<compile_context>
chip_gen: v7x
topology: tpu7x:2x2x1
jax: 0.10.0
libtpu: 0.0.40
codegen_flags: <defaults>
</compile_context>

<pallas_src>
import jax
import jax.numpy as jnp
from jax.experimental import pallas as pl
from jax.experimental.pallas import tpu as pltpu


def _pick_batch_block(n, c, hw, target_bytes=1 << 20):
    """Largest divisor of n giving ~target_bytes blocks, capped at n//2 so the
    grid keeps >=2 parallel steps (v7x has 2 TensorCores per chip)."""
    per_img = c * hw * 4
    cap = max(1, target_bytes // per_img)
    if n >= 2:
        cap = min(cap, n // 2)
    cap = max(1, min(cap, n))
    nb = 1
    for d in range(1, cap + 1):
        if n % d == 0:
            nb = d
    return nb


def cbam2_forward(x_nchw, w1, w2, wsp):
    """CBAM2 forward pass.

    x_nchw: (N, C, H, W) float32
    w1:  (C//r, C)  weight of Conv2d(C, C//r, 1, bias=False)   (squeezed)
    w2:  (C, C//r)  weight of Conv2d(C//r, C, 1, bias=False)   (squeezed)
    wsp: (2, k, k)  weight of Conv2d(2, 1, k, pad=k//2, bias=False) (squeezed)
    """
    N, C, H, W = x_nchw.shape
    Ch = int(w1.shape[0])
    HW = H * W
    kh, kw = int(wsp.shape[1]), int(wsp.shape[2])
    rh, rw = kh // 2, kw // 2
    PAD = rh * W + rw                         # max |dy*W + dx| shift
    inv_hw = 1.0 / float(HW)
    inv_c = 1.0 / float(C)

    NB = _pick_batch_block(N, C, HW)          # images per grid step

    # Free contiguous reshape (no data movement) + tiny weight reshapes.
    x_flat = x_nchw.reshape(N, C, HW)
    w2t = jnp.transpose(w2)                   # (Ch, C)
    wsp2 = wsp.reshape(2, kh * kw)            # (2, k*k) -> SMEM scalars

    def kernel(x_ref, w1_ref, w2t_ref, wsp_ref, o_ref):
        x = x_ref[...].astype(jnp.float32)                      # (NB, C, HW)

        # ---------------- channel attention ----------------
        p_max = jnp.max(x, axis=2)                              # (NB, C)
        p_avg = jnp.sum(x, axis=2) * inv_hw                     # (NB, C)
        pooled = jnp.concatenate([p_max, p_avg], axis=0)        # (2*NB, C)

        w1_v = w1_ref[...].astype(jnp.float32)                  # (Ch, C)
        w2t_v = w2t_ref[...].astype(jnp.float32)                # (Ch, C)

        # Fused two-branch MLP: C -> Ch -> C on the stacked pooled vectors.
        logit2 = jnp.zeros((2 * NB, C), jnp.float32)
        for j in range(Ch):
            hj = jnp.sum(pooled * w1_v[j:j + 1, :], axis=1,
                         keepdims=True)                         # (2*NB, 1)
            hj = jnp.maximum(hj, 0.0)                           # ReLU
            logit2 = logit2 + hj * w2t_v[j:j + 1, :]            # (2*NB, C)

        ch_logit = logit2[:NB] + logit2[NB:]                    # (NB, C)
        ch_att = 1.0 / (1.0 + jnp.exp(-ch_logit))               # sigmoid
        xc = x * ch_att[:, :, None]                             # (NB, C, HW)

        # ---------------- spatial attention ----------------
        s_max = jnp.max(xc, axis=1)                             # (NB, HW)
        s_avg = jnp.sum(xc, axis=1) * inv_c                     # (NB, HW)

        zpad = jnp.zeros((NB, PAD), jnp.float32)
        pmax = jnp.concatenate([zpad, s_max, zpad], axis=1)     # (NB, HW+2PAD)
        pavg = jnp.concatenate([zpad, s_avg, zpad], axis=1)

        col = jax.lax.broadcasted_iota(jnp.int32, (1, HW), 1) % W

        acc = jnp.zeros((NB, HW), jnp.float32)
        for dx in range(-rw, rw + 1):
            acc_dx = jnp.zeros((NB, HW), jnp.float32)
            for dy in range(-rh, rh + 1):
                tap = (dy + rh) * kw + (dx + rw)
                off = (dy + rh) * W + (dx + rw)
                # Scalar tap weights from SMEM; zero pad handles row edges.
                acc_dx = acc_dx + (wsp_ref[0, tap] * pmax[:, off:off + HW]
                                   + wsp_ref[1, tap] * pavg[:, off:off + HW])
            # Column-validity mask depends only on dx: hoisted out of dy loop.
            mask = jnp.logical_and(col + dx >= 0, col + dx < W)  # (1, HW)
            acc = acc + jnp.where(mask, acc_dx, 0.0)

        sp_att = 1.0 / (1.0 + jnp.exp(-acc))                     # (NB, HW)
        o_ref[...] = (xc * sp_att[:, None, :]).astype(o_ref.dtype)

    out_flat = pl.pallas_call(
        kernel,
        out_shape=jax.ShapeDtypeStruct((N, C, HW), x_nchw.dtype),
        grid_spec=pltpu.PrefetchScalarGridSpec(
            num_scalar_prefetch=0,
            grid=(N // NB,),
            in_specs=[
                pl.BlockSpec((NB, C, HW), lambda n: (n, 0, 0)),
                pl.BlockSpec((Ch, C), lambda n: (0, 0)),
                pl.BlockSpec((Ch, C), lambda n: (0, 0)),
                pl.BlockSpec(memory_space=pltpu.MemorySpace.SMEM),
            ],
            out_specs=pl.BlockSpec((NB, C, HW), lambda n: (n, 0, 0)),
        ),
        compiler_params=pltpu.CompilerParams(
            dimension_semantics=("parallel",)),
    )(x_flat, w1, w2t, wsp2)
    return out_flat.reshape(N, C, H, W)


def cbam2_reference(x, w1, w2, wsp):
    """Pure-JAX reference of the CBAM2 forward pass (f32-exact)."""
    hi = jax.lax.Precision.HIGHEST
    mx = jnp.max(x, axis=(2, 3), keepdims=True)
    av = jnp.mean(x, axis=(2, 3), keepdims=True)

    def mlp(p):
        h = jnp.einsum('nchw,oc->nohw', p, w1, precision=hi)
        h = jnp.maximum(h, 0.0)
        return jnp.einsum('nchw,oc->nohw', h, w2, precision=hi)

    ch_att = jax.nn.sigmoid(mlp(mx) + mlp(av))
    xc = ch_att * x
    smax = jnp.max(xc, axis=1, keepdims=True)
    savg = jnp.mean(xc, axis=1, keepdims=True)
    smap = jnp.concatenate([smax, savg], axis=1)
    conv = jax.lax.conv_general_dilated(
        smap, wsp[jnp.newaxis],
        window_strides=(1, 1),
        padding=((wsp.shape[1] // 2,) * 2, (wsp.shape[2] // 2,) * 2),
        dimension_numbers=('NCHW', 'OIHW', 'NCHW'),
        precision=hi)
    sp_att = jax.nn.sigmoid(conv)
    return sp_att * xc


if __name__ == "__main__":
    # CBAM2(channel=32, reduction=16, spatial_kernel=7)
    N, C, H, W = 2, 32, 16, 16
    reduction, spatial_kernel = 16, 7
    Ch = C // reduction                                  # 2

    key = jax.random.PRNGKey(0)
    k = jax.random.split(key, 4)
    x = jax.random.normal(k[0], (N, C, H, W), jnp.float32)
    w1 = jax.random.normal(k[1], (Ch, C), jnp.float32) * 0.2
    w2 = jax.random.normal(k[2], (C, Ch), jnp.float32) * 0.2
    wsp = jax.random.normal(k[3], (2, spatial_kernel, spatial_kernel),
                            jnp.float32) * 0.1

    out = cbam2_forward(x, w1, w2, wsp)
    out = jax.block_until_ready(out)

    ref = jax.block_until_ready(cbam2_reference(x, w1, w2, wsp))
    assert out.shape == (N, C, H, W), out.shape
    max_err = float(jnp.max(jnp.abs(out - ref)))
    assert jnp.allclose(out, ref, atol=1e-4, rtol=1e-4), max_err
    print("KERNEL_OK")
</pallas_src>

<mosaic_0001>
module attributes {stable_mosaic.version = 11 : i64} {
  func.func @kernel(%arg0: i32, %arg1: memref<1x32x256xf32, #tpu.memory_space<vmem>>, %arg2: memref<2x32xf32, #tpu.memory_space<vmem>>, %arg3: memref<2x32xf32, #tpu.memory_space<vmem>>, %arg4: memref<2x49xf32, #tpu.memory_space<smem>>, %arg5: memref<1x32x256xf32, #tpu.memory_space<vmem>>) attributes {dimension_semantics = [#tpu.dimension_semantics<parallel>], iteration_bounds = array<i64: 2>, scalar_prefetch = 0 : i64, scratch_operands = 0 : i64, tpu.core_type = #tpu.core_type<tc>, window_params = [{transform_indices = @transform_0, window_bounds = array<i64: 1, 32, 256>}, {pipeline_mode = #tpu.pipeline_mode<synchronous>, transform_indices = @transform_1, window_bounds = array<i64: 2, 32>}, {pipeline_mode = #tpu.pipeline_mode<synchronous>, transform_indices = @transform_2, window_bounds = array<i64: 2, 32>}, {transform_indices = @transform_3, window_bounds = array<i64: 2, 49>}, {transform_indices = @transform_4, window_bounds = array<i64: 1, 32, 256>}]} {
    %c0 = arith.constant 0 : index
    %c0_0 = arith.constant 0 : index
    %c0_1 = arith.constant 0 : index
    %0 = vector.load %arg1[%c0, %c0_0, %c0_1] : memref<1x32x256xf32, #tpu.memory_space<vmem>>, vector<1x32x256xf32>
    %cst = arith.constant dense<0xFF800000> : vector<1x32xf32>
    %1 = vector.multi_reduction <maximumf>, %0, %cst [2] : vector<1x32x256xf32> to vector<1x32xf32>
    %cst_2 = arith.constant dense<0.000000e+00> : vector<1x32xf32>
    %2 = vector.multi_reduction <add>, %0, %cst_2 [2] : vector<1x32x256xf32> to vector<1x32xf32>
    %cst_3 = arith.constant 3.906250e-03 : f32
    %3 = vector.broadcast %cst_3 : f32 to vector<1x32xf32>
    %4 = arith.mulf %2, %3 : vector<1x32xf32>
    %5 = tpu.concatenate %1, %4 in 0 : vector<1x32xf32>, vector<1x32xf32> -> vector<2x32xf32>
    %c0_4 = arith.constant 0 : index
    %c0_5 = arith.constant 0 : index
    %6 = vector.load %arg2[%c0_4, %c0_5] : memref<2x32xf32, #tpu.memory_space<vmem>>, vector<2x32xf32>
    %c0_6 = arith.constant 0 : index
    %c0_7 = arith.constant 0 : index
    %7 = vector.load %arg3[%c0_6, %c0_7] : memref<2x32xf32, #tpu.memory_space<vmem>>, vector<2x32xf32>
    %cst_8 = arith.constant 0.000000e+00 : f32
    %8 = vector.broadcast %cst_8 : f32 to vector<2x32xf32>
    %9 = vector.extract_strided_slice %6 {offsets = [0, 0], sizes = [1, 32], strides = [1, 1]} : vector<2x32xf32> to vector<1x32xf32>
    %10 = vector.broadcast %9 : vector<1x32xf32> to vector<2x32xf32>
    %11 = arith.mulf %5, %10 : vector<2x32xf32>
    %cst_9 = arith.constant dense<0.000000e+00> : vector<2xf32>
    %12 = vector.multi_reduction <add>, %11, %cst_9 [1] : vector<2x32xf32> to vector<2xf32>
    %13 = vector.shape_cast %12 : vector<2xf32> to vector<2x1xf32>
    %cst_10 = arith.constant 0.000000e+00 : f32
    %14 = vector.broadcast %cst_10 : f32 to vector<2x1xf32>
    %15 = arith.maximumf %13, %14 : vector<2x1xf32>
    %16 = vector.extract_strided_slice %7 {offsets = [0, 0], sizes = [1, 32], strides = [1, 1]} : vector<2x32xf32> to vector<1x32xf32>
    %17 = vector.broadcast %15 : vector<2x1xf32> to vector<2x32xf32>
    %18 = vector.broadcast %16 : vector<1x32xf32> to vector<2x32xf32>
    %19 = arith.mulf %17, %18 : vector<2x32xf32>
    %20 = arith.addf %8, %19 : vector<2x32xf32>
    %21 = vector.extract_strided_slice %6 {offsets = [1, 0], sizes = [1, 32], strides = [1, 1]} : vector<2x32xf32> to vector<1x32xf32>
    %22 = vector.broadcast %21 : vector<1x32xf32> to vector<2x32xf32>
    %23 = arith.mulf %5, %22 : vector<2x32xf32>
    %cst_11 = arith.constant dense<0.000000e+00> : vector<2xf32>
    %24 = vector.multi_reduction <add>, %23, %cst_11 [1] : vector<2x32xf32> to vector<2xf32>
    %25 = vector.shape_cast %24 : vector<2xf32> to vector<2x1xf32>
    %cst_12 = arith.constant 0.000000e+00 : f32
    %26 = vector.broadcast %cst_12 : f32 to vector<2x1xf32>
    %27 = arith.maximumf %25, %26 : vector<2x1xf32>
    %28 = vector.extract_strided_slice %7 {offsets = [1, 0], sizes = [1, 32], strides = [1, 1]} : vector<2x32xf32> to vector<1x32xf32>
    %29 = vector.broadcast %27 : vector<2x1xf32> to vector<2x32xf32>
    %30 = vector.broadcast %28 : vector<1x32xf32> to vector<2x32xf32>
    %31 = arith.mulf %29, %30 : vector<2x32xf32>
    %32 = arith.addf %20, %31 : vector<2x32xf32>
    %33 = vector.extract_strided_slice %32 {offsets = [0, 0], sizes = [1, 32], strides = [1, 1]} : vector<2x32xf32> to vector<1x32xf32>
    %34 = vector.extract_strided_slice %32 {offsets = [1, 0], sizes = [1, 32], strides = [1, 1]} : vector<2x32xf32> to vector<1x32xf32>
    %35 = arith.addf %33, %34 : vector<1x32xf32>
    %cst_13 = arith.constant 0.000000e+00 : f32
    %36 = vector.broadcast %cst_13 : f32 to vector<1x32xf32>
    %37 = arith.subf %36, %35 : vector<1x32xf32>
    %38 = math.exp %37 : vector<1x32xf32>
    %cst_14 = arith.constant 1.000000e+00 : f32
    %39 = vector.broadcast %cst_14 : f32 to vector<1x32xf32>
    %40 = arith.addf %39, %38 : vector<1x32xf32>
    %cst_15 = arith.constant 1.000000e+00 : f32
    %41 = vector.broadcast %cst_15 : f32 to vector<1x32xf32>
    %42 = arith.divf %41, %40 : vector<1x32xf32>
    %43 = vector.shape_cast %42 : vector<1x32xf32> to vector<1x32x1xf32>
    %44 = vector.broadcast %43 : vector<1x32x1xf32> to vector<1x32x256xf32>
    %45 = arith.mulf %0, %44 : vector<1x32x256xf32>
    %cst_16 = arith.constant dense<0xFF800000> : vector<1x256xf32>
    %46 = vector.multi_reduction <maximumf>, %45, %cst_16 [1] : vector<1x32x256xf32> to vector<1x256xf32>
    %cst_17 = arith.constant dense<0.000000e+00> : vector<1x256xf32>
    %47 = vector.multi_reduction <add>, %45, %cst_17 [1] : vector<1x32x256xf32> to vector<1x256xf32>
    %cst_18 = arith.constant 3.125000e-02 : f32
    %48 = vector.broadcast %cst_18 : f32 to vector<1x256xf32>
    %49 = arith.mulf %47, %48 : vector<1x256xf32>
    %cst_19 = arith.constant 0.000000e+00 : f32
    %50 = vector.broadcast %cst_19 : f32 to vector<1x51xf32>
    %51 = tpu.concatenate %50, %46, %50 in 1 : vector<1x51xf32>, vector<1x256xf32>, vector<1x51xf32> -> vector<1x358xf32>
    %52 = tpu.concatenate %50, %49, %50 in 1 : vector<1x51xf32>, vector<1x256xf32>, vector<1x51xf32> -> vector<1x358xf32>
    %53 = tpu.iota {dimensions = array<i32: 1>} : vector<1x256xi32>
    %c16_i32 = arith.constant 16 : i32
    %c0_i32 = arith.constant 0 : i32
    %54 = arith.cmpi eq, %c16_i32, %c0_i32 : i32
    %c1_i32 = arith.constant 1 : i32
    %55 = arith.select %54, %c1_i32, %c16_i32 : i32
    %56 = vector.broadcast %55 : i32 to vector<1x256xi32>
    %57 = arith.remsi %53, %56 : vector<1x256xi32>
    %c0_i32_20 = arith.constant 0 : i32
    %58 = vector.broadcast %c0_i32_20 : i32 to vector<1x256xi32>
    %59 = arith.cmpi ne, %57, %58 : vector<1x256xi32>
    %c0_i32_21 = arith.constant 0 : i32
    %60 = vector.broadcast %c0_i32_21 : i32 to vector<1x256xi32>
    %61 = arith.cmpi slt, %57, %60 : vector<1x256xi32>
    %c0_i32_22 = arith.constant 0 : i32
    %62 = arith.cmpi slt, %55, %c0_i32_22 : i32
    %63 = vector.broadcast %62 : i1 to vector<1x256xi1>
    %64 = vector.broadcast %63 : vector<1x256xi1> to vector<1x256xi1>
    %65 = arith.xori %61, %64 : vector<1x256xi1>
    %66 = arith.andi %65, %59 : vector<1x256xi1>
    %67 = vector.broadcast %55 : i32 to vector<1x256xi32>
    %68 = arith.addi %57, %67 : vector<1x256xi32>
    %69 = arith.select %66, %68, %57 : vector<1x256xi1>, vector<1x256xi32>
    %cst_23 = arith.constant 0.000000e+00 : f32
    %70 = vector.broadcast %cst_23 : f32 to vector<1x256xf32>
    %cst_24 = arith.constant 0.000000e+00 : f32
    %71 = vector.broadcast %cst_24 : f32 to vector<1x256xf32>
    %c0_25 = arith.constant 0 : index
    %c0_26 = arith.constant 0 : index
    %72 = memref.load %arg4[%c0_25, %c0_26] : memref<2x49xf32, #tpu.memory_space<smem>>
    %73 = vector.extract_strided_slice %51 {offsets = [0, 0], sizes = [1, 256], strides = [1, 1]} : vector<1x358xf32> to vector<1x256xf32>
    %74 = vector.broadcast %72 : f32 to vector<1x256xf32>
    %75 = arith.mulf %74, %73 : vector<1x256xf32>
    %c1 = arith.constant 1 : index
    %c0_27 = arith.constant 0 : index
    %76 = memref.load %arg4[%c1, %c0_27] : memref<2x49xf32, #tpu.memory_space<smem>>
    %77 = vector.extract_strided_slice %52 {offsets = [0, 0], sizes = [1, 256], strides = [1, 1]} : vector<1x358xf32> to vector<1x256xf32>
    %78 = vector.broadcast %76 : f32 to vector<1x256xf32>
    %79 = arith.mulf %78, %77 : vector<1x256xf32>
    %80 = arith.addf %75, %79 : vector<1x256xf32>
    %81 = arith.addf %71, %80 : vector<1x256xf32>
    %c0_28 = arith.constant 0 : index
    %c7 = arith.constant 7 : index
    %82 = memref.load %arg4[%c0_28, %c7] : memref<2x49xf32, #tpu.memory_space<smem>>
    %83 = vector.extract_strided_slice %51 {offsets = [0, 16], sizes = [1, 256], strides = [1, 1]} : vector<1x358xf32> to vector<1x256xf32>
    %84 = vector.broadcast %82 : f32 to vector<1x256xf32>
    %85 = arith.mulf %84, %83 : vector<1x256xf32>
    %c1_29 = arith.constant 1 : index
    %c7_30 = arith.constant 7 : index
    %86 = memref.load %arg4[%c1_29, %c7_30] : memref<2x49xf32, #tpu.memory_space<smem>>
    %87 = vector.extract_strided_slice %52 {offsets = [0, 16], sizes = [1, 256], strides = [1, 1]} : vector<1x358xf32> to vector<1x256xf32>
    %88 = vector.broadcast %86 : f32 to vector<1x256xf32>
    %89 = arith.mulf %88, %87 : vector<1x256xf32>
    %90 = arith.addf %85, %89 : vector<1x256xf32>
    %91 = arith.addf %81, %90 : vector<1x256xf32>
    %c0_31 = arith.constant 0 : index
    %c14 = arith.constant 14 : index
    %92 = memref.load %arg4[%c0_31, %c14] : memref<2x49xf32, #tpu.memory_space<smem>>
    %93 = vector.extract_strided_slice %51 {offsets = [0, 32], sizes = [1, 256], strides = [1, 1]} : vector<1x358xf32> to vector<1x256xf32>
    %94 = vector.broadcast %92 : f32 to vector<1x256xf32>
    %95 = arith.mulf %94, %93 : vector<1x256xf32>
    %c1_32 = arith.constant 1 : index
    %c14_33 = arith.constant 14 : index
    %96 = memref.load %arg4[%c1_32, %c14_33] : memref<2x49xf32, #tpu.memory_space<smem>>
    %97 = vector.extract_strided_slice %52 {offsets = [0, 32], sizes = [1, 256], strides = [1, 1]} : vector<1x358xf32> to vector<1x256xf32>
    %98 = vector.broadcast %96 : f32 to vector<1x256xf32>
    %99 = arith.mulf %98, %97 : vector<1x256xf32>
    %100 = arith.addf %95, %99 : vector<1x256xf32>
    %101 = arith.addf %91, %100 : vector<1x256xf32>
    %c0_34 = arith.constant 0 : index
    %c21 = arith.constant 21 : index
    %102 = memref.load %arg4[%c0_34, %c21] : memref<2x49xf32, #tpu.memory_space<smem>>
    %103 = vector.extract_strided_slice %51 {offsets = [0, 48], sizes = [1, 256], strides = [1, 1]} : vector<1x358xf32> to vector<1x256xf32>
    %104 = vector.broadcast %102 : f32 to vector<1x256xf32>
    %105 = arith.mulf %104, %103 : vector<1x256xf32>
    %c1_35 = arith.constant 1 : index
    %c21_36 = arith.constant 21 : index
    %106 = memref.load %arg4[%c1_35, %c21_36] : memref<2x49xf32, #tpu.memory_space<smem>>
    %107 = vector.extract_strided_slice %52 {offsets = [0, 48], sizes = [1, 256], strides = [1, 1]} : vector<1x358xf32> to vector<1x256xf32>
    %108 = vector.broadcast %106 : f32 to vector<1x256xf32>
    %109 = arith.mulf %108, %107 : vector<1x256xf32>
    %110 = arith.addf %105, %109 : vector<1x256xf32>
    %111 = arith.addf %101, %110 : vector<1x256xf32>
    %c0_37 = arith.constant 0 : index
    %c28 = arith.constant 28 : index
    %112 = memref.load %arg4[%c0_37, %c28] : memref<2x49xf32, #tpu.memory_space<smem>>
    %113 = vector.extract_strided_slice %51 {offsets = [0, 64], sizes = [1, 256], strides = [1, 1]} : vector<1x358xf32> to vector<1x256xf32>
    %114 = vector.broadcast %112 : f32 to vector<1x256xf32>
    %115 = arith.mulf %114, %113 : vector<1x256xf32>
    %c1_38 = arith.constant 1 : index
    %c28_39 = arith.constant 28 : index
    %116 = memref.load %arg4[%c1_38, %c28_39] : memref<2x49xf32, #tpu.memory_space<smem>>
    %117 = vector.extract_strided_slice %52 {offsets = [0, 64], sizes = [1, 256], strides = [1, 1]} : vector<1x358xf32> to vector<1x256xf32>
    %118 = vector.broadcast %116 : f32 to vector<1x256xf32>
    %119 = arith.mulf %118, %117 : vector<1x256xf32>
    %120 = arith.addf %115, %119 : vector<1x256xf32>
    %121 = arith.addf %111, %120 : vector<1x256xf32>
    %c0_40 = arith.constant 0 : index
    %c35 = arith.constant 35 : index
    %122 = memref.load %arg4[%c0_40, %c35] : memref<2x49xf32, #tpu.memory_space<smem>>
    %123 = vector.extract_strided_slice %51 {offsets = [0, 80], sizes = [1, 256], strides = [1, 1]} : vector<1x358xf32> to vector<1x256xf32>
    %124 = vector.broadcast %122 : f32 to vector<1x256xf32>
    %125 = arith.mulf %124, %123 : vector<1x256xf32>
    %c1_41 = arith.constant 1 : index
    %c35_42 = arith.constant 35 : index
    %126 = memref.load %arg4[%c1_41, %c35_42] : memref<2x49xf32, #tpu.memory_space<smem>>
    %127 = vector.extract_strided_slice %52 {offsets = [0, 80], sizes = [1, 256], strides = [1, 1]} : vector<1x358xf32> to vector<1x256xf32>
    %128 = vector.broadcast %126 : f32 to vector<1x256xf32>
    %129 = arith.mulf %128, %127 : vector<1x256xf32>
    %130 = arith.addf %125, %129 : vector<1x256xf32>
    %131 = arith.addf %121, %130 : vector<1x256xf32>
    %c0_43 = arith.constant 0 : index
    %c42 = arith.constant 42 : index
    %132 = memref.load %arg4[%c0_43, %c42] : memref<2x49xf32, #tpu.memory_space<smem>>
    %133 = vector.extract_strided_slice %51 {offsets = [0, 96], sizes = [1, 256], strides = [1, 1]} : vector<1x358xf32> to vector<1x256xf32>
    %134 = vector.broadcast %132 : f32 to vector<1x256xf32>
    %135 = arith.mulf %134, %133 : vector<1x256xf32>
    %c1_44 = arith.constant 1 : index
    %c42_45 = arith.constant 42 : index
    %136 = memref.load %arg4[%c1_44, %c42_45] : memref<2x49xf32, #tpu.memory_space<smem>>
    %137 = vector.extract_strided_slice %52 {offsets = [0, 96], sizes = [1, 256], strides = [1, 1]} : vector<1x358xf32> to vector<1x256xf32>
    %138 = vector.broadcast %136 : f32 to vector<1x256xf32>
    %139 = arith.mulf %138, %137 : vector<1x256xf32>
    %140 = arith.addf %135, %139 : vector<1x256xf32>
    %141 = arith.addf %131, %140 : vector<1x256xf32>
    %c-3_i32 = arith.constant -3 : i32
    %142 = vector.broadcast %c-3_i32 : i32 to vector<1x256xi32>
    %143 = arith.addi %69, %142 : vector<1x256xi32>
    %c0_i32_46 = arith.constant 0 : i32
    %144 = vector.broadcast %c0_i32_46 : i32 to vector<1x256xi32>
    %145 = arith.cmpi sge, %143, %144 : vector<1x256xi32>
    %c-3_i32_47 = arith.constant -3 : i32
    %146 = vector.broadcast %c-3_i32_47 : i32 to vector<1x256xi32>
    %147 = arith.addi %69, %146 : vector<1x256xi32>
    %c16_i32_48 = arith.constant 16 : i32
    %148 = vector.broadcast %c16_i32_48 : i32 to vector<1x256xi32>
    %149 = arith.cmpi slt, %147, %148 : vector<1x256xi32>
    %150 = arith.andi %145, %149 : vector<1x256xi1>
    %cst_49 = arith.constant 0.000000e+00 : f32
    %151 = vector.broadcast %cst_49 : f32 to vector<1x256xf32>
    %152 = arith.select %150, %141, %151 : vector<1x256xi1>, vector<1x256xf32>
    %153 = arith.addf %70, %152 : vector<1x256xf32>
    %cst_50 = arith.constant 0.000000e+00 : f32
    %154 = vector.broadcast %cst_50 : f32 to vector<1x256xf32>
    %c0_51 = arith.constant 0 : index
    %c1_52 = arith.constant 1 : index
    %155 = memref.load %arg4[%c0_51, %c1_52] : memref<2x49xf32, #tpu.memory_space<smem>>
    %156 = vector.extract_strided_slice %51 {offsets = [0, 1], sizes = [1, 256], strides = [1, 1]} : vector<1x358xf32> to vector<1x256xf32>
    %157 = vector.broadcast %155 : f32 to vector<1x256xf32>
    %158 = arith.mulf %157, %156 : vector<1x256xf32>
    %c1_53 = arith.constant 1 : index
    %c1_54 = arith.constant 1 : index
    %159 = memref.load %arg4[%c1_53, %c1_54] : memref<2x49xf32, #tpu.memory_space<smem>>
    %160 = vector.extract_strided_slice %52 {offsets = [0, 1], sizes = [1, 256], strides = [1, 1]} : vector<1x358xf32> to vector<1x256xf32>
    %161 = vector.broadcast %159 : f32 to vector<1x256xf32>
    %162 = arith.mulf %161, %160 : vector<1x256xf32>
    %163 = arith.addf %158, %162 : vector<1x256xf32>
    %164 = arith.addf %154, %163 : vector<1x256xf32>
    %c0_55 = arith.constant 0 : index
    %c8 = arith.constant 8 : index
    %165 = memref.load %arg4[%c0_55, %c8] : memref<2x49xf32, #tpu.memory_space<smem>>
    %166 = vector.extract_strided_slice %51 {offsets = [0, 17], sizes = [1, 256], strides = [1, 1]} : vector<1x358xf32> to vector<1x256xf32>
    %167 = vector.broadcast %165 : f32 to vector<1x256xf32>
    %168 = arith.mulf %167, %166 : vector<1x256xf32>
    %c1_56 = arith.constant 1 : index
    %c8_57 = arith.constant 8 : index
    %169 = memref.load %arg4[%c1_56, %c8_57] : memref<2x49xf32, #tpu.memory_space<smem>>
    %170 = vector.extract_strided_slice %52 {offsets = [0, 17], sizes = [1, 256], strides = [1, 1]} : vector<1x358xf32> to vector<1x256xf32>
    %171 = vector.broadcast %169 : f32 to vector<1x256xf32>
    %172 = arith.mulf %171, %170 : vector<1x256xf32>
    %173 = arith.addf %168, %172 : vector<1x256xf32>
    %174 = arith.addf %164, %173 : vector<1x256xf32>
    %c0_58 = arith.constant 0 : index
    %c15 = arith.constant 15 : index
    %175 = memref.load %arg4[%c0_58, %c15] : memref<2x49xf32, #tpu.memory_space<smem>>
    %176 = vector.extract_strided_slice %51 {offsets = [0, 33], sizes = [1, 256], strides = [1, 1]} : vector<1x358xf32> to vector<1x256xf32>
    %177 = vector.broadcast %175 : f32 to vector<1x256xf32>
    %178 = arith.mulf %177, %176 : vector<1x256xf32>
    %c1_59 = arith.constant 1 : index
    %c15_60 = arith.constant 15 : index
    %179 = memref.load %arg4[%c1_59, %c15_60] : memref<2x49xf32, #tpu.memory_space<smem>>
    %180 = vector.extract_strided_slice %52 {offsets = [0, 33], sizes = [1, 256], strides = [1, 1]} : vector<1x358xf32> to vector<1x256xf32>
    %181 = vector.broadcast %179 : f32 to vector<1x256xf32>
    %182 = arith.mulf %181, %180 : vector<1x256xf32>
    %183 = arith.addf %178, %182 : vector<1x256xf32>
    %184 = arith.addf %174, %183 : vector<1x256xf32>
    %c0_61 = arith.constant 0 : index
    %c22 = arith.constant 22 : index
    %185 = memref.load %arg4[%c0_61, %c22] : memref<2x49xf32, #tpu.memory_space<smem>>
    %186 = vector.extract_strided_slice %51 {offsets = [0, 49], sizes = [1, 256], strides = [1, 1]} : vector<1x358xf32> to vector<1x256xf32>
    %187 = vector.broadcast %185 : f32 to vector<1x256xf32>
    %188 = arith.mulf %187, %186 : vector<1x256xf32>
    %c1_62 = arith.constant 1 : index
    %c22_63 = arith.constant 22 : index
    %189 = memref.load %arg4[%c1_62, %c22_63] : memref<2x49xf32, #tpu.memory_space<smem>>
    %190 = vector.extract_strided_slice %52 {offsets = [0, 49], sizes = [1, 256], strides = [1, 1]} : vector<1x358xf32> to vector<1x256xf32>
    %191 = vector.broadcast %189 : f32 to vector<1x256xf32>
    %192 = arith.mulf %191, %190 : vector<1x256xf32>
    %193 = arith.addf %188, %192 : vector<1x256xf32>
    %194 = arith.addf %184, %193 : vector<1x256xf32>
    %c0_64 = arith.constant 0 : index
    %c29 = arith.constant 29 : index
    %195 = memref.load %arg4[%c0_64, %c29] : memref<2x49xf32, #tpu.memory_space<smem>>
    %196 = vector.extract_strided_slice %51 {offsets = [0, 65], sizes = [1, 256], strides = [1, 1]} : vector<1x358xf32> to vector<1x256xf32>
    %197 = vector.broadcast %195 : f32 to vector<1x256xf32>
    %198 = arith.mulf %197, %196 : vector<1x256xf32>
    %c1_65 = arith.constant 1 : index
    %c29_66 = arith.constant 29 : index
    %199 = memref.load %arg4[%c1_65, %c29_66] : memref<2x49xf32, #tpu.memory_space<smem>>
    %200 = vector.extract_strided_slice %52 {offsets = [0, 65], sizes = [1, 256], strides = [1, 1]} : vector<1x358xf32> to vector<1x256xf32>
    %201 = vector.broadcast %199 : f32 to vector<1x256xf32>
    %202 = arith.mulf %201, %200 : vector<1x256xf32>
    %203 = arith.addf %198, %202 : vector<1x256xf32>
    %204 = arith.addf %194, %203 : vector<1x256xf32>
    %c0_67 = arith.constant 0 : index
    %c36 = arith.constant 36 : index
    %205 = memref.load %arg4[%c0_67, %c36] : memref<2x49xf32, #tpu.memory_space<smem>>
    %206 = vector.extract_strided_slice %51 {offsets = [0, 81], sizes = [1, 256], strides = [1, 1]} : vector<1x358xf32> to vector<1x256xf32>
    %207 = vector.broadcast %205 : f32 to vector<1x256xf32>
    %208 = arith.mulf %207, %206 : vector<1x256xf32>
    %c1_68 = arith.constant 1 : index
    %c36_69 = arith.constant 36 : index
    %209 = memref.load %arg4[%c1_68, %c36_69] : memref<2x49xf32, #tpu.memory_space<smem>>
    %210 = vector.extract_strided_slice %52 {offsets = [0, 81], sizes = [1, 256], strides = [1, 1]} : vector<1x358xf32> to vector<1x256xf32>
    %211 = vector.broadcast %209 : f32 to vector<1x256xf32>
    %212 = arith.mulf %211, %210 : vector<1x256xf32>
    %213 = arith.addf %208, %212 : vector<1x256xf32>
    %214 = arith.addf %204, %213 : vector<1x256xf32>
    %c0_70 = arith.constant 0 : index
    %c43 = arith.constant 43 : index
    %215 = memref.load %arg4[%c0_70, %c43] : memref<2x49xf32, #tpu.memory_space<smem>>
    %216 = vector.extract_strided_slice %51 {offsets = [0, 97], sizes = [1, 256], strides = [1, 1]} : vector<1x358xf32> to vector<1x256xf32>
    %217 = vector.broadcast %215 : f32 to vector<1x256xf32>
    %218 = arith.mulf %217, %216 : vector<1x256xf32>
    %c1_71 = arith.constant 1 : index
    %c43_72 = arith.constant 43 : index
    %219 = memref.load %arg4[%c1_71, %c43_72] : memref<2x49xf32, #tpu.memory_space<smem>>
    %220 = vector.extract_strided_slice %52 {offsets = [0, 97], sizes = [1, 256], strides = [1, 1]} : vector<1x358xf32> to vector<1x256xf32>
    %221 = vector.broadcast %219 : f32 to vector<1x256xf32>
    %222 = arith.mulf %221, %220 : vector<1x256xf32>
    %223 = arith.addf %218, %222 : vector<1x256xf32>
    %224 = arith.addf %214, %223 : vector<1x256xf32>
    %c-2_i32 = arith.constant -2 : i32
    %225 = vector.broadcast %c-2_i32 : i32 to vector<1x256xi32>
    %226 = arith.addi %69, %225 : vector<1x256xi32>
    %c0_i32_73 = arith.constant 0 : i32
    %227 = vector.broadcast %c0_i32_73 : i32 to vector<1x256xi32>
    %228 = arith.cmpi sge, %226, %227 : vector<1x256xi32>
    %c-2_i32_74 = arith.constant -2 : i32
    %229 = vector.broadcast %c-2_i32_74 : i32 to vector<1x256xi32>
    %230 = arith.addi %69, %229 : vector<1x256xi32>
    %c16_i32_75 = arith.constant 16 : i32
    %231 = vector.broadcast %c16_i32_75 : i32 to vector<1x256xi32>
    %232 = arith.cmpi slt, %230, %231 : vector<1x256xi32>
    %233 = arith.andi %228, %232 : vector<1x256xi1>
    %cst_76 = arith.constant 0.000000e+00 : f32
    %234 = vector.broadcast %cst_76 : f32 to vector<1x256xf32>
    %235 = arith.select %233, %224, %234 : vector<1x256xi1>, vector<1x256xf32>
    %236 = arith.addf %153, %235 : vector<1x256xf32>
    %cst_77 = arith.constant 0.000000e+00 : f32
    %237 = vector.broadcast %cst_77 : f32 to vector<1x256xf32>
    %c0_78 = arith.constant 0 : index
    %c2 = arith.constant 2 : index
    %238 = memref.load %arg4[%c0_78, %c2] : memref<2x49xf32, #tpu.memory_space<smem>>
    %239 = vector.extract_strided_slice %51 {offsets = [0, 2], sizes = [1, 256], strides = [1, 1]} : vector<1x358xf32> to vector<1x256xf32>
    %240 = vector.broadcast %238 : f32 to vector<1x256xf32>
    %241 = arith.mulf %240, %239 : vector<1x256xf32>
    %c1_79 = arith.constant 1 : index
    %c2_80 = arith.constant 2 : index
    %242 = memref.load %arg4[%c1_79, %c2_80] : memref<2x49xf32, #tpu.memory_space<smem>>
    %243 = vector.extract_strided_slice %52 {offsets = [0, 2], sizes = [1, 256], strides = [1, 1]} : vector<1x358xf32> to vector<1x256xf32>
    %244 = vector.broadcast %242 : f32 to vector<1x256xf32>
    %245 = arith.mulf %244, %243 : vector<1x256xf32>
    %246 = arith.addf %241, %245 : vector<1x256xf32>
    %247 = arith.addf %237, %246 : vector<1x256xf32>
    %c0_81 = arith.constant 0 : index
    %c9 = arith.constant 9 : index
    %248 = memref.load %arg4[%c0_81, %c9] : memref<2x49xf32, #tpu.memory_space<smem>>
    %249 = vector.extract_strided_slice %51 {offsets = [0, 18], sizes = [1, 256], strides = [1, 1]} : vector<1x358xf32> to vector<1x256xf32>
    %250 = vector.broadcast %248 : f32 to vector<1x256xf32>
    %251 = arith.mulf %250, %249 : vector<1x256xf32>
    %c1_82 = arith.constant 1 : index
    %c9_83 = arith.constant 9 : index
    %252 = memref.load %arg4[%c1_82, %c9_83] : memref<2x49xf32, #tpu.memory_space<smem>>
    %253 = vector.extract_strided_slice %52 {offsets = [0, 18], sizes = [1, 256], strides = [1, 1]} : vector<1x358xf32> to vector<1x256xf32>
    %254 = vector.broadcast %252 : f32 to vector<1x256xf32>
    %255 = arith.mulf %254, %253 : vector<1x256xf32>
    %256 = arith.addf %251, %255 : vector<1x256xf32>
    %257 = arith.addf %247, %256 : vector<1x256xf32>
    %c0_84 = arith.constant 0 : index
    %c16 = arith.constant 16 : index
    %258 = memref.load %arg4[%c0_84, %c16] : memref<2x49xf32, #tpu.memory_space<smem>>
    %259 = vector.extract_strided_slice %51 {offsets = [0, 34], sizes = [1, 256], strides = [1, 1]} : vector<1x358xf32> to vector<1x256xf32>
    %260 = vector.broadcast %258 : f32 to vector<1x256xf32>
    %261 = arith.mulf %260, %259 : vector<1x256xf32>
    %c1_85 = arith.constant 1 : index
    %c16_86 = arith.constant 16 : index
    %262 = memref.load %arg4[%c1_85, %c16_86] : memref<2x49xf32, #tpu.memory_space<smem>>
    %263 = vector.extract_strided_slice %52 {offsets = [0, 34], sizes = [1, 256], strides = [1, 1]} : vector<1x358xf32> to vector<1x256xf32>
    %264 = vector.broadcast %262 : f32 to vector<1x256xf32>
    %265 = arith.mulf %264, %263 : vector<1x256xf32>
    %266 = arith.addf %261, %265 : vector<1x256xf32>
    %267 = arith.addf %257, %266 : vector<1x256xf32>
    %c0_87 = arith.constant 0 : index
    %c23 = arith.constant 23 : index
    %268 = memref.load %arg4[%c0_87, %c23] : memref<2x49xf32, #tpu.memory_space<smem>>
    %269 = vector.extract_strided_slice %51 {offsets = [0, 50], sizes = [1, 256], strides = [1, 1]} : vector<1x358xf32> to vector<1x256xf32>
    %270 = vector.broadcast %268 : f32 to vector<1x256xf32>
    %271 = arith.mulf %270, %269 : vector<1x256xf32>
    %c1_88 = arith.constant 1 : index
    %c23_89 = arith.constant 23 : index
    %272 = memref.load %arg4[%c1_88, %c23_89] : memref<2x49xf32, #tpu.memory_space<smem>>
    %273 = vector.extract_strided_slice %52 {offsets = [0, 50], sizes = [1, 256], strides = [1, 1]} : vector<1x358xf32> to vector<1x256xf32>
    %274 = vector.broadcast %272 : f32 to vector<1x256xf32>
    %275 = arith.mulf %274, %273 : vector<1x256xf32>
    %276 = arith.addf %271, %275 : vector<1x256xf32>
    %277 = arith.addf %267, %276 : vector<1x256xf32>
    %c0_90 = arith.constant 0 : index
    %c30 = arith.constant 30 : index
    %278 = memref.load %arg4[%c0_90, %c30] : memref<2x49xf32, #tpu.memory_space<smem>>
    %279 = vector.extract_strided_slice %51 {offsets = [0, 66], sizes = [1, 256], strides = [1, 1]} : vector<1x358xf32> to vector<1x256xf32>
    %280 = vector.broadcast %278 : f32 to vector<1x256xf32>
    %281 = arith.mulf %280, %279 : vector<1x256xf32>
    %c1_91 = arith.constant 1 : index
    %c30_92 = arith.constant 30 : index
    %282 = memref.load %arg4[%c1_91, %c30_92] : memref<2x49xf32, #tpu.memory_space<smem>>
    %283 = vector.extract_strided_slice %52 {offsets = [0, 66], sizes = [1, 256], strides = [1, 1]} : vector<1x358xf32> to vector<1x256xf32>
    %284 = vector.broadcast %282 : f32 to vector<1x256xf32>
    %285 = arith.mulf %284, %283 : vector<1x256xf32>
    %286 = arith.addf %281, %285 : vector<1x256xf32>
    %287 = arith.addf %277, %286 : vector<1x256xf32>
    %c0_93 = arith.constant 0 : index
    %c37 = arith.constant 37 : index
    %288 = memref.load %arg4[%c0_93, %c37] : memref<2x49xf32, #tpu.memory_space<smem>>
    %289 = vector.extract_strided_slice %51 {offsets = [0, 82], sizes = [1, 256], strides = [1, 1]} : vector<1x358xf32> to vector<1x256xf32>
    %290 = vector.broadcast %288 : f32 to vector<1x256xf32>
    %291 = arith.mulf %290, %289 : vector<1x256xf32>
    %c1_94 = arith.constant 1 : index
    %c37_95 = arith.constant 37 : index
    %292 = memref.load %arg4[%c1_94, %c37_95] : memref<2x49xf32, #tpu.memory_space<smem>>
    %293 = vector.extract_strided_slice %52 {offsets = [0, 82], sizes = [1, 256], strides = [1, 1]} : vector<1x358xf32> to vector<1x256xf32>
    %294 = vector.broadcast %292 : f32 to vector<1x256xf32>
    %295 = arith.mulf %294, %293 : vector<1x256xf32>
    %296 = arith.addf %291, %295 : vector<1x256xf32>
    %297 = arith.addf %287, %296 : vector<1x256xf32>
    %c0_96 = arith.constant 0 : index
    %c44 = arith.constant 44 : index
    %298 = memref.load %arg4[%c0_96, %c44] : memref<2x49xf32, #tpu.memory_space<smem>>
    %299 = vector.extract_strided_slice %51 {offsets = [0, 98], sizes = [1, 256], strides = [1, 1]} : vector<1x358xf32> to vector<1x256xf32>
    %300 = vector.broadcast %298 : f32 to vector<1x256xf32>
    %301 = arith.mulf %300, %299 : vector<1x256xf32>
    %c1_97 = arith.constant 1 : index
    %c44_98 = arith.constant 44 : index
    %302 = memref.load %arg4[%c1_97, %c44_98] : memref<2x49xf32, #tpu.memory_space<smem>>
    %303 = vector.extract_strided_slice %52 {offsets = [0, 98], sizes = [1, 256], strides = [1, 1]} : vector<1x358xf32> to vector<1x256xf32>
    %304 = vector.broadcast %302 : f32 to vector<1x256xf32>
    %305 = arith.mulf %304, %303 : vector<1x256xf32>
    %306 = arith.addf %301, %305 : vector<1x256xf32>
    %307 = arith.addf %297, %306 : vector<1x256xf32>
    %c-1_i32 = arith.constant -1 : i32
    %308 = vector.broadcast %c-1_i32 : i32 to vector<1x256xi32>
    %309 = arith.addi %69, %308 : vector<1x256xi32>
    %c0_i32_99 = arith.constant 0 : i32
    %310 = vector.broadcast %c0_i32_99 : i32 to vector<1x256xi32>
    %311 = arith.cmpi sge, %309, %310 : vector<1x256xi32>
    %c-1_i32_100 = arith.constant -1 : i32
    %312 = vector.broadcast %c-1_i32_100 : i32 to vector<1x256xi32>
    %313 = arith.addi %69, %312 : vector<1x256xi32>
    %c16_i32_101 = arith.constant 16 : i32
    %314 = vector.broadcast %c16_i32_101 : i32 to vector<1x256xi32>
    %315 = arith.cmpi slt, %313, %314 : vector<1x256xi32>
    %316 = arith.andi %311, %315 : vector<1x256xi1>
    %cst_102 = arith.constant 0.000000e+00 : f32
    %317 = vector.broadcast %cst_102 : f32 to vector<1x256xf32>
    %318 = arith.select %316, %307, %317 : vector<1x256xi1>, vector<1x256xf32>
    %319 = arith.addf %236, %318 : vector<1x256xf32>
    %cst_103 = arith.constant 0.000000e+00 : f32
    %320 = vector.broadcast %cst_103 : f32 to vector<1x256xf32>
    %c0_104 = arith.constant 0 : index
    %c3 = arith.constant 3 : index
    %321 = memref.load %arg4[%c0_104, %c3] : memref<2x49xf32, #tpu.memory_space<smem>>
    %322 = vector.extract_strided_slice %51 {offsets = [0, 3], sizes = [1, 256], strides = [1, 1]} : vector<1x358xf32> to vector<1x256xf32>
    %323 = vector.broadcast %321 : f32 to vector<1x256xf32>
    %324 = arith.mulf %323, %322 : vector<1x256xf32>
    %c1_105 = arith.constant 1 : index
    %c3_106 = arith.constant 3 : index
    %325 = memref.load %arg4[%c1_105, %c3_106] : memref<2x49xf32, #tpu.memory_space<smem>>
    %326 = vector.extract_strided_slice %52 {offsets = [0, 3], sizes = [1, 256], strides = [1, 1]} : vector<1x358xf32> to vector<1x256xf32>
    %327 = vector.broadcast %325 : f32 to vector<1x256xf32>
    %328 = arith.mulf %327, %326 : vector<1x256xf32>
    %329 = arith.addf %324, %328 : vector<1x256xf32>
    %330 = arith.addf %320, %329 : vector<1x256xf32>
    %c0_107 = arith.constant 0 : index
    %c10 = arith.constant 10 : index
    %331 = memref.load %arg4[%c0_107, %c10] : memref<2x49xf32, #tpu.memory_space<smem>>
    %332 = vector.extract_strided_slice %51 {offsets = [0, 19], sizes = [1, 256], strides = [1, 1]} : vector<1x358xf32> to vector<1x256xf32>
    %333 = vector.broadcast %331 : f32 to vector<1x256xf32>
    %334 = arith.mulf %333, %332 : vector<1x256xf32>
    %c1_108 = arith.constant 1 : index
    %c10_109 = arith.constant 10 : index
    %335 = memref.load %arg4[%c1_108, %c10_109] : memref<2x49xf32, #tpu.memory_space<smem>>
    %336 = vector.extract_strided_slice %52 {offsets = [0, 19], sizes = [1, 256], strides = [1, 1]} : vector<1x358xf32> to vector<1x256xf32>
    %337 = vector.broadcast %335 : f32 to vector<1x256xf32>
    %338 = arith.mulf %337, %336 : vector<1x256xf32>
    %339 = arith.addf %334, %338 : vector<1x256xf32>
    %340 = arith.addf %330, %339 : vector<1x256xf32>
    %c0_110 = arith.constant 0 : index
    %c17 = arith.constant 17 : index
    %341 = memref.load %arg4[%c0_110, %c17] : memref<2x49xf32, #tpu.memory_space<smem>>
    %342 = vector.extract_strided_slice %51 {offsets = [0, 35], sizes = [1, 256], strides = [1, 1]} : vector<1x358xf32> to vector<1x256xf32>
    %343 = vector.broadcast %341 : f32 to vector<1x256xf32>
    %344 = arith.mulf %343, %342 : vector<1x256xf32>
    %c1_111 = arith.constant 1 : index
    %c17_112 = arith.constant 17 : index
    %345 = memref.load %arg4[%c1_111, %c17_112] : memref<2x49xf32, #tpu.memory_space<smem>>
    %346 = vector.extract_strided_slice %52 {offsets = [0, 35], sizes = [1, 256], strides = [1, 1]} : vector<1x358xf32> to vector<1x256xf32>
    %347 = vector.broadcast %345 : f32 to vector<1x256xf32>
    %348 = arith.mulf %347, %346 : vector<1x256xf32>
    %349 = arith.addf %344, %348 : vector<1x256xf32>
    %350 = arith.addf %340, %349 : vector<1x256xf32>
    %c0_113 = arith.constant 0 : index
    %c24 = arith.constant 24 : index
    %351 = memref.load %arg4[%c0_113, %c24] : memref<2x49xf32, #tpu.memory_space<smem>>
    %352 = vector.extract_strided_slice %51 {offsets = [0, 51], sizes = [1, 256], strides = [1, 1]} : vector<1x358xf32> to vector<1x256xf32>
    %353 = vector.broadcast %351 : f32 to vector<1x256xf32>
    %354 = arith.mulf %353, %352 : vector<1x256xf32>
    %c1_114 = arith.constant 1 : index
    %c24_115 = arith.constant 24 : index
    %355 = memref.load %arg4[%c1_114, %c24_115] : memref<2x49xf32, #tpu.memory_space<smem>>
    %356 = vector.extract_strided_slice %52 {offsets = [0, 51], sizes = [1, 256], strides = [1, 1]} : vector<1x358xf32> to vector<1x256xf32>
    %357 = vector.broadcast %355 : f32 to vector<1x256xf32>
    %358 = arith.mulf %357, %356 : vector<1x256xf32>
    %359 = arith.addf %354, %358 : vector<1x256xf32>
    %360 = arith.addf %350, %359 : vector<1x256xf32>
    %c0_116 = arith.constant 0 : index
    %c31 = arith.constant 31 : index
    %361 = memref.load %arg4[%c0_116, %c31] : memref<2x49xf32, #tpu.memory_space<smem>>
    %362 = vector.extract_strided_slice %51 {offsets = [0, 67], sizes = [1, 256], strides = [1, 1]} : vector<1x358xf32> to vector<1x256xf32>
    %363 = vector.broadcast %361 : f32 to vector<1x256xf32>
    %364 = arith.mulf %363, %362 : vector<1x256xf32>
    %c1_117 = arith.constant 1 : index
    %c31_118 = arith.constant 31 : index
    %365 = memref.load %arg4[%c1_117, %c31_118] : memref<2x49xf32, #tpu.memory_space<smem>>
    %366 = vector.extract_strided_slice %52 {offsets = [0, 67], sizes = [1, 256], strides = [1, 1]} : vector<1x358xf32> to vector<1x256xf32>
    %367 = vector.broadcast %365 : f32 to vector<1x256xf32>
    %368 = arith.mulf %367, %366 : vector<1x256xf32>
    %369 = arith.addf %364, %368 : vector<1x256xf32>
    %370 = arith.addf %360, %369 : vector<1x256xf32>
    %c0_119 = arith.constant 0 : index
    %c38 = arith.constant 38 : index
    %371 = memref.load %arg4[%c0_119, %c38] : memref<2x49xf32, #tpu.memory_space<smem>>
    %372 = vector.extract_strided_slice %51 {offsets = [0, 83], sizes = [1, 256], strides = [1, 1]} : vector<1x358xf32> to vector<1x256xf32>
    %373 = vector.broadcast %371 : f32 to vector<1x256xf32>
    %374 = arith.mulf %373, %372 : vector<1x256xf32>
    %c1_120 = arith.constant 1 : index
    %c38_121 = arith.constant 38 : index
    %375 = memref.load %arg4[%c1_120, %c38_121] : memref<2x49xf32, #tpu.memory_space<smem>>
    %376 = vector.extract_strided_slice %52 {offsets = [0, 83], sizes = [1, 256], strides = [1, 1]} : vector<1x358xf32> to vector<1x256xf32>
    %377 = vector.broadcast %375 : f32 to vector<1x256xf32>
    %378 = arith.mulf %377, %376 : vector<1x256xf32>
    %379 = arith.addf %374, %378 : vector<1x256xf32>
    %380 = arith.addf %370, %379 : vector<1x256xf32>
    %c0_122 = arith.constant 0 : index
    %c45 = arith.constant 45 : index
    %381 = memref.load %arg4[%c0_122, %c45] : memref<2x49xf32, #tpu.memory_space<smem>>
    %382 = vector.extract_strided_slice %51 {offsets = [0, 99], sizes = [1, 256], strides = [1, 1]} : vector<1x358xf32> to vector<1x256xf32>
    %383 = vector.broadcast %381 : f32 to vector<1x256xf32>
    %384 = arith.mulf %383, %382 : vector<1x256xf32>
    %c1_123 = arith.constant 1 : index
    %c45_124 = arith.constant 45 : index
    %385 = memref.load %arg4[%c1_123, %c45_124] : memref<2x49xf32, #tpu.memory_space<smem>>
    %386 = vector.extract_strided_slice %52 {offsets = [0, 99], sizes = [1, 256], strides = [1, 1]} : vector<1x358xf32> to vector<1x256xf32>
    %387 = vector.broadcast %385 : f32 to vector<1x256xf32>
    %388 = arith.mulf %387, %386 : vector<1x256xf32>
    %389 = arith.addf %384, %388 : vector<1x256xf32>
    %390 = arith.addf %380, %389 : vector<1x256xf32>
    %c0_i32_125 = arith.constant 0 : i32
    %391 = vector.broadcast %c0_i32_125 : i32 to vector<1x256xi32>
    %392 = arith.addi %69, %391 : vector<1x256xi32>
    %c0_i32_126 = arith.constant 0 : i32
    %393 = vector.broadcast %c0_i32_126 : i32 to vector<1x256xi32>
    %394 = arith.cmpi sge, %392, %393 : vector<1x256xi32>
    %c0_i32_127 = arith.constant 0 : i32
    %395 = vector.broadcast %c0_i32_127 : i32 to vector<1x256xi32>
    %396 = arith.addi %69, %395 : vector<1x256xi32>
    %c16_i32_128 = arith.constant 16 : i32
    %397 = vector.broadcast %c16_i32_128 : i32 to vector<1x256xi32>
    %398 = arith.cmpi slt, %396, %397 : vector<1x256xi32>
    %399 = arith.andi %394, %398 : vector<1x256xi1>
    %cst_129 = arith.constant 0.000000e+00 : f32
    %400 = vector.broadcast %cst_129 : f32 to vector<1x256xf32>
    %401 = arith.select %399, %390, %400 : vector<1x256xi1>, vector<1x256xf32>
    %402 = arith.addf %319, %401 : vector<1x256xf32>
    %cst_130 = arith.constant 0.000000e+00 : f32
    %403 = vector.broadcast %cst_130 : f32 to vector<1x256xf32>
    %c0_131 = arith.constant 0 : index
    %c4 = arith.constant 4 : index
    %404 = memref.load %arg4[%c0_131, %c4] : memref<2x49xf32, #tpu.memory_space<smem>>
    %405 = vector.extract_strided_slice %51 {offsets = [0, 4], sizes = [1, 256], strides = [1, 1]} : vector<1x358xf32> to vector<1x256xf32>
    %406 = vector.broadcast %404 : f32 to vector<1x256xf32>
    %407 = arith.mulf %406, %405 : vector<1x256xf32>
    %c1_132 = arith.constant 1 : index
    %c4_133 = arith.constant 4 : index
    %408 = memref.load %arg4[%c1_132, %c4_133] : memref<2x49xf32, #tpu.memory_space<smem>>
    %409 = vector.extract_strided_slice %52 {offsets = [0, 4], sizes = [1, 256], strides = [1, 1]} : vector<1x358xf32> to vector<1x256xf32>
    %410 = vector.broadcast %408 : f32 to vector<1x256xf32>
    %411 = arith.mulf %410, %409 : vector<1x256xf32>
    %412 = arith.addf %407, %411 : vector<1x256xf32>
    %413 = arith.addf %403, %412 : vector<1x256xf32>
    %c0_134 = arith.constant 0 : index
    %c11 = arith.constant 11 : index
    %414 = memref.load %arg4[%c0_134, %c11] : memref<2x49xf32, #tpu.memory_space<smem>>
    %415 = vector.extract_strided_slice %51 {offsets = [0, 20], sizes = [1, 256], strides = [1, 1]} : vector<1x358xf32> to vector<1x256xf32>
    %416 = vector.broadcast %414 : f32 to vector<1x256xf32>
    %417 = arith.mulf %416, %415 : vector<1x256xf32>
    %c1_135 = arith.constant 1 : index
    %c11_136 = arith.constant 11 : index
    %418 = memref.load %arg4[%c1_135, %c11_136] : memref<2x49xf32, #tpu.memory_space<smem>>
    %419 = vector.extract_strided_slice %52 {offsets = [0, 20], sizes = [1, 256], strides = [1, 1]} : vector<1x358xf32> to vector<1x256xf32>
    %420 = vector.broadcast %418 : f32 to vector<1x256xf32>
    %421 = arith.mulf %420, %419 : vector<1x256xf32>
    %422 = arith.addf %417, %421 : vector<1x256xf32>
    %423 = arith.addf %413, %422 : vector<1x256xf32>
    %c0_137 = arith.constant 0 : index
    %c18 = arith.constant 18 : index
    %424 = memref.load %arg4[%c0_137, %c18] : memref<2x49xf32, #tpu.memory_space<smem>>
    %425 = vector.extract_strided_slice %51 {offsets = [0, 36], sizes = [1, 256], strides = [1, 1]} : vector<1x358xf32> to vector<1x256xf32>
    %426 = vector.broadcast %424 : f32 to vector<1x256xf32>
    %427 = arith.mulf %426, %425 : vector<1x256xf32>
    %c1_138 = arith.constant 1 : index
    %c18_139 = arith.constant 18 : index
    %428 = memref.load %arg4[%c1_138, %c18_139] : memref<2x49xf32, #tpu.memory_space<smem>>
    %429 = vector.extract_strided_slice %52 {offsets = [0, 36], sizes = [1, 256], strides = [1, 1]} : vector<1x358xf32> to vector<1x256xf32>
    %430 = vector.broadcast %428 : f32 to vector<1x256xf32>
    %431 = arith.mulf %430, %429 : vector<1x256xf32>
    %432 = arith.addf %427, %431 : vector<1x256xf32>
    %433 = arith.addf %423, %432 : vector<1x256xf32>
    %c0_140 = arith.constant 0 : index
    %c25 = arith.constant 25 : index
    %434 = memref.load %arg4[%c0_140, %c25] : memref<2x49xf32, #tpu.memory_space<smem>>
    %435 = vector.extract_strided_slice %51 {offsets = [0, 52], sizes = [1, 256], strides = [1, 1]} : vector<1x358xf32> to vector<1x256xf32>
    %436 = vector.broadcast %434 : f32 to vector<1x256xf32>
    %437 = arith.mulf %436, %435 : vector<1x256xf32>
    %c1_141 = arith.constant 1 : index
    %c25_142 = arith.constant 25 : index
    %438 = memref.load %arg4[%c1_141, %c25_142] : memref<2x49xf32, #tpu.memory_space<smem>>
    %439 = vector.extract_strided_slice %52 {offsets = [0, 52], sizes = [1, 256], strides = [1, 1]} : vector<1x358xf32> to vector<1x256xf32>
    %440 = vector.broadcast %438 : f32 to vector<1x256xf32>
    %441 = arith.mulf %440, %439 : vector<1x256xf32>
    %442 = arith.addf %437, %441 : vector<1x256xf32>
    %443 = arith.addf %433, %442 : vector<1x256xf32>
    %c0_143 = arith.constant 0 : index
    %c32 = arith.constant 32 : index
    %444 = memref.load %arg4[%c0_143, %c32] : memref<2x49xf32, #tpu.memory_space<smem>>
    %445 = vector.extract_strided_slice %51 {offsets = [0, 68], sizes = [1, 256], strides = [1, 1]} : vector<1x358xf32> to vector<1x256xf32>
    %446 = vector.broadcast %444 : f32 to vector<1x256xf32>
    %447 = arith.mulf %446, %445 : vector<1x256xf32>
    %c1_144 = arith.constant 1 : index
    %c32_145 = arith.constant 32 : index
    %448 = memref.load %arg4[%c1_144, %c32_145] : memref<2x49xf32, #tpu.memory_space<smem>>
    %449 = vector.extract_strided_slice %52 {offsets = [0, 68], sizes = [1, 256], strides = [1, 1]} : vector<1x358xf32> to vector<1x256xf32>
    %450 = vector.broadcast %448 : f32 to vector<1x256xf32>
    %451 = arith.mulf %450, %449 : vector<1x256xf32>
    %452 = arith.addf %447, %451 : vector<1x256xf32>
    %453 = arith.addf %443, %452 : vector<1x256xf32>
    %c0_146 = arith.constant 0 : index
    %c39 = arith.constant 39 : index
    %454 = memref.load %arg4[%c0_146, %c39] : memref<2x49xf32, #tpu.memory_space<smem>>
    %455 = vector.extract_strided_slice %51 {offsets = [0, 84], sizes = [1, 256], strides = [1, 1]} : vector<1x358xf32> to vector<1x256xf32>
    %456 = vector.broadcast %454 : f32 to vector<1x256xf32>
    %457 = arith.mulf %456, %455 : vector<1x256xf32>
    %c1_147 = arith.constant 1 : index
    %c39_148 = arith.constant 39 : index
    %458 = memref.load %arg4[%c1_147, %c39_148] : memref<2x49xf32, #tpu.memory_space<smem>>
    %459 = vector.extract_strided_slice %52 {offsets = [0, 84], sizes = [1, 256], strides = [1, 1]} : vector<1x358xf32> to vector<1x256xf32>
    %460 = vector.broadcast %458 : f32 to vector<1x256xf32>
    %461 = arith.mulf %460, %459 : vector<1x256xf32>
    %462 = arith.addf %457, %461 : vector<1x256xf32>
    %463 = arith.addf %453, %462 : vector<1x256xf32>
    %c0_149 = arith.constant 0 : index
    %c46 = arith.constant 46 : index
    %464 = memref.load %arg4[%c0_149, %c46] : memref<2x49xf32, #tpu.memory_space<smem>>
    %465 = vector.extract_strided_slice %51 {offsets = [0, 100], sizes = [1, 256], strides = [1, 1]} : vector<1x358xf32> to vector<1x256xf32>
    %466 = vector.broadcast %464 : f32 to vector<1x256xf32>
    %467 = arith.mulf %466, %465 : vector<1x256xf32>
    %c1_150 = arith.constant 1 : index
    %c46_151 = arith.constant 46 : index
    %468 = memref.load %arg4[%c1_150, %c46_151] : memref<2x49xf32, #tpu.memory_space<smem>>
    %469 = vector.extract_strided_slice %52 {offsets = [0, 100], sizes = [1, 256], strides = [1, 1]} : vector<1x358xf32> to vector<1x256xf32>
    %470 = vector.broadcast %468 : f32 to vector<1x256xf32>
    %471 = arith.mulf %470, %469 : vector<1x256xf32>
    %472 = arith.addf %467, %471 : vector<1x256xf32>
    %473 = arith.addf %463, %472 : vector<1x256xf32>
    %c1_i32_152 = arith.constant 1 : i32
    %474 = vector.broadcast %c1_i32_152 : i32 to vector<1x256xi32>
    %475 = arith.addi %69, %474 : vector<1x256xi32>
    %c0_i32_153 = arith.constant 0 : i32
    %476 = vector.broadcast %c0_i32_153 : i32 to vector<1x256xi32>
    %477 = arith.cmpi sge, %475, %476 : vector<1x256xi32>
    %c1_i32_154 = arith.constant 1 : i32
    %478 = vector.broadcast %c1_i32_154 : i32 to vector<1x256xi32>
    %479 = arith.addi %69, %478 : vector<1x256xi32>
    %c16_i32_155 = arith.constant 16 : i32
    %480 = vector.broadcast %c16_i32_155 : i32 to vector<1x256xi32>
    %481 = arith.cmpi slt, %479, %480 : vector<1x256xi32>
    %482 = arith.andi %477, %481 : vector<1x256xi1>
    %cst_156 = arith.constant 0.000000e+00 : f32
    %483 = vector.broadcast %cst_156 : f32 to vector<1x256xf32>
    %484 = arith.select %482, %473, %483 : vector<1x256xi1>, vector<1x256xf32>
    %485 = arith.addf %402, %484 : vector<1x256xf32>
    %cst_157 = arith.constant 0.000000e+00 : f32
    %486 = vector.broadcast %cst_157 : f32 to vector<1x256xf32>
    %c0_158 = arith.constant 0 : index
    %c5 = arith.constant 5 : index
    %487 = memref.load %arg4[%c0_158, %c5] : memref<2x49xf32, #tpu.memory_space<smem>>
    %488 = vector.extract_strided_slice %51 {offsets = [0, 5], sizes = [1, 256], strides = [1, 1]} : vector<1x358xf32> to vector<1x256xf32>
    %489 = vector.broadcast %487 : f32 to vector<1x256xf32>
    %490 = arith.mulf %489, %488 : vector<1x256xf32>
    %c1_159 = arith.constant 1 : index
    %c5_160 = arith.constant 5 : index
    %491 = memref.load %arg4[%c1_159, %c5_160] : memref<2x49xf32, #tpu.memory_space<smem>>
    %492 = vector.extract_strided_slice %52 {offsets = [0, 5], sizes = [1, 256], strides = [1, 1]} : vector<1x358xf32> to vector<1x256xf32>
    %493 = vector.broadcast %491 : f32 to vector<1x256xf32>
    %494 = arith.mulf %493, %492 : vector<1x256xf32>
    %495 = arith.addf %490, %494 : vector<1x256xf32>
    %496 = arith.addf %486, %495 : vector<1x256xf32>
    %c0_161 = arith.constant 0 : index
    %c12 = arith.constant 12 : index
    %497 = memref.load %arg4[%c0_161, %c12] : memref<2x49xf32, #tpu.memory_space<smem>>
    %498 = vector.extract_strided_slice %51 {offsets = [0, 21], sizes = [1, 256], strides = [1, 1]} : vector<1x358xf32> to vector<1x256xf32>
    %499 = vector.broadcast %497 : f32 to vector<1x256xf32>
    %500 = arith.mulf %499, %498 : vector<1x256xf32>
    %c1_162 = arith.constant 1 : index
    %c12_163 = arith.constant 12 : index
    %501 = memref.load %arg4[%c1_162, %c12_163] : memref<2x49xf32, #tpu.memory_space<smem>>
    %502 = vector.extract_strided_slice %52 {offsets = [0, 21], sizes = [1, 256], strides = [1, 1]} : vector<1x358xf32> to vector<1x256xf32>
    %503 = vector.broadcast %501 : f32 to vector<1x256xf32>
    %504 = arith.mulf %503, %502 : vector<1x256xf32>
    %505 = arith.addf %500, %504 : vector<1x256xf32>
    %506 = arith.addf %496, %505 : vector<1x256xf32>
    %c0_164 = arith.constant 0 : index
    %c19 = arith.constant 19 : index
    %507 = memref.load %arg4[%c0_164, %c19] : memref<2x49xf32, #tpu.memory_space<smem>>
    %508 = vector.extract_strided_slice %51 {offsets = [0, 37], sizes = [1, 256], strides = [1, 1]} : vector<1x358xf32> to vector<1x256xf32>
    %509 = vector.broadcast %507 : f32 to vector<1x256xf32>
    %510 = arith.mulf %509, %508 : vector<1x256xf32>
    %c1_165 = arith.constant 1 : index
    %c19_166 = arith.constant 19 : index
    %511 = memref.load %arg4[%c1_165, %c19_166] : memref<2x49xf32, #tpu.memory_space<smem>>
    %512 = vector.extract_strided_slice %52 {offsets = [0, 37], sizes = [1, 256], strides = [1, 1]} : vector<1x358xf32> to vector<1x256xf32>
    %513 = vector.broadcast %511 : f32 to vector<1x256xf32>
    %514 = arith.mulf %513, %512 : vector<1x256xf32>
    %515 = arith.addf %510, %514 : vector<1x256xf32>
    %516 = arith.addf %506, %515 : vector<1x256xf32>
    %c0_167 = arith.constant 0 : index
    %c26 = arith.constant 26 : index
    %517 = memref.load %arg4[%c0_167, %c26] : memref<2x49xf32, #tpu.memory_space<smem>>
    %518 = vector.extract_strided_slice %51 {offsets = [0, 53], sizes = [1, 256], strides = [1, 1]} : vector<1x358xf32> to vector<1x256xf32>
    %519 = vector.broadcast %517 : f32 to vector<1x256xf32>
    %520 = arith.mulf %519, %518 : vector<1x256xf32>
    %c1_168 = arith.constant 1 : index
    %c26_169 = arith.constant 26 : index
    %521 = memref.load %arg4[%c1_168, %c26_169] : memref<2x49xf32, #tpu.memory_space<smem>>
    %522 = vector.extract_strided_slice %52 {offsets = [0, 53], sizes = [1, 256], strides = [1, 1]} : vector<1x358xf32> to vector<1x256xf32>
    %523 = vector.broadcast %521 : f32 to vector<1x256xf32>
    %524 = arith.mulf %523, %522 : vector<1x256xf32>
    %525 = arith.addf %520, %524 : vector<1x256xf32>
    %526 = arith.addf %516, %525 : vector<1x256xf32>
    %c0_170 = arith.constant 0 : index
    %c33 = arith.constant 33 : index
    %527 = memref.load %arg4[%c0_170, %c33] : memref<2x49xf32, #tpu.memory_space<smem>>
    %528 = vector.extract_strided_slice %51 {offsets = [0, 69], sizes = [1, 256], strides = [1, 1]} : vector<1x358xf32> to vector<1x256xf32>
    %529 = vector.broadcast %527 : f32 to vector<1x256xf32>
    %530 = arith.mulf %529, %528 : vector<1x256xf32>
    %c1_171 = arith.constant 1 : index
    %c33_172 = arith.constant 33 : index
    %531 = memref.load %arg4[%c1_171, %c33_172] : memref<2x49xf32, #tpu.memory_space<smem>>
    %532 = vector.extract_strided_slice %52 {offsets = [0, 69], sizes = [1, 256], strides = [1, 1]} : vector<1x358xf32> to vector<1x256xf32>
    %533 = vector.broadcast %531 : f32 to vector<1x256xf32>
    %534 = arith.mulf %533, %532 : vector<1x256xf32>
    %535 = arith.addf %530, %534 : vector<1x256xf32>
    %536 = arith.addf %526, %535 : vector<1x256xf32>
    %c0_173 = arith.constant 0 : index
    %c40 = arith.constant 40 : index
    %537 = memref.load %arg4[%c0_173, %c40] : memref<2x49xf32, #tpu.memory_space<smem>>
    %538 = vector.extract_strided_slice %51 {offsets = [0, 85], sizes = [1, 256], strides = [1, 1]} : vector<1x358xf32> to vector<1x256xf32>
    %539 = vector.broadcast %537 : f32 to vector<1x256xf32>
    %540 = arith.mulf %539, %538 : vector<1x256xf32>
    %c1_174 = arith.constant 1 : index
    %c40_175 = arith.constant 40 : index
    %541 = memref.load %arg4[%c1_174, %c40_175] : memref<2x49xf32, #tpu.memory_space<smem>>
    %542 = vector.extract_strided_slice %52 {offsets = [0, 85], sizes = [1, 256], strides = [1, 1]} : vector<1x358xf32> to vector<1x256xf32>
    %543 = vector.broadcast %541 : f32 to vector<1x256xf32>
    %544 = arith.mulf %543, %542 : vector<1x256xf32>
    %545 = arith.addf %540, %544 : vector<1x256xf32>
    %546 = arith.addf %536, %545 : vector<1x256xf32>
    %c0_176 = arith.constant 0 : index
    %c47 = arith.constant 47 : index
    %547 = memref.load %arg4[%c0_176, %c47] : memref<2x49xf32, #tpu.memory_space<smem>>
    %548 = vector.extract_strided_slice %51 {offsets = [0, 101], sizes = [1, 256], strides = [1, 1]} : vector<1x358xf32> to vector<1x256xf32>
    %549 = vector.broadcast %547 : f32 to vector<1x256xf32>
    %550 = arith.mulf %549, %548 : vector<1x256xf32>
    %c1_177 = arith.constant 1 : index
    %c47_178 = arith.constant 47 : index
    %551 = memref.load %arg4[%c1_177, %c47_178] : memref<2x49xf32, #tpu.memory_space<smem>>
    %552 = vector.extract_strided_slice %52 {offsets = [0, 101], sizes = [1, 256], strides = [1, 1]} : vector<1x358xf32> to vector<1x256xf32>
    %553 = vector.broadcast %551 : f32 to vector<1x256xf32>
    %554 = arith.mulf %553, %552 : vector<1x256xf32>
    %555 = arith.addf %550, %554 : vector<1x256xf32>
    %556 = arith.addf %546, %555 : vector<1x256xf32>
    %c2_i32 = arith.constant 2 : i32
    %557 = vector.broadcast %c2_i32 : i32 to vector<1x256xi32>
    %558 = arith.addi %69, %557 : vector<1x256xi32>
    %c0_i32_179 = arith.constant 0 : i32
    %559 = vector.broadcast %c0_i32_179 : i32 to vector<1x256xi32>
    %560 = arith.cmpi sge, %558, %559 : vector<1x256xi32>
    %c2_i32_180 = arith.constant 2 : i32
    %561 = vector.broadcast %c2_i32_180 : i32 to vector<1x256xi32>
    %562 = arith.addi %69, %561 : vector<1x256xi32>
    %c16_i32_181 = arith.constant 16 : i32
    %563 = vector.broadcast %c16_i32_181 : i32 to vector<1x256xi32>
    %564 = arith.cmpi slt, %562, %563 : vector<1x256xi32>
    %565 = arith.andi %560, %564 : vector<1x256xi1>
    %cst_182 = arith.constant 0.000000e+00 : f32
    %566 = vector.broadcast %cst_182 : f32 to vector<1x256xf32>
    %567 = arith.select %565, %556, %566 : vector<1x256xi1>, vector<1x256xf32>
    %568 = arith.addf %485, %567 : vector<1x256xf32>
    %cst_183 = arith.constant 0.000000e+00 : f32
    %569 = vector.broadcast %cst_183 : f32 to vector<1x256xf32>
    %c0_184 = arith.constant 0 : index
    %c6 = arith.constant 6 : index
    %570 = memref.load %arg4[%c0_184, %c6] : memref<2x49xf32, #tpu.memory_space<smem>>
    %571 = vector.extract_strided_slice %51 {offsets = [0, 6], sizes = [1, 256], strides = [1, 1]} : vector<1x358xf32> to vector<1x256xf32>
    %572 = vector.broadcast %570 : f32 to vector<1x256xf32>
    %573 = arith.mulf %572, %571 : vector<1x256xf32>
    %c1_185 = arith.constant 1 : index
    %c6_186 = arith.constant 6 : index
    %574 = memref.load %arg4[%c1_185, %c6_186] : memref<2x49xf32, #tpu.memory_space<smem>>
    %575 = vector.extract_strided_slice %52 {offsets = [0, 6], sizes = [1, 256], strides = [1, 1]} : vector<1x358xf32> to vector<1x256xf32>
    %576 = vector.broadcast %574 : f32 to vector<1x256xf32>
    %577 = arith.mulf %576, %575 : vector<1x256xf32>
    %578 = arith.addf %573, %577 : vector<1x256xf32>
    %579 = arith.addf %569, %578 : vector<1x256xf32>
    %c0_187 = arith.constant 0 : index
    %c13 = arith.constant 13 : index
    %580 = memref.load %arg4[%c0_187, %c13] : memref<2x49xf32, #tpu.memory_space<smem>>
    %581 = vector.extract_strided_slice %51 {offsets = [0, 22], sizes = [1, 256], strides = [1, 1]} : vector<1x358xf32> to vector<1x256xf32>
    %582 = vector.broadcast %580 : f32 to vector<1x256xf32>
    %583 = arith.mulf %582, %581 : vector<1x256xf32>
    %c1_188 = arith.constant 1 : index
    %c13_189 = arith.constant 13 : index
    %584 = memref.load %arg4[%c1_188, %c13_189] : memref<2x49xf32, #tpu.memory_space<smem>>
    %585 = vector.extract_strided_slice %52 {offsets = [0, 22], sizes = [1, 256], strides = [1, 1]} : vector<1x358xf32> to vector<1x256xf32>
    %586 = vector.broadcast %584 : f32 to vector<1x256xf32>
    %587 = arith.mulf %586, %585 : vector<1x256xf32>
    %588 = arith.addf %583, %587 : vector<1x256xf32>
    %589 = arith.addf %579, %588 : vector<1x256xf32>
    %c0_190 = arith.constant 0 : index
    %c20 = arith.constant 20 : index
    %590 = memref.load %arg4[%c0_190, %c20] : memref<2x49xf32, #tpu.memory_space<smem>>
    %591 = vector.extract_strided_slice %51 {offsets = [0, 38], sizes = [1, 256], strides = [1, 1]} : vector<1x358xf32> to vector<1x256xf32>
    %592 = vector.broadcast %590 : f32 to vector<1x256xf32>
    %593 = arith.mulf %592, %591 : vector<1x256xf32>
    %c1_191 = arith.constant 1 : index
    %c20_192 = arith.constant 20 : index
    %594 = memref.load %arg4[%c1_191, %c20_192] : memref<2x49xf32, #tpu.memory_space<smem>>
    %595 = vector.extract_strided_slice %52 {offsets = [0, 38], sizes = [1, 256], strides = [1, 1]} : vector<1x358xf32> to vector<1x256xf32>
    %596 = vector.broadcast %594 : f32 to vector<1x256xf32>
    %597 = arith.mulf %596, %595 : vector<1x256xf32>
    %598 = arith.addf %593, %597 : vector<1x256xf32>
    %599 = arith.addf %589, %598 : vector<1x256xf32>
    %c0_193 = arith.constant 0 : index
    %c27 = arith.constant 27 : index
    %600 = memref.load %arg4[%c0_193, %c27] : memref<2x49xf32, #tpu.memory_space<smem>>
    %601 = vector.extract_strided_slice %51 {offsets = [0, 54], sizes = [1, 256], strides = [1, 1]} : vector<1x358xf32> to vector<1x256xf32>
    %602 = vector.broadcast %600 : f32 to vector<1x256xf32>
    %603 = arith.mulf %602, %601 : vector<1x256xf32>
    %c1_194 = arith.constant 1 : index
    %c27_195 = arith.constant 27 : index
    %604 = memref.load %arg4[%c1_194, %c27_195] : memref<2x49xf32, #tpu.memory_space<smem>>
    %605 = vector.extract_strided_slice %52 {offsets = [0, 54], sizes = [1, 256], strides = [1, 1]} : vector<1x358xf32> to vector<1x256xf32>
    %606 = vector.broadcast %604 : f32 to vector<1x256xf32>
    %607 = arith.mulf %606, %605 : vector<1x256xf32>
    %608 = arith.addf %603, %607 : vector<1x256xf32>
    %609 = arith.addf %599, %608 : vector<1x256xf32>
    %c0_196 = arith.constant 0 : index
    %c34 = arith.constant 34 : index
    %610 = memref.load %arg4[%c0_196, %c34] : memref<2x49xf32, #tpu.memory_space<smem>>
    %611 = vector.extract_strided_slice %51 {offsets = [0, 70], sizes = [1, 256], strides = [1, 1]} : vector<1x358xf32> to vector<1x256xf32>
    %612 = vector.broadcast %610 : f32 to vector<1x256xf32>
    %613 = arith.mulf %612, %611 : vector<1x256xf32>
    %c1_197 = arith.constant 1 : index
    %c34_198 = arith.constant 34 : index
    %614 = memref.load %arg4[%c1_197, %c34_198] : memref<2x49xf32, #tpu.memory_space<smem>>
    %615 = vector.extract_strided_slice %52 {offsets = [0, 70], sizes = [1, 256], strides = [1, 1]} : vector<1x358xf32> to vector<1x256xf32>
    %616 = vector.broadcast %614 : f32 to vector<1x256xf32>
    %617 = arith.mulf %616, %615 : vector<1x256xf32>
    %618 = arith.addf %613, %617 : vector<1x256xf32>
    %619 = arith.addf %609, %618 : vector<1x256xf32>
    %c0_199 = arith.constant 0 : index
    %c41 = arith.constant 41 : index
    %620 = memref.load %arg4[%c0_199, %c41] : memref<2x49xf32, #tpu.memory_space<smem>>
    %621 = vector.extract_strided_slice %51 {offsets = [0, 86], sizes = [1, 256], strides = [1, 1]} : vector<1x358xf32> to vector<1x256xf32>
    %622 = vector.broadcast %620 : f32 to vector<1x256xf32>
    %623 = arith.mulf %622, %621 : vector<1x256xf32>
    %c1_200 = arith.constant 1 : index
    %c41_201 = arith.constant 41 : index
    %624 = memref.load %arg4[%c1_200, %c41_201] : memref<2x49xf32, #tpu.memory_space<smem>>
    %625 = vector.extract_strided_slice %52 {offsets = [0, 86], sizes = [1, 256], strides = [1, 1]} : vector<1x358xf32> to vector<1x256xf32>
    %626 = vector.broadcast %624 : f32 to vector<1x256xf32>
    %627 = arith.mulf %626, %625 : vector<1x256xf32>
    %628 = arith.addf %623, %627 : vector<1x256xf32>
    %629 = arith.addf %619, %628 : vector<1x256xf32>
    %c0_202 = arith.constant 0 : index
    %c48 = arith.constant 48 : index
    %630 = memref.load %arg4[%c0_202, %c48] : memref<2x49xf32, #tpu.memory_space<smem>>
    %631 = vector.extract_strided_slice %51 {offsets = [0, 102], sizes = [1, 256], strides = [1, 1]} : vector<1x358xf32> to vector<1x256xf32>
    %632 = vector.broadcast %630 : f32 to vector<1x256xf32>
    %633 = arith.mulf %632, %631 : vector<1x256xf32>
    %c1_203 = arith.constant 1 : index
    %c48_204 = arith.constant 48 : index
    %634 = memref.load %arg4[%c1_203, %c48_204] : memref<2x49xf32, #tpu.memory_space<smem>>
    %635 = vector.extract_strided_slice %52 {offsets = [0, 102], sizes = [1, 256], strides = [1, 1]} : vector<1x358xf32> to vector<1x256xf32>
    %636 = vector.broadcast %634 : f32 to vector<1x256xf32>
    %637 = arith.mulf %636, %635 : vector<1x256xf32>
    %638 = arith.addf %633, %637 : vector<1x256xf32>
    %639 = arith.addf %629, %638 : vector<1x256xf32>
    %c3_i32 = arith.constant 3 : i32
    %640 = vector.broadcast %c3_i32 : i32 to vector<1x256xi32>
    %641 = arith.addi %69, %640 : vector<1x256xi32>
    %c0_i32_205 = arith.constant 0 : i32
    %642 = vector.broadcast %c0_i32_205 : i32 to vector<1x256xi32>
    %643 = arith.cmpi sge, %641, %642 : vector<1x256xi32>
    %c3_i32_206 = arith.constant 3 : i32
    %644 = vector.broadcast %c3_i32_206 : i32 to vector<1x256xi32>
    %645 = arith.addi %69, %644 : vector<1x256xi32>
    %c16_i32_207 = arith.constant 16 : i32
    %646 = vector.broadcast %c16_i32_207 : i32 to vector<1x256xi32>
    %647 = arith.cmpi slt, %645, %646 : vector<1x256xi32>
    %648 = arith.andi %643, %647 : vector<1x256xi1>
    %cst_208 = arith.constant 0.000000e+00 : f32
    %649 = vector.broadcast %cst_208 : f32 to vector<1x256xf32>
    %650 = arith.select %648, %639, %649 : vector<1x256xi1>, vector<1x256xf32>
    %651 = arith.addf %568, %650 : vector<1x256xf32>
    %cst_209 = arith.constant 0.000000e+00 : f32
    %652 = vector.broadcast %cst_209 : f32 to vector<1x256xf32>
    %653 = arith.subf %652, %651 : vector<1x256xf32>
    %654 = math.exp %653 : vector<1x256xf32>
    %cst_210 = arith.constant 1.000000e+00 : f32
    %655 = vector.broadcast %cst_210 : f32 to vector<1x256xf32>
    %656 = arith.addf %655, %654 : vector<1x256xf32>
    %cst_211 = arith.constant 1.000000e+00 : f32
    %657 = vector.broadcast %cst_211 : f32 to vector<1x256xf32>
    %658 = arith.divf %657, %656 : vector<1x256xf32>
    %659 = vector.shape_cast %658 : vector<1x256xf32> to vector<1x1x256xf32>
    %660 = vector.broadcast %659 : vector<1x1x256xf32> to vector<1x32x256xf32>
    %661 = arith.mulf %45, %660 : vector<1x32x256xf32>
    %c0_212 = arith.constant 0 : index
    %c0_213 = arith.constant 0 : index
    %c0_214 = arith.constant 0 : index
    %662 = vector.load %arg5[%c0_212, %c0_213, %c0_214] : memref<1x32x256xf32, #tpu.memory_space<vmem>>, vector<1x32x256xf32>
    tpu.vector_store %arg5[%c0_212, %c0_213, %c0_214], %661 {strides = array<i32>} : memref<1x32x256xf32, #tpu.memory_space<vmem>>, vector<1x32x256xf32>,
    return
  }
  func.func @transform_0(%arg0: i32) -> (i32, i32, i32) {
    %c0_i32 = arith.constant 0 : i32
    %c0_i32_0 = arith.constant 0 : i32
    %c0_i32_1 = arith.constant 0 : i32
    return %arg0, %c0_i32, %c0_i32_0 : i32, i32, i32
  }
  func.func @transform_1(%arg0: i32) -> (i32, i32) {
    %c0_i32 = arith.constant 0 : i32
    %c0_i32_0 = arith.constant 0 : i32
    %c0_i32_1 = arith.constant 0 : i32
    return %c0_i32, %c0_i32_0 : i32, i32
  }
  func.func @transform_2(%arg0: i32) -> (i32, i32) {
    %c0_i32 = arith.constant 0 : i32
    %c0_i32_0 = arith.constant 0 : i32
    %c0_i32_1 = arith.constant 0 : i32
    return %c0_i32, %c0_i32_0 : i32, i32
  }
  func.func @transform_3(%arg0: i32) -> (i32, i32) {
    %c0_i32 = arith.constant 0 : i32
    %c0_i32_0 = arith.constant 0 : i32
    %c0_i32_1 = arith.constant 0 : i32
    return %c0_i32, %c0_i32_0 : i32, i32
  }
  func.func @transform_4(%arg0: i32) -> (i32, i32, i32) {
    %c0_i32 = arith.constant 0 : i32
    %c0_i32_0 = arith.constant 0 : i32
    %c0_i32_1 = arith.constant 0 : i32
    return %arg0, %c0_i32, %c0_i32_0 : i32, i32, i32
  }
}

</mosaic_0001>

<bundles_post_ra>
// kernel: tpu_custom_call.1
= control target key start
LH: loop header
LB: loop body
LE: loop exit
PB: predicated region body
PF: predicated region fallthrough
CT: control target
= control target key end

     0   :  { %9 = vsyncpa [#allocation3], 0  ;;  %s3771_s0 = inlined_call_operand.hbm [shape: f32[2,32,256], index: 0, kind: input, shape index: {}]   ;;  %s3772_s1 = inlined_call_operand.vmem [shape: f32[2,32], index: 1, kind: input, shape index: {}]   ;;  %s3773_s2 = inlined_call_operand.vmem [shape: f32[2,32], index: 2, kind: input, shape index: {}]   ;;  %s3774_s3 = inlined_call_operand.vmem [shape: f32[2,49], index: 3, kind: input, shape index: {}]   ;;  %s3775_s4 = inlined_call_operand.hbm [shape: f32[2,32,256], index: 4, kind: output, shape index: {}]  }
   0x1   :  { %11 = vsyncpa [#allocation3 + $0x1], 0 }
   0x2   :  { %12 = vsyncpa [#allocation5], 0 }
   0x3   :  { %13 = vsyncpa [#allocation4], 0 }
   0x4   :  { %15 = vsyncpa [#allocation4 + $0x1], 0  ;;  %s2508_s15 = smov 0   ;;  %s2510_s16 = smov 0  }
   0x5   :  { %s2512_s17 = smov 0   ;;  %s2514_s18 = smov 0  }
   0x6 LB: > { %s2529_s19 = sadd.s32 4294967295, %s2461_s18   ;;  %s2145_s20 = sadd.s32 4294967294, %s2461_s18   ;;  %s2461_s18 = sphi %s2514_s18, %s3896_s18   ;;  %s2457_s17 = sphi %s2512_s17, %s3895_s17   ;;  %s2453_s16 = sphi %s2510_s16, %s3894_s16   ;;  %s2449_s15 = sphi %s2508_s15, %s3893_s15  }
   0x7   : > { %s2533_s21 = sadd.s32 1, %s2461_s18   ;;  %s28_s22 = sadd.s32 1, %s2457_s17 }
   0x8   : > { %s25_s23 = ssub.s32 %s2461_s18, %s2533_s21  ;;  %p35_p0 = scmp.ne.s32.totalorder %s2457_s17, %s2453_s16 }
   0x9   : > { %p26_p1 = scmp.eq.s32.totalorder %s25_s23, 0  ;;  %p36_p2 = scmp.eq.s32.totalorder %s2461_s18, 0 }
   0xa   : > { %p41_p3 = scmp.ne.s32.totalorder %s2453_s16, %s2449_s15  ;;  %p3777_p4 = scmp.eq.s32.totalorder %s2529_s19, 0 }
   0xb   : > { %s2545_s24 = scalar_select %p26_p1, %s2457_s17, %s28_s22  }
   0xc   : > { %p2547_p5 = por %p36_p2, %p35_p0  ;;  %p2553_p6 = por %p3777_p4, %p41_p3 }
   0xd   : > { %p128_p7 = scmp.eq.s32.totalorder %s2529_s19, 1  ;;  %p134_p8 = scmp.eq.s32.totalorder %s2145_s20, 1 }
   0xe   : > { %s3801_s26 = scalar_select %p2553_p6, 1, 0 }
   0xf   : > { %p2146_p9 = scmp.ge.s32.totalorder %s2461_s18, 1  ;;  %p141_p10 = scmp.lt.s32.totalorder %s2461_s18, 3 }
  0x10   : > { %p2560_p11 = por %p128_p7, %p35_p0  ;;  %p2564_p12 = por %p134_p8, %p41_p3 }
  0x11   : > { %p2568_p13 = pnand %p2146_p9, %p141_p10  ;;  %s160_s6 = sshll.u32 %s3774_s3, 4  ;;  %s161_s6 = int_to_ptr.vmem [resolvable:$true] %s160_s6 }
  0x12   : > { %s3802_s27 = scalar_select %p2560_p11, 1, 0 }
  0x13   : > { %s3803_s28 = scalar_select %p2564_p12, 1, 0 }
  0x14   : > { %p2268_p1 = pneg %p2568_p13  ;;  %p2281_p2 = scmp.lt.s32.totalorder %s2461_s18, 2 }
  0x15   : > { %s171_s8 = sand.u32 1, %s2457_s17   ;;  %s2346_s11 = scalar_lea.vmem %s161_s6, 32 }
  0x16   : > { %p2581_p7 = pnand %p2268_p1, %p3777_p4  ;;  %p2588_p3 = pnand %p2281_p2, %p2547_p5 }
  0x17   : > { %s2149_s10 = sshll.u32 %s171_s8, 6  ;;  %p2347_p8 = scmp.ne.s32.totalorder %s161_s6, %s2346_s11 }
  0x18   : > { %p2348_p9 = pneg %p2581_p7  ;;  %p2354_p12 = scmp.lt.s32.totalorder %s161_s6, %s161_s6 }
  0x19   : > { %p2355_p11 = scmp.lt.s32.totalorder %s2346_s11, %s2346_s11 }
  0x1a   : > { %p2349_p10 = pnand %p2348_p9, %p2347_p8 }
  0x1b   : > { %p2356_p1 = por %p2355_p11, %p2354_p12 }
  0x1c   : > { %p2350_p0 = pneg %p2349_p10 }
  0x1e   : > { %p2357_p4 = pnand %p2356_p1, %p2350_p0 }
  0x20   : > { %2360 = shalt.err (!%p2357_p4)
}
  0x21   : > { %s2463_s12 = smov [#allocation6]   ;;  %s2258_s13 = sshll.u32 %s2461_s18, 10 }
  0x22   : > { %2271 = dma.vmem_to_smem (!%p2581_p7), %s161_s6, 32, %s2463_s12, [#allocation5]  }
  0x23   : > { %s175_s14 = scalar_lea.vmem [#allocation2], %s2149_s10  ;;  %s2600_s25 = scalar_lea.hbm %s3771_s0, %s2258_s13 }
  0x24   : > { %s182_s20 = sshll.u32 %s175_s14, 4  ;;  %s2604_s30 = scalar_lea.sflag [#allocation3], %s171_s8  ;;  %s2602_s20 = int_to_ptr.vmem [resolvable:$true] %s182_s20 }
  0x25   : > { %s2361_s5 = scalar_lea.hbm %s2600_s25, 1024  ;;  %p2363_p5 = pneg %p2588_p3 }
  0x26   : > { %p2362_p4 = scmp.ne.s32.totalorder %s2600_s25, %s2361_s5  ;;  %s2366_s10 = scalar_lea.hbm %s3771_s0, 2048 }
  0x27   : > { %p2367_p0 = scmp.lt.u32.totalorder %s2600_s25, %s3771_s0  ;;  %p2368_p2 = scmp.lt.u32.totalorder %s2366_s10, %s2361_s5 }
  0x28   : > { %p2364_p11 = pnand %p2363_p5, %p2362_p4  ;;  %p2370_p8 = scmp.lt.u32.totalorder %s2361_s5, %s2600_s25 }
  0x29   : > { %p2369_p7 = por %p2368_p2, %p2367_p0 }
  0x2a   : > { %p2365_p12 = pneg %p2364_p11 }
  0x2b   : > { %p2371_p9 = por %p2370_p8, %p2369_p7 }
  0x2d   : > { %p2372_p10 = pnand %p2371_p9, %p2365_p12 }
  0x2f   : > { %2375 = shalt.err (!%p2372_p10)
}
  0x30   : > { %s2376_s8 = scalar_lea.vmem %s2602_s20, 1024  ;;  %s2464_s13 = smov [#allocation2]  }
  0x31   : > { %p2377_p1 = scmp.ne.s32.totalorder %s2602_s20, %s2376_s8  ;;  %s2381_s14 = sshll.u32 %s2464_s13, 4  ;;  %s2382_s14 = int_to_ptr.vmem [resolvable:$false] %s2381_s14 }
  0x32   : > { %s2383_s22 = scalar_lea.vmem %s2382_s14, 2048  ;;  %p2384_p6 = scmp.lt.s32.totalorder %s2602_s20, %s2382_s14 }
  0x33   : > { %p2379_p4 = pnand %p2377_p1, %p2363_p5  ;;  %p2385_p0 = scmp.lt.s32.totalorder %s2383_s22, %s2376_s8 }
  0x35   : > { %p2380_p11 = pneg %p2379_p4  ;;  %p2386_p2 = por %p2385_p0, %p2384_p6 }
  0x37   : > { %p2387_p7 = pnand %p2386_p2, %p2380_p11 }
  0x39   : > { %2390 = shalt.err (!%p2387_p7)
}
  0x3a   : > { %s2465_s23 = smov 256   ;;  %s2466_s5 = smov 16  }
  0x3b   : > { %2275 = dma.hbm_to_vmem [thread:$0]  (!%p2588_p3), %s2600_s25, 1024, %s2602_s20, %s2604_s30, %s2465_s23, %s2465_s23, %s2466_s5  }
  0x3c   : > { %194 = sbr.rel (%p2568_p13) target bundleno = 1236 (0x4d4), region = 36 }
  0x43   : > { %s2635_s6 = sand.u32 1, %s2453_s16   ;;  %p3807_p6 = scmp.ne.s32.totalorder %s3801_s26, 0 }
  0x44   : > { %s2153_s7 = sshll.u32 %s2635_s6, 6  ;;  %s197_s10 = scalar_lea.sflag [#allocation3], %s2635_s6 }
  0x45   : > { %s200_s11 = scalar_lea.vmem [#allocation2], %s2153_s7 }
  0x46   : > { %2436 = dma.done.wait (%p3807_p6), %s197_s10, 1024  }
  0x47   : > { %2438 = vsyncadd (%p3807_p6), %s197_s10, 4294966272  ;;  %p3808_p3 = scmp.eq.s32.totalorder %s2529_s19, 0 }
  0x49   : > { %2440 = dma.done.wait (%p3808_p3), [#allocation5], 32   ;;  %p3809_p13 = pmov %p3808_p3 }
  0x4b   : > { %2442 = vsyncadd (%p3809_p13), [#allocation5], 4294967264 }
  0x4c   : > { %209 = sfence }
  0x4d   : > { %v2649_v0 = vld [vmem:[%s200_s11 + $0x20] sm:$0xff]  ;;  %v2651_v1 = vld [vmem:[%s200_s11 + $0x28] sm:$0xff]  ;;  %v2659_v5 = vld [vmem:[%s200_s11 + $0x10] sm:$0xff]  ;;  %v270_v16 = vlaneseq  ;;  %vm281_vm0 = vcmask 130112   ;;  %vm288_vm1 = vcmask 195712   ;;  %vm295_vm2 = vcmask 261312  }
  0x4e   : > { %v2653_v2 = vld [vmem:[%s200_s11] sm:$0xff]  ;;  %v256_v3 = vadd.f32 %v2651_v1, %v2649_v0  ;;  %v2657_v4 = vld [vmem:[%s200_s11 + $0x8] sm:$0xff]  ;;  %v2661_v6 = vld [vmem:[%s200_s11 + $0x18] sm:$0xff]  ;;  %v244_v15 = vmax.f32 %v2649_v0, %v2651_v1  ;;  %vm322_vm3 = vcmask 1040384   ;;  %vm331_vm4 = vcmask 254976   ;;  %s2467_s25 = smov 51  }
  0x4f   : > { %v250_v7 = vadd.f32 %v2657_v4, %v2653_v2  ;;  %v238_v8 = vmax.f32 %v2653_v2, %v2657_v4  ;;  %v253_v9 = vadd.f32 %v2661_v6, %v2659_v5  ;;  %v2669_v10 = vld [vmem:[%s200_s11 + $0x30] sm:$0xff]  ;;  %v2671_v11 = vld [vmem:[%s200_s11 + $0x38] sm:$0xff]  ;;  %v241_v13 = vmax.f32 %v2659_v5, %v2661_v6  ;;  %v324_v42 = vld [vmem:[%s3772_s1] sm:$0x3]  ;;  %s2157_s30 = sld [smem:[#allocation6 + $0x7]]  ;;  %s2160_s8 = sld [smem:[#allocation6 + $0x8e]] }
  0x50   : > { %257 = vadd.xlane.f32.xlu1 %v256_v3  ;;  %v259_v12 = vadd.f32 %v2671_v11, %v2669_v10  ;;  %v247_v14 = vmax.f32 %v2669_v10, %v2671_v11  ;;  %v2681_v17 = vand.u32 127, %v270_v16  ;;  %v273_v21 = vshrl.u32 %v270_v16, 7  ;;  %v325_v62 = vld [vmem:[%s3773_s2] sm:$0x3]  ;;  %s2158_s12 = sld [smem:[#allocation6 + $0x87]]  ;;  %s2159_s13 = sld [smem:[#allocation6 + $0xe]] }
  0x51   : > { %251 = vadd.xlane.f32.xlu0 %v250_v7  ;;  %vm438_vm5 = vcmask 416768   ;;  %s2162_s14 = sld [smem:[#allocation6 + $0x95]]  ;;  %s2164_s23 = sld [smem:[#allocation6 + $0x9c]]  ;;  %vm516_vm6 = vcmask 916480   ;;  %vm545_vm7 = vcmask 785408   ;;  %vm574_vm8 = vcmask 654336  }
  0x52   : > { %3810 = vst [vmem:[#allocation11_spill] sm:$0xff] %v2681_v17  ;;  %v276_v20 = vadd.s32 4294967288, %v2681_v17  ;;  %v290_v25 = vadd.s32 4294967272, %v2681_v17  ;;  %v283_v26 = vadd.s32 4294967280, %v2681_v17  ;;  %v274_v28 = vsub.s32 %v2681_v17, %v273_v21  ;;  %s2161_s22 = sld [smem:[#allocation6 + $0x15]]  ;;  %s2468_s5 = smov 112  }
  0x53   : > { %v344_v39 = vsub.s32 1, %v273_v21  ;;  %v2687_v40 = vsub.s32 0, %v273_v21  ;;  %s2163_s10 = sld [smem:[#allocation6 + $0x1c]]  ;;  %s2469_s11 = smov 96   ;;  %vm603_vm9 = vcmask 523264   ;;  %vm632_vm10 = vcmask 392192  }
  0x54   : > { %239 = vmax.xlane.f32.xlu1 %v238_v8  ;;  %v279_v23 = vsub.s32 %v276_v20, %v273_v21  ;;  %v293_v33 = vsub.s32 %v290_v25, %v273_v21  ;;  %v286_v35 = vsub.s32 %v283_v26, %v273_v21  ;;  %s2166_s26 = sld [smem:[#allocation6 + $0xa3]]  ;;  %s2168_s9 = sld [smem:[#allocation6 + $0xaa]]  ;;  %vm661_vm11 = vcmask 261120  }
  0x55   : > { %254 = vadd.xlane.f32.xlu0 %v253_v9  ;;  %3811 = vst [vmem:[#allocation12_spill] sm:$0xff] %v2687_v40  ;;  %v345_v51 = vrot.slane %v324_v42, %v344_v39  ;;  %v329_v52 = vrot.slane %v324_v42, %v2687_v40  ;;  %v354_v63 = vrot.slane %v325_v62, %v344_v39  ;;  %s2165_s29 = sld [smem:[#allocation6 + $0x23]]  ;;  %s2470_s20 = smov 80   ;;  %vm893_vm12 = vcmask 1039360  }
  0x56   : > { %v339_v3 = vrot.slane %v325_v62, %v2687_v40  ;;  %vm1115_vm13 = vcmask 1031168   ;;  %p3890_p12 = scmp.ne.s32.totalorder %s3802_s27, 0 }
  0x58   : > { %260 = vadd.xlane.f32.xlu1 %v259_v12 }
  0x59   : > { %242 = vmax.xlane.f32.xlu0 %v241_v13 }
  0x5c   : > { %248 = vmax.xlane.f32.xlu1 %v247_v14 }
  0x5d   : > { %245 = vmax.xlane.f32.xlu0 %v244_v15 }
  0xdd   : > { %v258_v18 = vpop.xlane.xlu1 %257 }
  0xde   : > { %v252_v19 = vpop.xlane.xlu0 %251  ;;  %v264_v36 = vmul.f32 0.00390625, %v258_v18 }
  0xdf   : > { %v262_v29 = vmul.f32 0.00390625, %v252_v19 }
  0xe0   : > { %v314_v48 = vrot.slane %v264_v36, %v286_v35 }
  0xe1   : > { %v240_v22 = vpop.xlane.xlu1 %239  ;;  %v305_v37 = vrot.slane %v262_v29, %v274_v28 }
  0xe2   : > { %v255_v24 = vpop.xlane.xlu0 %254  ;;  %v275_v44 = vrot.slane %v240_v22, %v274_v28 }
  0xe3   : > { %v263_v27 = vmul.f32 0.00390625, %v255_v24 }
  0xe5   : > { %v261_v30 = vpop.xlane.xlu1 %260  ;;  %v309_v31 = vrot.slane %v263_v27, %v279_v23 }
  0xe6   : > { %v243_v32 = vpop.xlane.xlu0 %242  ;;  %v265_v34 = vmul.f32 0.00390625, %v261_v30 }
  0xe7   : > { %v280_v38 = vrot.slane %v243_v32, %v279_v23  ;;  %v310_v43 = vsel %vm281_vm0, %v309_v31, %v305_v37 }
  0xe8   : > { %v319_v45 = vrot.slane %v265_v34, %v293_v33  ;;  %v315_v54 = vsel %vm288_vm1, %v314_v48, %v310_v43 }
  0xe9   : > { %v249_v41 = vpop.xlane.xlu1 %248  ;;  %v282_v50 = vsel %vm281_vm0, %v280_v38, %v275_v44 }
  0xea   : > { %v246_v46 = vpop.xlane.xlu0 %245  ;;  %v294_v47 = vrot.slane %v249_v41, %v293_v33  ;;  %v320_v56 = vsel %vm295_vm2, %v319_v45, %v315_v54 }
  0xeb   : > { %v287_v49 = vrot.slane %v246_v46, %v286_v35 }
  0xed   : > { %v289_v53 = vsel %vm288_vm1, %v287_v49, %v282_v50 }
  0xee   : > { %v296_v55 = vsel %vm295_vm2, %v294_v47, %v289_v53 }
  0xef   : > { %v323_v57 = vsel %vm322_vm3, %v296_v55, %v320_v56 }
  0xf0   : > { %v346_v58 = vmul.f32 %v345_v51, %v323_v57  ;;  %v330_v59 = vmul.f32 %v329_v52, %v323_v57 }
  0xf2   : > { %v347_v60 = vsel %vm331_vm4, %v346_v58, 0.0  ;;  %v332_v61 = vsel %vm331_vm4, %v330_v59, 0.0  ;;  %vm1335_vm4 = vcmask 1022976  }
  0xf3   : > { %348 = vadd.xlane.f32.xlu1 %v347_v60  ;;  %333 = vadd.xlane.f32.xlu0 %v332_v61 }
 0x180   : > { %v349_v7 = vpop.xlane.xlu1 %348  ;;  %v334_v8 = vpop.xlane.xlu0 %333 }
 0x181   : > { %v350_v9 = vmax.f32 %v349_v7, 0.0  ;;  %v335_v12 = vmax.f32 %v334_v8, 0.0 }
 0x183   : > { %v355_v13 = vmul.f32 %v354_v63, %v350_v9  ;;  %v340_v14 = vmul.f32 %v339_v3, %v335_v12 }
 0x185   : > { %v356_v15 = vadd.f32 %v355_v13, %v340_v14 }
 0x187   : > { %v358_v16 = vrot.slane %v356_v15, 1 }
 0x189   : > { %v360_v18 = vadd.f32 %v358_v16, %v356_v15  ;;  %v495_v16 = vstv %s2157_s30  ;;  %s2471_s30 = smov 64  }
 0x18b   : > { %v361_v19 = vsub.f32 0.0, %v360_v18  ;;  %v500_v18 = vstv %s2158_s12  ;;  %s2172_s12 = sld [smem:[#allocation6 + $0x88]] }
 0x18d   : > { %v362_v20 = vmul.f32 1.442695, %v361_v19 }
 0x18f   : > { %2334 = vpow2.f32 %v362_v20 }
 0x199   : > { %v2335_v21 = vpop.eup %2334 }
 0x19a   : > { %v364_v22 = vadd.f32 1.0, %v2335_v21 }
 0x19c   : > { %2336 = vrcp.f32 %v364_v22 }
 0x1a6   : > { %v2337_v23 = vpop.eup %2336 }
 0x1a7   : > { %v370_v24 = vrot.slane %v2337_v23, %v2687_v40 }
 0x1a9   : > { %376 = vbcast.lane.b32.xlu1 %v370_v24, 264  ;;  %372 = vbcast.lane.b32.xlu0 %v370_v24, 256 }
 0x1ad   : > { %380 = vbcast.lane.b32.xlu1 %v370_v24, 272 }
 0x1b1   : > { %384 = vbcast.lane.b32.xlu1 %v370_v24, 280  ;;  %v529_v24 = vstv %s2160_s8  ;;  %s2171_s8 = sld [smem:[#allocation6 + $0x8]] }
 0x21b   : > { %v377_v25 = vpop.permute.xlu1 %376  ;;  %v373_v26 = vpop.permute.xlu0 %372 }
 0x21c   : > { %v2703_v27 = vmul.f32 %v377_v25, %v2659_v5  ;;  %v2706_v28 = vmul.f32 %v377_v25, %v2661_v6  ;;  %v2709_v29 = vmul.f32 %v373_v26, %v2653_v2  ;;  %v2712_v30 = vmul.f32 %v373_v26, %v2657_v4 }
 0x21e   : > { %3812 = vst [vmem:[#allocation13_spill] sm:$0xff] %v2703_v27  ;;  %3813 = vst [vmem:[#allocation14_spill] sm:$0xff] %v2706_v28  ;;  %v412_v5 = vadd.f32 %v2703_v27, %v2709_v29  ;;  %v421_v6 = vadd.f32 %v2706_v28, %v2712_v30 }
 0x21f   : > { %3814 = vst [vmem:[#allocation15_spill] sm:$0xff] %v2709_v29  ;;  %3815 = vst [vmem:[#allocation16_spill] sm:$0xff] %v2712_v30  ;;  %v381_v31 = vpop.permute.xlu1 %380 }
 0x220   : > { %v2715_v32 = vmul.f32 %v381_v31, %v2649_v0  ;;  %v2718_v33 = vmul.f32 %v381_v31, %v2651_v1 }
 0x222   : > { %3816 = vst [vmem:[#allocation17_spill] sm:$0xff] %v2715_v32  ;;  %3817 = vst [vmem:[#allocation18_spill] sm:$0xff] %v2718_v33  ;;  %v413_v2 = vadd.f32 %v412_v5, %v2715_v32  ;;  %v422_v35 = vadd.f32 %v421_v6, %v2718_v33  ;;  %v394_v1 = vmax.f32 %v2709_v29, %v2715_v32 }
 0x223   : > { %v385_v34 = vpop.permute.xlu1 %384  ;;  %v403_v36 = vmax.f32 %v2712_v30, %v2718_v33 }
 0x224   : > { %v2727_v4 = vmul.f32 %v385_v34, %v2669_v10  ;;  %v2730_v0 = vmul.f32 %v385_v34, %v2671_v11  ;;  %v524_v34 = vstv %s2159_s13  ;;  %s2174_s13 = sld [smem:[#allocation6 + $0x8f]] }
 0x226   : > { %3818 = vst [vmem:[#allocation19_spill] sm:$0xff] %v2727_v4  ;;  %3819 = vst [vmem:[#allocation20_spill] sm:$0xff] %v2730_v0  ;;  %v395_v37 = vmax.f32 %v2703_v27, %v2727_v4  ;;  %v404_v38 = vmax.f32 %v2706_v28, %v2730_v0  ;;  %v414_v39 = vadd.f32 %v413_v2, %v2727_v4 }
 0x227   : > { %v423_v10 = vadd.f32 %v422_v35, %v2730_v0 }
 0x228   : > { %v415_v41 = vrot.slane %v414_v39, 4  ;;  %v405_v11 = vmax.f32 %v403_v36, %v404_v38  ;;  %v396_v43 = vmax.f32 %v394_v1, %v395_v37 }
 0x229   : > { %v424_v42 = vrot.slane %v423_v10, 4 }
 0x22a   : > { %v406_v44 = vrot.slane %v405_v11, 4  ;;  %v397_v45 = vrot.slane %v396_v43, 4  ;;  %v416_v47 = vadd.f32 %v415_v41, %v414_v39 }
 0x22b   : > { %v425_v46 = vadd.f32 %v424_v42, %v423_v10 }
 0x22c   : > { %v407_v48 = vmax.f32 %v405_v11, %v406_v44  ;;  %v398_v49 = vmax.f32 %v396_v43, %v397_v45  ;;  %v417_v51 = vrot.slane %v416_v47, 2  ;;  %v558_v11 = vstv %s2162_s14  ;;  %s2472_s14 = smov 48  }
 0x22d   : > { %v426_v50 = vrot.slane %v425_v46, 2  ;;  %v553_v45 = vstv %s2161_s22  ;;  %s2173_s22 = sld [smem:[#allocation6 + $0xf]] }
 0x22e   : > { %v408_v52 = vrot.slane %v407_v48, 2  ;;  %v399_v53 = vrot.slane %v398_v49, 2  ;;  %v418_v55 = vadd.f32 %v417_v51, %v416_v47 }
 0x22f   : > { %v427_v54 = vadd.f32 %v426_v50, %v425_v46  ;;  %v587_v50 = vstv %s2164_s23  ;;  %s2473_s23 = smov 32  }
 0x230   : > { %v409_v56 = vmax.f32 %v407_v48, %v408_v52  ;;  %v400_v57 = vmax.f32 %v398_v49, %v399_v53  ;;  %v419_v59 = vrot.slane %v418_v55, 1  ;;  %v582_v53 = vstv %s2163_s10  ;;  %s2176_s10 = sld [smem:[#allocation6 + $0x96]] }
 0x231   : > { %v428_v58 = vrot.slane %v427_v54, 1 }
 0x232   : > { %v410_v60 = vrot.slane %v409_v56, 1  ;;  %v401_v61 = vrot.slane %v400_v57, 1  ;;  %v420_v7 = vadd.f32 %v419_v59, %v418_v55 }
 0x233   : > { %v429_v3 = vadd.f32 %v428_v58, %v427_v54 }
 0x234   : > { %v411_v62 = vmax.f32 %v409_v56, %v410_v60  ;;  %v402_v63 = vmax.f32 %v400_v57, %v401_v61  ;;  %v430_v9 = vmul.f32 0.03125, %v420_v7 }
 0x235   : > { %v431_v8 = vmul.f32 0.03125, %v429_v3  ;;  %v616_v3 = vstv %s2166_s26  ;;  %s2175_s26 = sld [smem:[#allocation6 + $0x16]] }
 0x236   : > { %436 = vrot.lane.b32.xlu1 %v411_v62, %s2467_s25  ;;  %434 = vrot.lane.b32.xlu0 %v402_v63, %s2467_s25 }
 0x23a   : > { %449 = vrot.lane.b32.xlu1 %v431_v8, %s2467_s25  ;;  %447 = vrot.lane.b32.xlu0 %v430_v9, %s2467_s25  ;;  %s2167_s25 = sld [smem:[#allocation6 + $0x2a]]  ;;  %v611_v9 = vstv %s2165_s29  ;;  %s2178_s29 = sld [smem:[#allocation6 + $0x9d]] }
 0x2a8   : > { %v437_v12 = vpop.permute.xlu1 %436  ;;  %v435_v13 = vpop.permute.xlu0 %434 }
 0x2a9   : > { %v2743_v14 = vsel %vm438_vm5, %v435_v13, %v437_v12  ;;  %v2746_v15 = vsel %vm438_vm5, 0.0, %v435_v13  ;;  %v2762_v6 = vsel %vm438_vm5, %v437_v12, 0.0 }
 0x2aa   : > { %3820 = vst [vmem:[#allocation21_spill] sm:$0xff] %v2743_v14  ;;  %v496_v25 = vmul.f32 %v495_v16, %v2746_v15  ;;  %v497_v31 = vmul.f32 %v495_v16, %v2743_v14  ;;  %v498_v37 = vmul.f32 %v495_v16, %v2762_v6  ;;  %v525_v38 = vmul.f32 %v524_v34, %v2746_v15 }
 0x2ab   : > { %v526_v43 = vmul.f32 %v524_v34, %v2743_v14  ;;  %v527_v44 = vmul.f32 %v524_v34, %v2762_v6  ;;  %v554_v51 = vmul.f32 %v553_v45, %v2746_v15  ;;  %v555_v52 = vmul.f32 %v553_v45, %v2743_v14 }
 0x2ac   : > { %v450_v19 = vpop.permute.xlu1 %449  ;;  %v448_v20 = vpop.permute.xlu0 %447  ;;  %v556_v58 = vmul.f32 %v553_v45, %v2762_v6  ;;  %v583_v59 = vmul.f32 %v582_v53, %v2746_v15  ;;  %v584_v7 = vmul.f32 %v582_v53, %v2743_v14  ;;  %v585_v8 = vmul.f32 %v582_v53, %v2762_v6 }
 0x2ad   : > { %v2749_v21 = vsel %vm438_vm5, %v450_v19, 0.0  ;;  %v2752_v22 = vsel %vm438_vm5, %v448_v20, %v450_v19  ;;  %v2755_v23 = vsel %vm438_vm5, 0.0, %v448_v20  ;;  %v645_v19 = vstv %s2168_s9  ;;  %s2177_s9 = sld [smem:[#allocation6 + $0x1d]] }
 0x2ae   : > { %3821 = vst [vmem:[#allocation22_spill] sm:$0xff] %v2752_v22  ;;  %v501_v26 = vmul.f32 %v500_v18, %v2755_v23  ;;  %v502_v5 = vmul.f32 %v500_v18, %v2752_v22  ;;  %v503_v1 = vmul.f32 %v500_v18, %v2749_v21  ;;  %v530_v36 = vmul.f32 %v529_v24, %v2755_v23 }
 0x2af   : > { %v531_v41 = vmul.f32 %v529_v24, %v2752_v22  ;;  %v532_v42 = vmul.f32 %v529_v24, %v2749_v21  ;;  %v559_v48 = vmul.f32 %v558_v11, %v2755_v23  ;;  %v560_v49 = vmul.f32 %v558_v11, %v2752_v22 }
 0x2b0   : > { %v504_v2 = vadd.f32 %v501_v26, %v496_v25  ;;  %v505_v35 = vadd.f32 %v502_v5, %v497_v31  ;;  %v506_v39 = vadd.f32 %v503_v1, %v498_v37  ;;  %v533_v10 = vadd.f32 %v530_v36, %v525_v38 }
 0x2b1   : > { %v534_v46 = vadd.f32 %v531_v41, %v526_v43  ;;  %v535_v47 = vadd.f32 %v532_v42, %v527_v44  ;;  %v562_v54 = vadd.f32 %v559_v48, %v554_v51  ;;  %v563_v55 = vadd.f32 %v560_v49, %v555_v52 }
 0x2b2   : > { %510 = vrot.lane.b32.xlu0 %v504_v2, %s2468_s5  ;;  %512 = vrot.lane.b32.xlu1 %v505_v35, %s2468_s5  ;;  %v561_v56 = vmul.f32 %v558_v11, %v2749_v21  ;;  %v588_v57 = vmul.f32 %v587_v50, %v2755_v23  ;;  %v589_v62 = vmul.f32 %v587_v50, %v2752_v22  ;;  %v640_v25 = vstv %s2167_s25  ;;  %s2180_s25 = sld [smem:[#allocation6 + $0xa4]] }
 0x2b3   : > { %v590_v63 = vmul.f32 %v587_v50, %v2749_v21  ;;  %v617_v16 = vmul.f32 %v616_v3, %v2755_v23  ;;  %v618_v18 = vmul.f32 %v616_v3, %v2752_v22  ;;  %v612_v20 = vmul.f32 %v611_v9, %v2746_v15 }
 0x2b4   : > { %v564_v60 = vadd.f32 %v561_v56, %v556_v58  ;;  %v591_v61 = vadd.f32 %v588_v57, %v583_v59  ;;  %v592_v12 = vadd.f32 %v589_v62, %v584_v7  ;;  %v613_v24 = vmul.f32 %v611_v9, %v2743_v14 }
 0x2b5   : > { %v593_v13 = vadd.f32 %v590_v63, %v585_v8  ;;  %v620_v26 = vadd.f32 %v617_v16, %v612_v20  ;;  %v619_v5 = vmul.f32 %v616_v3, %v2749_v21  ;;  %v646_v34 = vmul.f32 %v645_v19, %v2755_v23 }
 0x2b6   : > { %514 = vrot.lane.b32.xlu0 %v506_v39, %s2468_s5  ;;  %539 = vrot.lane.b32.xlu1 %v533_v10, %s2469_s11  ;;  %v621_v31 = vadd.f32 %v618_v18, %v613_v24  ;;  %v614_v2 = vmul.f32 %v611_v9, %v2762_v6  ;;  %v641_v35 = vmul.f32 %v640_v25, %v2746_v15  ;;  %v702_v39 = vstv %s2172_s12  ;;  %s2169_s12 = sld [smem:[#allocation6 + $0x1]] }
 0x2b7   : > { %v647_v37 = vmul.f32 %v645_v19, %v2752_v22  ;;  %v648_v38 = vmul.f32 %v645_v19, %v2749_v21  ;;  %v642_v10 = vmul.f32 %v640_v25, %v2743_v14  ;;  %v643_v41 = vmul.f32 %v640_v25, %v2762_v6 }
 0x2b8   : > { %v622_v1 = vadd.f32 %v619_v5, %v614_v2  ;;  %v649_v36 = vadd.f32 %v646_v34, %v641_v35  ;;  %v697_v42 = vstv %s2171_s8  ;;  %v703_v44 = vmul.f32 %v702_v39, %v2755_v23  ;;  %s2170_s8 = sld [smem:[#allocation6 + $0x81]] }
 0x2b9   : > { %v650_v11 = vadd.f32 %v647_v37, %v642_v10  ;;  %v651_v43 = vadd.f32 %v648_v38, %v643_v41  ;;  %v704_v45 = vmul.f32 %v702_v39, %v2752_v22  ;;  %v699_v48 = vmul.f32 %v697_v42, %v2743_v14 }
 0x2ba   : > { %541 = vrot.lane.b32.xlu0 %v534_v46, %s2469_s11  ;;  %543 = vrot.lane.b32.xlu1 %v535_v47, %s2469_s11  ;;  %v732_v46 = vstv %s2174_s13  ;;  %v698_v47 = vmul.f32 %v697_v42, %v2746_v15  ;;  %v727_v49 = vstv %s2173_s22  ;;  %v705_v52 = vmul.f32 %v702_v39, %v2749_v21  ;;  %s2179_s13 = sld [smem:[#allocation6 + $0x24]]  ;;  %s2182_s22 = sld [smem:[#allocation6 + $0xab]] }
 0x2bb   : > { %v707_v51 = vadd.f32 %v704_v45, %v699_v48  ;;  %v733_v53 = vmul.f32 %v732_v46, %v2755_v23  ;;  %v734_v58 = vmul.f32 %v732_v46, %v2752_v22  ;;  %v735_v59 = vmul.f32 %v732_v46, %v2749_v21 }
 0x2bc   : > { %v706_v50 = vadd.f32 %v703_v44, %v698_v47  ;;  %v730_v62 = vmul.f32 %v727_v49, %v2762_v6  ;;  %v757_v63 = vstv %s2175_s26  ;;  %v787_v18 = vstv %s2177_s9  ;;  %s2186_s26 = sld [smem:[#allocation6 + $0x89]]  ;;  %s2188_s9 = sld [smem:[#allocation6 + $0x90]] }
 0x2bd   : > { %v759_v16 = vmul.f32 %v757_v63, %v2743_v14  ;;  %v2845_v37 = vstv %s2169_s12  ;;  %v790_v39 = vmul.f32 %v787_v18, %v2762_v6  ;;  %s2183_s12 = sld [smem:[#allocation6 + $0x2]]  ;;  %vm1557_vm5 = vcmask 1014784  }
 0x2be   : > { %568 = vrot.lane.b32.xlu0 %v562_v54, %s2470_s20  ;;  %570 = vrot.lane.b32.xlu1 %v563_v55, %s2470_s20  ;;  %v700_v54 = vmul.f32 %v697_v42, %v2762_v6  ;;  %v728_v55 = vmul.f32 %v727_v49, %v2746_v15  ;;  %v738_v7 = vadd.f32 %v735_v59, %v730_v62  ;;  %v2847_v38 = vstv %s2170_s8  ;;  %s2184_s8 = sld [smem:[#allocation6 + $0x82]] }
 0x2bf   : > { %v682_v44 = vmul.f32 %v2845_v37, %v2746_v15  ;;  %v687_v45 = vmul.f32 %v2847_v38, %v2755_v23 }
 0x2c0   : > { %v708_v56 = vadd.f32 %v705_v52, %v700_v54  ;;  %v736_v57 = vadd.f32 %v733_v53, %v728_v55  ;;  %v817_v41 = vstv %s2179_s13  ;;  %v852_v46 = vstv %s2182_s22  ;;  %s2190_s13 = sld [smem:[#allocation6 + $0x97]] }
 0x2c1   : > { %v818_v47 = vmul.f32 %v817_v41, %v2746_v15  ;;  %v819_v48 = vmul.f32 %v817_v41, %v2743_v14  ;;  %v688_v52 = vmul.f32 %v2847_v38, %v2752_v22  ;;  %v854_v62 = vmul.f32 %v852_v46, %v2752_v22  ;;  %s2189_s22 = sld [smem:[#allocation6 + $0x17]] }
 0x2c2   : > { %572 = vrot.lane.b32.xlu0 %v564_v60, %s2470_s20  ;;  %597 = vrot.lane.b32.xlu1 %v591_v61, %s2471_s30  ;;  %v762_v60 = vstv %s2176_s10  ;;  %v729_v61 = vmul.f32 %v727_v49, %v2743_v14  ;;  %s2181_s10 = sld [smem:[#allocation6 + $0x2b]]  ;;  %v2862_v49 = vadd.f32 %v687_v45, %v682_v44 }
 0x2c3   : > { %v763_v8 = vmul.f32 %v762_v60, %v2755_v23  ;;  %v764_v9 = vmul.f32 %v762_v60, %v2752_v22  ;;  %v765_v24 = vmul.f32 %v762_v60, %v2749_v21 }
 0x2c4   : > { %v737_v3 = vadd.f32 %v734_v58, %v729_v61  ;;  %3822 = vst [vmem:[#allocation23_spill] sm:$0xff] %v2862_v49  ;;  %v820_v58 = vmul.f32 %v817_v41, %v2762_v6 }
 0x2c5   : > { %v767_v20 = vadd.f32 %v764_v9, %v759_v16 }
 0x2c6   : > { %599 = vrot.lane.b32.xlu0 %v592_v12, %s2471_s30  ;;  %601 = vrot.lane.b32.xlu1 %v593_v13, %s2471_s30  ;;  %v792_v12 = vstv %s2178_s29  ;;  %v758_v13 = vmul.f32 %v757_v63, %v2746_v15  ;;  %s2185_s29 = sld [smem:[#allocation6 + $0x9]] }
 0x2c7   : > { %v793_v25 = vmul.f32 %v792_v12, %v2755_v23  ;;  %v794_v5 = vmul.f32 %v792_v12, %v2752_v22  ;;  %v795_v35 = vmul.f32 %v792_v12, %v2749_v21  ;;  %v954_v12 = vstv %s2188_s9  ;;  %s2193_s9 = sld [smem:[#allocation6 + $0x25]] }
 0x2c8   : > { %v766_v19 = vadd.f32 %v763_v8, %v758_v13  ;;  %v956_v44 = vmul.f32 %v954_v12, %v2752_v22 }
 0x2ca   : > { %626 = vrot.lane.b32.xlu0 %v620_v26, %s2472_s14  ;;  %628 = vrot.lane.b32.xlu1 %v621_v31, %s2472_s14  ;;  %v760_v26 = vmul.f32 %v757_v63, %v2762_v6  ;;  %v788_v31 = vmul.f32 %v787_v18, %v2746_v15  ;;  %v855_v63 = vmul.f32 %v852_v46, %v2749_v21 }
 0x2cc   : > { %v768_v34 = vadd.f32 %v765_v24, %v760_v26  ;;  %v796_v2 = vadd.f32 %v793_v25, %v788_v31  ;;  %v919_v9 = vstv %s2185_s29  ;;  %v2888_v26 = vstv %s2183_s12  ;;  %s2194_s29 = sld [smem:[#allocation6 + $0xa5]]  ;;  %s2195_s12 = sld [smem:[#allocation6 + $0x2c]] }
 0x2cd   : > { %v921_v24 = vmul.f32 %v919_v9, %v2743_v14  ;;  %v920_v25 = vmul.f32 %v919_v9, %v2746_v15  ;;  %v2890_v31 = vstv %s2184_s8  ;;  %v905_v45 = vmul.f32 %v2888_v26, %v2743_v14  ;;  %s2200_s8 = sld [smem:[#allocation6 + $0x8a]] }
 0x2ce   : > { %630 = vrot.lane.b32.xlu0 %v622_v1, %s2472_s14  ;;  %655 = vrot.lane.b32.xlu1 %v649_v36, %s2473_s23  ;;  %v822_v1 = vstv %s2180_s25  ;;  %v789_v36 = vmul.f32 %v787_v18, %v2743_v14  ;;  %s2187_s25 = sld [smem:[#allocation6 + $0x10]] }
 0x2cf   : > { %v823_v42 = vmul.f32 %v822_v1, %v2755_v23  ;;  %v825_v55 = vmul.f32 %v822_v1, %v2749_v21 }
 0x2d0   : > { %v797_v10 = vadd.f32 %v794_v5, %v789_v36  ;;  %v955_v5 = vmul.f32 %v954_v12, %v2755_v23  ;;  %v904_v36 = vmul.f32 %v2888_v26, %v2746_v15 }
 0x2d1   : > { %v826_v53 = vadd.f32 %v823_v42, %v818_v47  ;;  %v828_v60 = vadd.f32 %v825_v55, %v820_v58  ;;  %v957_v42 = vmul.f32 %v954_v12, %v2749_v21  ;;  %v984_v47 = vstv %s2190_s13  ;;  %s2199_s13 = sld [smem:[#allocation6 + $0xa]] }
 0x2d2   : > { %657 = vrot.lane.b32.xlu0 %v650_v11, %s2473_s23  ;;  %659 = vrot.lane.b32.xlu1 %v651_v43, %s2473_s23  ;;  %v798_v11 = vadd.f32 %v795_v35, %v790_v39  ;;  %v824_v43 = vmul.f32 %v822_v1, %v2752_v22  ;;  %v909_v39 = vmul.f32 %v2890_v31, %v2755_v23 }
 0x2d3   : > { %v986_v55 = vmul.f32 %v984_v47, %v2752_v22 }
 0x2d4   : > { %v827_v54 = vadd.f32 %v824_v43, %v819_v48 }
 0x2d6   : > { %712 = vrot.lane.b32.xlu0 %v706_v50, %s2468_s5  ;;  %714 = vrot.lane.b32.xlu1 %v707_v51, %s2468_s5  ;;  %v847_v50 = vstv %s2181_s10  ;;  %v683_v51 = vmul.f32 %v2845_v37, %v2743_v14  ;;  %s2192_s10 = sld [smem:[#allocation6 + $0x9e]] }
 0x2d7   : > { %v848_v59 = vmul.f32 %v847_v50, %v2746_v15  ;;  %v850_v8 = vmul.f32 %v847_v50, %v2762_v6 }
 0x2d9   : > { %v858_v16 = vadd.f32 %v855_v63, %v850_v8 }
 0x2da   : > { %716 = vrot.lane.b32.xlu0 %v708_v56, %s2468_s5  ;;  %742 = vrot.lane.b32.xlu1 %v736_v57, %s2469_s11  ;;  %v853_v56 = vmul.f32 %v852_v46, %v2755_v23  ;;  %v2870_v57 = vadd.f32 %v688_v52, %v683_v51  ;;  %v910_v46 = vmul.f32 %v2890_v31, %v2752_v22  ;;  %v979_v52 = vstv %s2189_s22  ;;  %s2214_s22 = sld [smem:[#allocation6 + $0x8b]] }
 0x2dc   : > { %v856_v61 = vadd.f32 %v853_v56, %v848_v59  ;;  %v2914_v51 = vadd.f32 %v910_v46, %v905_v45  ;;  %v985_v56 = vmul.f32 %v984_v47, %v2755_v23  ;;  %v1014_v58 = vstv %s2192_s10  ;;  %s2213_s10 = sld [smem:[#allocation6 + $0xb]] }
 0x2dd   : > { %v981_v59 = vmul.f32 %v979_v52, %v2743_v14 }
 0x2de   : > { %744 = vrot.lane.b32.xlu0 %v737_v3, %s2469_s11  ;;  %746 = vrot.lane.b32.xlu1 %v738_v7, %s2469_s11  ;;  %v924_v3 = vstv %s2186_s26  ;;  %v849_v7 = vmul.f32 %v847_v50, %v2743_v14  ;;  %s2191_s26 = sld [smem:[#allocation6 + $0x1e]] }
 0x2df   : > { %v926_v18 = vmul.f32 %v924_v3, %v2752_v22  ;;  %v927_v35 = vmul.f32 %v924_v3, %v2749_v21 }
 0x2e0   : > { %v857_v13 = vadd.f32 %v854_v62, %v849_v7  ;;  %v989_v62 = vadd.f32 %v986_v55, %v981_v59  ;;  %v987_v7 = vmul.f32 %v984_v47, %v2749_v21 }
 0x2e2   : > { %772 = vrot.lane.b32.xlu0 %v766_v19, %s2470_s20  ;;  %774 = vrot.lane.b32.xlu1 %v767_v20, %s2470_s20  ;;  %v925_v19 = vmul.f32 %v924_v3, %v2755_v23  ;;  %v949_v20 = vstv %s2187_s25  ;;  %v1015_v3 = vmul.f32 %v1014_v58, %v2755_v23  ;;  %s2196_s25 = sld [smem:[#allocation6 + $0xac]] }
 0x2e3   : > { %v950_v1 = vmul.f32 %v949_v20, %v2746_v15  ;;  %v952_v48 = vmul.f32 %v949_v20, %v2762_v6  ;;  %v951_v50 = vmul.f32 %v949_v20, %v2743_v14 }
 0x2e5   : > { %v958_v41 = vadd.f32 %v955_v5, %v950_v1 }
 0x2e6   : > { %776 = vrot.lane.b32.xlu0 %v768_v34, %s2470_s20  ;;  %802 = vrot.lane.b32.xlu1 %v796_v2, %s2471_s30  ;;  %v929_v34 = vadd.f32 %v926_v18, %v921_v24  ;;  %v928_v2 = vadd.f32 %v925_v19, %v920_v25  ;;  %v1016_v18 = vmul.f32 %v1014_v58, %v2752_v22  ;;  %v1044_v19 = vstv %s2194_s29  ;;  %s2201_s29 = sld [smem:[#allocation6 + $0x11]] }
 0x2e7   : > { %v1039_v25 = vstv %s2193_s9  ;;  %s2216_s9 = sld [smem:[#allocation6 + $0x92]] }
 0x2e8   : > { %v1074_v1 = vstv %s2196_s25  ;;  %v1042_v46 = vmul.f32 %v1039_v25, %v2762_v6  ;;  %s2215_s25 = sld [smem:[#allocation6 + $0x12]] }
 0x2ea   : > { %804 = vrot.lane.b32.xlu0 %v797_v10, %s2471_s30  ;;  %806 = vrot.lane.b32.xlu1 %v798_v11, %s2471_s30  ;;  %v922_v10 = vmul.f32 %v919_v9, %v2762_v6  ;;  %v2903_v11 = vadd.f32 %v909_v39, %v904_v36  ;;  %v982_v9 = vmul.f32 %v979_v52, %v2762_v6 }
 0x2eb   : > { %v1041_v36 = vmul.f32 %v1039_v25, %v2743_v14  ;;  %v1040_v39 = vmul.f32 %v1039_v25, %v2746_v15 }
 0x2ec   : > { %v930_v43 = vadd.f32 %v927_v35, %v922_v10  ;;  %v1045_v35 = vmul.f32 %v1044_v19, %v2755_v23  ;;  %v1069_v10 = vstv %s2195_s12  ;;  %s2228_s12 = sld [smem:[#allocation6 + $0x8c]] }
 0x2ed   : > { %v1070_v45 = vmul.f32 %v1069_v10, %v2746_v15  ;;  %v1071_v55 = vmul.f32 %v1069_v10, %v2743_v14 }
 0x2ee   : > { %832 = vrot.lane.b32.xlu0 %v826_v53, %s2472_s14  ;;  %834 = vrot.lane.b32.xlu1 %v827_v54, %s2472_s14  ;;  %v960_v53 = vadd.f32 %v957_v42, %v952_v48  ;;  %v959_v54 = vadd.f32 %v956_v44, %v951_v50  ;;  %v1048_v42 = vadd.f32 %v1045_v35, %v1040_v39  ;;  %v1171_v35 = vstv %s2201_s29  ;;  %s2230_s29 = sld [smem:[#allocation6 + $0x93]] }
 0x2ef   : > { %v1047_v44 = vmul.f32 %v1044_v19, %v2749_v21  ;;  %v1077_v50 = vmul.f32 %v1074_v1, %v2749_v21 }
 0x2f1   : > { %v1050_v48 = vadd.f32 %v1047_v44, %v1042_v46  ;;  %v1173_v44 = vmul.f32 %v1171_v35, %v2743_v14  ;;  %v1391_v46 = vstv %s2215_s25  ;;  %s2242_s25 = sld [smem:[#allocation6 + $0x8d]] }
 0x2f2   : > { %836 = vrot.lane.b32.xlu0 %v828_v60, %s2472_s14  ;;  %862 = vrot.lane.b32.xlu1 %v856_v61, %s2473_s23  ;;  %v980_v60 = vmul.f32 %v979_v52, %v2746_v15  ;;  %v1009_v61 = vstv %s2191_s26  ;;  %v1076_v52 = vmul.f32 %v1074_v1, %v2752_v22  ;;  %s2202_s26 = sld [smem:[#allocation6 + $0x91]] }
 0x2f3   : > { %v1010_v8 = vmul.f32 %v1009_v61, %v2746_v15  ;;  %v1012_v20 = vmul.f32 %v1009_v61, %v2762_v6  ;;  %v1011_v24 = vmul.f32 %v1009_v61, %v2743_v14 }
 0x2f4   : > { %v988_v63 = vadd.f32 %v985_v56, %v980_v60  ;;  %v1141_v56 = vstv %s2199_s13  ;;  %v1079_v59 = vadd.f32 %v1076_v52, %v1071_v55  ;;  %s2204_s13 = sld [smem:[#allocation6 + $0x98]]  ;;  %v1392_v55 = vmul.f32 %v1391_v46, %v2746_v15 }
 0x2f5   : > { %v1018_v12 = vadd.f32 %v1015_v3, %v1010_v8  ;;  %v1142_v3 = vmul.f32 %v1141_v56, %v2746_v15 }
 0x2f6   : > { %864 = vrot.lane.b32.xlu0 %v857_v13, %s2473_s23  ;;  %866 = vrot.lane.b32.xlu1 %v858_v16, %s2473_s23  ;;  %v990_v13 = vadd.f32 %v987_v7, %v982_v9  ;;  %v1017_v16 = vmul.f32 %v1014_v58, %v2749_v21  ;;  %v1361_v7 = vstv %s2213_s10  ;;  %s2218_s10 = sld [smem:[#allocation6 + $0x99]] }
 0x2f8   : > { %v1020_v5 = vadd.f32 %v1017_v16, %v1012_v20  ;;  %v1362_v16 = vmul.f32 %v1361_v7, %v2746_v15 }
 0x2fa   : > { %936 = vrot.lane.b32.xlu0 %v929_v34, %s2468_s5  ;;  %934 = vrot.lane.b32.xlu1 %v928_v2, %s2468_s5  ;;  %v1019_v34 = vadd.f32 %v1016_v18, %v1011_v24  ;;  %v1046_v2 = vmul.f32 %v1044_v19, %v2752_v22  ;;  %v1144_v18 = vmul.f32 %v1141_v56, %v2762_v6 }
 0x2fe   : > { %964 = vrot.lane.b32.xlu0 %v958_v41, %s2469_s11  ;;  %938 = vrot.lane.b32.xlu1 %v930_v43, %s2468_s5  ;;  %v1049_v41 = vadd.f32 %v1046_v2, %v1041_v36  ;;  %v1075_v43 = vmul.f32 %v1074_v1, %v2755_v23  ;;  %v1363_v2 = vmul.f32 %v1361_v7, %v2743_v14 }
 0x300   : > { %v1078_v47 = vadd.f32 %v1075_v43, %v1070_v45  ;;  %v1396_v43 = vstv %s2216_s9  ;;  %v1172_v45 = vmul.f32 %v1171_v35, %v2746_v15  ;;  %s2229_s9 = sld [smem:[#allocation6 + $0x13]] }
 0x302   : > { %968 = vrot.lane.b32.xlu0 %v960_v53, %s2469_s11  ;;  %966 = vrot.lane.b32.xlu1 %v959_v54, %s2469_s11  ;;  %v1146_v53 = vstv %s2200_s8  ;;  %v1072_v54 = vmul.f32 %v1069_v10, %v2762_v6  ;;  %s2227_s8 = sld [smem:[#allocation6 + $0xc]] }
 0x303   : > { %v1148_v60 = vmul.f32 %v1146_v53, %v2752_v22  ;;  %v1147_v61 = vmul.f32 %v1146_v53, %v2755_v23 }
 0x304   : > { %v1080_v58 = vadd.f32 %v1077_v50, %v1072_v54 }
 0x305   : > { %v1150_v9 = vadd.f32 %v1147_v61, %v1142_v3  ;;  %v1588_v3 = vstv %s2228_s12  ;;  %s2241_s12 = sld [smem:[#allocation6 + $0xd]] }
 0x306   : > { %996 = vrot.lane.b32.xlu0 %v989_v62, %s2470_s20  ;;  %994 = vrot.lane.b32.xlu1 %v988_v63, %s2470_s20  ;;  %v1366_v62 = vstv %s2214_s22  ;;  %v1143_v63 = vmul.f32 %v1141_v56, %v2743_v14  ;;  %v1174_v56 = vmul.f32 %v1171_v35, %v2762_v6  ;;  %s2203_s22 = sld [smem:[#allocation6 + $0x18]] }
 0x307   : > { %v1369_v24 = vmul.f32 %v1366_v62, %v2749_v21  ;;  %v1368_v25 = vmul.f32 %v1366_v62, %v2752_v22 }
 0x308   : > { %v1151_v8 = vadd.f32 %v1148_v60, %v1143_v63  ;;  %v1398_v63 = vmul.f32 %v1396_v43, %v2752_v22 }
 0x309   : > { %v1371_v10 = vadd.f32 %v1368_v25, %v1363_v2 }
 0x30a   : > { %1024 = vrot.lane.b32.xlu0 %v1018_v12, %s2471_s30  ;;  %998 = vrot.lane.b32.xlu1 %v990_v13, %s2470_s20  ;;  %v1367_v12 = vmul.f32 %v1366_v62, %v2755_v23  ;;  %v1149_v13 = vmul.f32 %v1146_v53, %v2749_v21  ;;  %v1397_v53 = vmul.f32 %v1396_v43, %v2755_v23 }
 0x30b   : > { %v1399_v62 = vmul.f32 %v1396_v43, %v2749_v21 }
 0x30c   : > { %v1370_v19 = vadd.f32 %v1367_v12, %v1362_v16  ;;  %v1152_v20 = vadd.f32 %v1149_v13, %v1144_v18  ;;  %v1400_v60 = vadd.f32 %v1397_v53, %v1392_v55  ;;  %v1426_v55 = vstv %s2218_s10  ;;  %s2219_s10 = sld [smem:[#allocation6 + $0x20]] }
 0x30e   : > { %1028 = vrot.lane.b32.xlu0 %v1020_v5, %s2471_s30  ;;  %1026 = vrot.lane.b32.xlu1 %v1019_v34, %s2471_s30  ;;  %v1176_v5 = vstv %s2202_s26  ;;  %v1364_v34 = vmul.f32 %v1361_v7, %v2762_v6  ;;  %v1394_v7 = vmul.f32 %v1391_v46, %v2762_v6  ;;  %s2217_s26 = sld [smem:[#allocation6 + $0x19]] }
 0x30f   : > { %v1179_v54 = vmul.f32 %v1176_v5, %v2749_v21 }
 0x310   : > { %v1372_v39 = vadd.f32 %v1369_v24, %v1364_v34  ;;  %v1402_v16 = vadd.f32 %v1399_v62, %v1394_v7  ;;  %v1206_v24 = vstv %s2204_s13  ;;  %v1201_v34 = vstv %s2203_s22  ;;  %s2205_s13 = sld [smem:[#allocation6 + $0x1f]]  ;;  %s2220_s22 = sld [smem:[#allocation6 + $0xa0]] }
 0x311   : > { %v1182_v61 = vadd.f32 %v1179_v54, %v1174_v56  ;;  %v1202_v43 = vmul.f32 %v1201_v34, %v2746_v15  ;;  %v1209_v53 = vmul.f32 %v1206_v24, %v2749_v21  ;;  %v1208_v54 = vmul.f32 %v1206_v24, %v2752_v22 }
 0x312   : > { %1056 = vrot.lane.b32.xlu0 %v1049_v41, %s2472_s14  ;;  %1054 = vrot.lane.b32.xlu1 %v1048_v42, %s2472_s14  ;;  %v1178_v41 = vmul.f32 %v1176_v5, %v2752_v22  ;;  %v1177_v42 = vmul.f32 %v1176_v5, %v2755_v23  ;;  %v1204_v56 = vmul.f32 %v1201_v34, %v2762_v6 }
 0x314   : > { %v1181_v50 = vadd.f32 %v1178_v41, %v1173_v44  ;;  %v1180_v52 = vadd.f32 %v1177_v42, %v1172_v45  ;;  %v1207_v41 = vmul.f32 %v1206_v24, %v2755_v23  ;;  %v1591_v42 = vmul.f32 %v1588_v3, %v2749_v21 }
 0x316   : > { %1084 = vrot.lane.b32.xlu0 %v1078_v47, %s2473_s23  ;;  %1058 = vrot.lane.b32.xlu1 %v1050_v48, %s2472_s14 }
 0x31a   : > { %1088 = vrot.lane.b32.xlu0 %v1080_v58, %s2473_s23  ;;  %1086 = vrot.lane.b32.xlu1 %v1079_v59, %s2473_s23 }
 0x31e   : > { %1158 = vrot.lane.b32.xlu0 %v1151_v8, %s2468_s5  ;;  %1156 = vrot.lane.b32.xlu1 %v1150_v9, %s2468_s5  ;;  %v1393_v8 = vmul.f32 %v1391_v46, %v2743_v14  ;;  %v1583_v9 = vstv %s2227_s8  ;;  %s2206_s8 = sld [smem:[#allocation6 + $0x9f]] }
 0x31f   : > { %v1585_v25 = vmul.f32 %v1583_v9, %v2743_v14  ;;  %v1584_v5 = vmul.f32 %v1583_v9, %v2746_v15  ;;  %v1586_v44 = vmul.f32 %v1583_v9, %v2762_v6  ;;  %v1427_v9 = vmul.f32 %v1426_v55, %v2755_v23 }
 0x320   : > { %v1401_v18 = vadd.f32 %v1398_v63, %v1393_v8  ;;  %v1428_v8 = vmul.f32 %v1426_v55, %v2752_v22 }
 0x322   : > { %1376 = vrot.lane.b32.xlu0 %v1370_v19, %s2468_s5  ;;  %1160 = vrot.lane.b32.xlu1 %v1152_v20, %s2468_s5  ;;  %v1590_v19 = vmul.f32 %v1588_v3, %v2752_v22  ;;  %v1589_v20 = vmul.f32 %v1588_v3, %v2755_v23  ;;  %v1212_v3 = vadd.f32 %v1209_v53, %v1204_v56 }
 0x324   : > { %v2970_v1 = vpop.permute.xlu0 %510  ;;  %v2972_v36 = vpop.permute.xlu1 %512 }
 0x325   : > { %3823 = vst [vmem:[#allocation24_spill] sm:$0xff] %v2970_v1  ;;  %3824 = vst [vmem:[#allocation25_spill] sm:$0xff] %v2972_v36 }
 0x326   : > { %1380 = vrot.lane.b32.xlu0 %v1372_v39, %s2468_s5  ;;  %1378 = vrot.lane.b32.xlu1 %v1371_v10, %s2468_s5  ;;  %v1593_v39 = vadd.f32 %v1590_v19, %v1585_v25  ;;  %v1592_v10 = vadd.f32 %v1589_v20, %v1584_v5  ;;  %v1613_v20 = vstv %s2229_s9  ;;  %s2244_s9 = sld [smem:[#allocation6 + $0x94]] }
 0x327   : > { %v1616_v56 = vmul.f32 %v1613_v20, %v2762_v6 }
 0x328   : > { %v2980_v47 = vpop.permute.xlu0 %514  ;;  %v2982_v48 = vpop.permute.xlu1 %539 }
 0x329   : > { %3825 = vst [vmem:[#allocation26_spill] sm:$0xff] %v2980_v47  ;;  %3826 = vst [vmem:[#allocation27_spill] sm:$0xff] %v2982_v48 }
 0x32a   : > { %1188 = vrot.lane.b32.xlu0 %v1181_v50, %s2469_s11  ;;  %1186 = vrot.lane.b32.xlu1 %v1180_v52, %s2469_s11  ;;  %v1210_v50 = vadd.f32 %v1207_v41, %v1202_v43  ;;  %v1594_v52 = vadd.f32 %v1591_v42, %v1586_v44  ;;  %v1614_v41 = vmul.f32 %v1613_v20, %v2746_v15 }
 0x32c   : > { %v2990_v58 = vpop.permute.xlu0 %541  ;;  %v2992_v59 = vpop.permute.xlu1 %543 }
 0x32d   : > { %3827 = vst [vmem:[#allocation28_spill] sm:$0xff] %v2990_v58  ;;  %3828 = vst [vmem:[#allocation29_spill] sm:$0xff] %v2992_v59 }
 0x32e   : > { %1406 = vrot.lane.b32.xlu0 %v1400_v60, %s2469_s11  ;;  %1190 = vrot.lane.b32.xlu1 %v1182_v61, %s2469_s11  ;;  %v1203_v60 = vmul.f32 %v1201_v34, %v2743_v14  ;;  %v1421_v61 = vstv %s2217_s26  ;;  %s2232_s26 = sld [smem:[#allocation6 + $0x9a]] }
 0x32f   : > { %v1422_v19 = vmul.f32 %v1421_v61, %v2746_v15  ;;  %v1424_v42 = vmul.f32 %v1421_v61, %v2762_v6 }
 0x330   : > { %v3000_v12 = vpop.permute.xlu0 %568  ;;  %v3002_v13 = vpop.permute.xlu1 %570  ;;  %v1211_v7 = vadd.f32 %v1208_v54, %v1203_v60  ;;  %v1615_v60 = vmul.f32 %v1613_v20, %v2743_v14 }
 0x331   : > { %3829 = vst [vmem:[#allocation30_spill] sm:$0xff] %v3000_v12  ;;  %3830 = vst [vmem:[#allocation31_spill] sm:$0xff] %v3002_v13  ;;  %v1430_v34 = vadd.f32 %v1427_v9, %v1422_v19  ;;  %v1236_v19 = vstv %s2206_s8  ;;  %s2222_s8 = sld [smem:[#allocation6 + $0xa7]] }
 0x332   : > { %1410 = vrot.lane.b32.xlu0 %v1402_v16, %s2469_s11  ;;  %1408 = vrot.lane.b32.xlu1 %v1401_v18, %s2469_s11  ;;  %v1618_v16 = vstv %s2230_s29  ;;  %v1423_v18 = vmul.f32 %v1421_v61, %v2743_v14  ;;  %v1805_v61 = vstv %s2241_s12  ;;  %s2231_s29 = sld [smem:[#allocation6 + $0x1a]]  ;;  %s2207_s12 = sld [smem:[#allocation6 + $0x26]] }
 0x333   : > { %v1621_v53 = vmul.f32 %v1618_v16, %v2749_v21  ;;  %v1620_v54 = vmul.f32 %v1618_v16, %v2752_v22  ;;  %v1806_v20 = vmul.f32 %v1805_v61, %v2746_v15 }
 0x334   : > { %v3010_v2 = vpop.permute.xlu0 %572  ;;  %v3012_v35 = vpop.permute.xlu1 %597  ;;  %v1431_v5 = vadd.f32 %v1428_v8, %v1423_v18 }
 0x335   : > { %3831 = vst [vmem:[#allocation32_spill] sm:$0xff] %v3010_v2  ;;  %3832 = vst [vmem:[#allocation33_spill] sm:$0xff] %v3012_v35  ;;  %v1624_v8 = vadd.f32 %v1621_v53, %v1616_v56  ;;  %v1623_v9 = vadd.f32 %v1620_v54, %v1615_v60  ;;  %v1808_v54 = vmul.f32 %v1805_v61, %v2762_v6 }
 0x336   : > { %1600 = vrot.lane.b32.xlu0 %v1593_v39, %s2468_s5  ;;  %1598 = vrot.lane.b32.xlu1 %v1592_v10, %s2468_s5  ;;  %v1619_v39 = vmul.f32 %v1618_v16, %v2755_v23  ;;  %v1429_v10 = vmul.f32 %v1426_v55, %v2749_v21  ;;  %v1810_v55 = vstv %s2242_s25  ;;  %s2208_s25 = sld [smem:[#allocation6 + $0xa6]] }
 0x337   : > { %v1812_v18 = vmul.f32 %v1810_v55, %v2752_v22  ;;  %v1811_v16 = vmul.f32 %v1810_v55, %v2755_v23 }
 0x338   : > { %v3020_v45 = vpop.permute.xlu0 %599  ;;  %v3022_v46 = vpop.permute.xlu1 %601 }
 0x339   : > { %3833 = vst [vmem:[#allocation34_spill] sm:$0xff] %v3020_v45  ;;  %3834 = vst [vmem:[#allocation35_spill] sm:$0xff] %v3022_v46 }
 0x33a   : > { %1216 = vrot.lane.b32.xlu0 %v1210_v50, %s2470_s20  ;;  %1602 = vrot.lane.b32.xlu1 %v1594_v52, %s2468_s5  ;;  %v1622_v50 = vadd.f32 %v1619_v39, %v1614_v41  ;;  %v1432_v52 = vadd.f32 %v1429_v10, %v1424_v42  ;;  %v1814_v42 = vadd.f32 %v1811_v16, %v1806_v20  ;;  %v1456_v16 = vstv %s2220_s22  ;;  %s2234_s22 = sld [smem:[#allocation6 + $0xa1]] }
 0x33b   : > { %v1451_v20 = vstv %s2219_s10  ;;  %v1459_v33 = vmul.f32 %v1456_v16, %v2749_v21  ;;  %s2233_s10 = sld [smem:[#allocation6 + $0x21]] }
 0x33c   : > { %v3030_v62 = vpop.permute.xlu0 %626  ;;  %v3032_v63 = vpop.permute.xlu1 %628 }
 0x33d   : > { %3835 = vst [vmem:[#allocation36_spill] sm:$0xff] %v3030_v62  ;;  %3836 = vst [vmem:[#allocation37_spill] sm:$0xff] %v3032_v63 }
 0x33e   : > { %1220 = vrot.lane.b32.xlu0 %v1212_v3, %s2470_s20  ;;  %1218 = vrot.lane.b32.xlu1 %v1211_v7, %s2470_s20 }
 0x340   : > { %v3040_v24 = vpop.permute.xlu0 %630  ;;  %v3042_v25 = vpop.permute.xlu1 %655 }
 0x341   : > { %3837 = vst [vmem:[#allocation38_spill] sm:$0xff] %v3040_v24  ;;  %3838 = vst [vmem:[#allocation39_spill] sm:$0xff] %v3042_v25 }
 0x342   : > { %1438 = vrot.lane.b32.xlu0 %v1431_v5, %s2470_s20  ;;  %1436 = vrot.lane.b32.xlu1 %v1430_v34, %s2470_s20  ;;  %v1807_v5 = vmul.f32 %v1805_v61, %v2743_v14  ;;  %v1231_v34 = vstv %s2205_s13  ;;  %s2221_s13 = sld [smem:[#allocation6 + $0x27]] }
 0x343   : > { %v1232_v53 = vmul.f32 %v1231_v34, %v2746_v15  ;;  %v1233_v61 = vmul.f32 %v1231_v34, %v2743_v14 }
 0x344   : > { %v3050_v43 = vpop.permute.xlu0 %657  ;;  %v3052_v44 = vpop.permute.xlu1 %659  ;;  %v1815_v41 = vadd.f32 %v1812_v18, %v1807_v5  ;;  %v1239_v18 = vmul.f32 %v1236_v19, %v2749_v21  ;;  %v1234_v5 = vmul.f32 %v1231_v34, %v2762_v6  ;;  %v1452_v34 = vmul.f32 %v1451_v20, %v2746_v15 }
 0x345   : > { %3839 = vst [vmem:[#allocation40_spill] sm:$0xff] %v3050_v43  ;;  %3840 = vst [vmem:[#allocation41_spill] sm:$0xff] %v3052_v44 }
 0x346   : > { %1628 = vrot.lane.b32.xlu0 %v1622_v50, %s2469_s11  ;;  %1440 = vrot.lane.b32.xlu1 %v1432_v52, %s2470_s20  ;;  %v1237_v50 = vmul.f32 %v1236_v19, %v2755_v23  ;;  %v1813_v52 = vmul.f32 %v1810_v55, %v2749_v21  ;;  %v1238_v55 = vmul.f32 %v1236_v19, %v2752_v22 }
 0x347   : > { %v1457_v19 = vmul.f32 %v1456_v16, %v2755_v23 }
 0x348   : > { %v3060_v3 = vpop.permute.xlu0 %712  ;;  %v3062_v7 = vpop.permute.xlu1 %714 }
 0x349   : > { %3841 = vst [vmem:[#allocation42_spill] sm:$0xff] %v3060_v3 }
 0x34a   : > { %1632 = vrot.lane.b32.xlu0 %v1624_v8, %s2469_s11  ;;  %1630 = vrot.lane.b32.xlu1 %v1623_v9, %s2469_s11  ;;  %v1240_v8 = vadd.f32 %v1237_v50, %v1232_v53  ;;  %v1816_v9 = vadd.f32 %v1813_v52, %v1808_v54  ;;  %v1242_v50 = vadd.f32 %v1239_v18, %v1234_v5  ;;  %v1648_v54 = vstv %s2232_s26  ;;  %s2246_s26 = sld [smem:[#allocation6 + $0x9b]] }
 0x34b   : > { %v1241_v52 = vadd.f32 %v1238_v55, %v1233_v61  ;;  %v1458_v53 = vmul.f32 %v1456_v16, %v2752_v22  ;;  %v1460_v5 = vadd.f32 %v1457_v19, %v1452_v34  ;;  %v1649_v61 = vmul.f32 %v1648_v54, %v2755_v23 }
 0x34c   : > { %v3070_v39 = vpop.permute.xlu0 %716  ;;  %v3072_v10 = vpop.permute.xlu1 %742  ;;  %v1650_v16 = vmul.f32 %v1648_v54, %v2752_v22  ;;  %v1840_v34 = vstv %s2244_s9  ;;  %s2209_s9 = sld [smem:[#allocation6 + $0x2d]] }
 0x34d   : > { %3842 = vst [vmem:[#allocation43_spill] sm:$0xff] %v3072_v10  ;;  %v1843_v29 = vmul.f32 %v1840_v34, %v2749_v21 }
 0x34e   : > { %1822 = vrot.lane.b32.xlu0 %v1815_v41, %s2468_s5  ;;  %1820 = vrot.lane.b32.xlu1 %v1814_v42, %s2468_s5 }
 0x350   : > { %v3080_v56 = vpop.permute.xlu0 %744  ;;  %v3082_v60 = vpop.permute.xlu1 %746  ;;  %v1870_v24 = vstv %s2246_s26  ;;  %s3234_s26 = sld [smem:[#allocation6 + $0x4]] }
 0x351   : > { %v1873_v48 = vmul.f32 %v1870_v24, %v2749_v21 }
 0x352   : > { %1246 = vrot.lane.b32.xlu0 %v1240_v8, %s2471_s30  ;;  %1824 = vrot.lane.b32.xlu1 %v1816_v9, %s2468_s5  ;;  %v1453_v8 = vmul.f32 %v1451_v20, %v2743_v14  ;;  %v1643_v9 = vstv %s2231_s29  ;;  %s2243_s5 = sld [smem:[#allocation6 + $0x14]]  ;;  %s2210_s29 = sld [smem:[#allocation6 + $0xad]] }
 0x354   : > { %v3090_v41 = vpop.permute.xlu0 %772  ;;  %v3092_v42 = vpop.permute.xlu1 %774  ;;  %v1461_v55 = vadd.f32 %v1458_v53, %v1453_v8  ;;  %v1651_v8 = vmul.f32 %v1648_v54, %v2749_v21  ;;  %v1841_v54 = vmul.f32 %v1840_v34, %v2755_v23 }
 0x355   : > { %3843 = vst [vmem:[#allocation44_spill] sm:$0xff] %v3090_v41 }
 0x356   : > { %1250 = vrot.lane.b32.xlu0 %v1242_v50, %s2471_s30  ;;  %1248 = vrot.lane.b32.xlu1 %v1241_v52, %s2471_s30  ;;  %v1644_v50 = vmul.f32 %v1643_v9, %v2746_v15  ;;  %v1454_v52 = vmul.f32 %v1451_v20, %v2762_v6  ;;  %v1645_v20 = vmul.f32 %v1643_v9, %v2743_v14 }
 0x358   : > { %v3100_v0 = vpop.permute.xlu0 %776  ;;  %v3102_v18 = vpop.permute.xlu1 %802  ;;  %v1652_v53 = vadd.f32 %v1649_v61, %v1644_v50  ;;  %v1462_v19 = vadd.f32 %v1459_v33, %v1454_v52  ;;  %v1653_v33 = vadd.f32 %v1650_v16, %v1645_v20  ;;  %v1842_v50 = vmul.f32 %v1840_v34, %v2752_v22 }
 0x359   : > { %3844 = vst [vmem:[#allocation45_spill] sm:$0xff] %v3102_v18  ;;  %v1266_v52 = vstv %s2208_s25  ;;  %s3187_s25 = sld [smem:[#allocation6 + $0x2e]] }
 0x35a   : > { %1468 = vrot.lane.b32.xlu0 %v1461_v55, %s2471_s30  ;;  %1466 = vrot.lane.b32.xlu1 %v1460_v5, %s2471_s30  ;;  %v1646_v55 = vmul.f32 %v1643_v9, %v2762_v6  ;;  %v1835_v5 = vstv %s2243_s5  ;;  %v1267_v20 = vmul.f32 %v1266_v52, %v2755_v23  ;;  %v1268_v34 = vmul.f32 %v1266_v52, %v2752_v22  ;;  %s3178_s5 = sld [smem:[#allocation6 + $0xae]] }
 0x35b   : > { %v1836_v9 = vmul.f32 %v1835_v5, %v2746_v15 }
 0x35c   : > { %v3110_v28 = vpop.permute.xlu0 %804  ;;  %v3112_v30 = vpop.permute.xlu1 %806  ;;  %v1654_v61 = vadd.f32 %v1651_v8, %v1646_v55 }
 0x35d   : > { %v1844_v55 = vadd.f32 %v1841_v54, %v1836_v9  ;;  %v1486_v9 = vstv %s2222_s8  ;;  %s3205_s8 = sld [smem:[#allocation6 + $0x28]] }
 0x35e   : > { %1658 = vrot.lane.b32.xlu0 %v1652_v53, %s2470_s20  ;;  %1470 = vrot.lane.b32.xlu1 %v1462_v19, %s2471_s30  ;;  %v1837_v53 = vmul.f32 %v1835_v5, %v2743_v14  ;;  %v1261_v19 = vstv %s2207_s12  ;;  %s3198_s12 = sld [smem:[#allocation6 + $0xa8]] }
 0x360   : > { %v3120_v4 = vpop.permute.xlu0 %832  ;;  %v3122_v32 = vpop.permute.xlu1 %834  ;;  %v1845_v16 = vadd.f32 %v1842_v50, %v1837_v53  ;;  %v1269_v53 = vmul.f32 %v1266_v52, %v2749_v21  ;;  %v1678_v52 = vstv %s2234_s22  ;;  %s3220_s22 = sld [smem:[#allocation6 + $0x22]] }
 0x361   : > { %3845 = vst [vmem:[#allocation46_spill] sm:$0xff] %v3120_v4 }
 0x362   : > { %1662 = vrot.lane.b32.xlu0 %v1654_v61, %s2470_s20  ;;  %1660 = vrot.lane.b32.xlu1 %v1653_v33, %s2470_s20  ;;  %v1262_v61 = vmul.f32 %v1261_v19, %v2746_v15  ;;  %v1838_v33 = vmul.f32 %v1835_v5, %v2762_v6  ;;  %v1263_v5 = vmul.f32 %v1261_v19, %v2743_v14 }
 0x364   : > { %v3130_v27 = vpop.permute.xlu0 %836  ;;  %v3132_v8 = vpop.permute.xlu1 %862  ;;  %v1270_v50 = vadd.f32 %v1267_v20, %v1262_v61  ;;  %v1846_v54 = vadd.f32 %v1843_v29, %v1838_v33  ;;  %v1271_v20 = vadd.f32 %v1268_v34, %v1263_v5  ;;  %v1488_v29 = vmul.f32 %v1486_v9, %v2752_v22 }
 0x365   : > { %3846 = vst [vmem:[#allocation47_spill] sm:$0xff] %v3132_v8  ;;  %v1487_v61 = vmul.f32 %v1486_v9, %v2755_v23  ;;  %v1489_v5 = vmul.f32 %v1486_v9, %v2749_v21 }
 0x366   : > { %1852 = vrot.lane.b32.xlu0 %v1845_v16, %s2469_s11  ;;  %1850 = vrot.lane.b32.xlu1 %v1844_v55, %s2469_s11  ;;  %v1264_v16 = vmul.f32 %v1261_v19, %v2762_v6  ;;  %v1481_v55 = vstv %s2221_s13  ;;  %v1673_v19 = vstv %s2233_s10  ;;  %s3217_s13 = sld [smem:[#allocation6 + $0x3]]  ;;  %s3222_s10 = sld [smem:[#allocation6 + $0xa2]] }
 0x367   : > { %v1483_v33 = vmul.f32 %v1481_v55, %v2743_v14  ;;  %v1676_v9 = vmul.f32 %v1673_v19, %v2762_v6 }
 0x368   : > { %v3140_v40 = vpop.permute.xlu0 %864  ;;  %v3142_v25 = vpop.permute.xlu1 %866  ;;  %v1272_v62 = vadd.f32 %v1269_v53, %v1264_v16  ;;  %v1679_v16 = vmul.f32 %v1678_v52, %v2755_v23 }
 0x369   : > { %3847 = vst [vmem:[#allocation48_spill] sm:$0xff] %v3140_v40  ;;  %v1491_v53 = vadd.f32 %v1488_v29, %v1483_v33  ;;  %v1680_v33 = vmul.f32 %v1678_v52, %v2752_v22 }
 0x36a   : > { %1276 = vrot.lane.b32.xlu0 %v1270_v50, %s2472_s14  ;;  %1854 = vrot.lane.b32.xlu1 %v1846_v54, %s2469_s11  ;;  %v1482_v50 = vmul.f32 %v1481_v55, %v2746_v15  ;;  %s2245_s11 = sld [smem:[#allocation6 + $0x1b]] }
 0x36c   : > { %v937_v43 = vpop.permute.xlu0 %936  ;;  %v935_v44 = vpop.permute.xlu1 %934  ;;  %v1490_v34 = vadd.f32 %v1487_v61, %v1482_v50  ;;  %v1681_v61 = vmul.f32 %v1678_v52, %v2749_v21  ;;  %v1675_v50 = vmul.f32 %v1673_v19, %v2743_v14 }
 0x36d   : > { %v940_v52 = vsel %vm516_vm6, %v935_v44, %v937_v43 }
 0x36e   : > { %1280 = vrot.lane.b32.xlu0 %v1272_v62, %s2472_s14  ;;  %1278 = vrot.lane.b32.xlu1 %v1271_v20, %s2472_s14  ;;  %v1674_v62 = vmul.f32 %v1673_v19, %v2746_v15  ;;  %v1484_v20 = vmul.f32 %v1481_v55, %v2762_v6 }
 0x370   : > { %v965_v54 = vpop.permute.xlu0 %964  ;;  %v3156_v63 = vpop.permute.xlu1 %938  ;;  %v1682_v46 = vadd.f32 %v1679_v16, %v1674_v62  ;;  %v1492_v29 = vadd.f32 %v1489_v5, %v1484_v20  ;;  %v1865_v55 = vstv %s2245_s11  ;;  %v1684_v5 = vadd.f32 %v1681_v61, %v1676_v9  ;;  %s3237_s11 = sld [smem:[#allocation6 + $0x84]] }
 0x371   : > { %v1683_v62 = vadd.f32 %v1680_v33, %v1675_v50  ;;  %v1871_v20 = vmul.f32 %v1870_v24, %v2755_v23  ;;  %v1866_v19 = vmul.f32 %v1865_v55, %v2746_v15  ;;  %v1291_v61 = vstv %s2209_s9  ;;  %s3247_s9 = sld [smem:[#allocation6 + $0xaf]] }
 0x372   : > { %1498 = vrot.lane.b32.xlu0 %v1491_v53, %s2472_s14  ;;  %1496 = vrot.lane.b32.xlu1 %v1490_v34, %s2472_s14  ;;  %v1872_v53 = vmul.f32 %v1870_v24, %v2752_v22  ;;  %v1296_v34 = vstv %s2210_s29  ;;  %v945_v50 = vadd.f32 %v940_v52, %v2903_v11  ;;  %v1868_v11 = vmul.f32 %v1865_v55, %v2762_v6  ;;  %s3239_s29 = sld [smem:[#allocation6 + $0x2f]] }
 0x373   : > { %v1298_v24 = vmul.f32 %v1296_v34, %v2752_v22 }
 0x374   : > { %v3164_v35 = vpop.permute.xlu0 %968  ;;  %v967_v45 = vpop.permute.xlu1 %966 }
 0x375   : > { %v970_v33 = vsel %vm545_vm7, %v965_v54, %v967_v45  ;;  %v971_v44 = vsel %vm545_vm7, %v967_v45, %v3164_v35 }
 0x376   : > { %1688 = vrot.lane.b32.xlu0 %v1682_v46, %s2471_s30  ;;  %1500 = vrot.lane.b32.xlu1 %v1492_v29, %s2472_s14  ;;  %v941_v46 = vsel %vm516_vm6, %v937_v43, %v3156_v63  ;;  %v1867_v29 = vmul.f32 %v1865_v55, %v2743_v14  ;;  %v1297_v43 = vmul.f32 %v1296_v34, %v2755_v23 }
 0x377   : > { %v946_v13 = vadd.f32 %v941_v46, %v2914_v51  ;;  %v1299_v51 = vmul.f32 %v1296_v34, %v2749_v21  ;;  %v1876_v46 = vadd.f32 %v1873_v48, %v1868_v11  ;;  %v1511_v48 = vstv %s3187_s25  ;;  %s3255_s25 = sld [smem:[#allocation6 + $0x30]] }
 0x378   : > { %v997_v12 = vpop.permute.xlu0 %996  ;;  %v995_v16 = vpop.permute.xlu1 %994  ;;  %v1875_v9 = vadd.f32 %v1872_v53, %v1867_v29  ;;  %v1292_v53 = vmul.f32 %v1291_v61, %v2746_v15  ;;  %v975_v29 = vadd.f32 %v970_v33, %v945_v50  ;;  %v1294_v33 = vmul.f32 %v1291_v61, %v2762_v6 }
 0x379   : > { %v1000_v54 = vsel %vm574_vm8, %v995_v16, %v997_v12  ;;  %v976_v58 = vadd.f32 %v971_v44, %v946_v13  ;;  %v1516_v44 = vstv %s3178_s5  ;;  %v1513_v11 = vmul.f32 %v1511_v48, %v2743_v14  ;;  %s3249_s5 = sld [smem:[#allocation6 + $0x29]] }
 0x37a   : > { %1692 = vrot.lane.b32.xlu0 %v1684_v5, %s2471_s30  ;;  %1690 = vrot.lane.b32.xlu1 %v1683_v62, %s2471_s30  ;;  %v1874_v62 = vadd.f32 %v1871_v20, %v1866_v19  ;;  %v1300_v52 = vadd.f32 %v1297_v43, %v1292_v53 }
 0x37c   : > { %v1025_v5 = vpop.permute.xlu0 %1024  ;;  %v3191_v2 = vpop.permute.xlu1 %998 }
 0x37d   : > { %v1001_v45 = vsel %vm574_vm8, %v997_v12, %v3191_v2  ;;  %v1005_v12 = vadd.f32 %v1000_v54, %v975_v29  ;;  %v1518_v54 = vmul.f32 %v1516_v44, %v2752_v22 }
 0x37e   : > { %1882 = vrot.lane.b32.xlu0 %v1875_v9, %s2470_s20  ;;  %1880 = vrot.lane.b32.xlu1 %v1874_v62, %s2470_s20  ;;  %v1006_v16 = vadd.f32 %v1001_v45, %v976_v58  ;;  %v1293_v58 = vmul.f32 %v1291_v61, %v2743_v14  ;;  %v1517_v45 = vmul.f32 %v1516_v44, %v2755_v23  ;;  %v1708_v61 = vstv %s3198_s12  ;;  %s3278_s12 = sld [smem:[#allocation6 + $0xa9]] }
 0x37f   : > { %v3292_v59 = vstv %s3249_s5  ;;  %s482_s5 = sld [smem:[#allocation6]] }
 0x380   : > { %v3207_v20 = vpop.permute.xlu0 %1028  ;;  %v1027_v13 = vpop.permute.xlu1 %1026  ;;  %v1301_v62 = vadd.f32 %v1298_v24, %v1293_v58  ;;  %v1514_v58 = vmul.f32 %v1511_v48, %v2762_v6  ;;  %v1926_v49 = vmul.f32 %v3292_v59, %v2746_v15 }
 0x381   : > { %v1030_v19 = vsel %vm603_vm9, %v1025_v5, %v1027_v13  ;;  %v1031_v55 = vsel %vm603_vm9, %v1027_v13, %v3207_v20  ;;  %v1302_v5 = vadd.f32 %v1299_v51, %v1294_v33  ;;  %v1703_v51 = vstv %s3205_s8  ;;  %s3303_s8 = sld [smem:[#allocation6 + $0xb0]] }
 0x382   : > { %v1035_v9 = vadd.f32 %v1030_v19, %v1005_v12  ;;  %v1036_v34 = vadd.f32 %v1031_v55, %v1006_v16  ;;  %1306 = vrot.lane.b32.xlu0 %v1300_v52, %s2473_s23  ;;  %1884 = vrot.lane.b32.xlu1 %v1876_v46, %s2470_s20  ;;  %v1512_v12 = vmul.f32 %v1511_v48, %v2746_v15  ;;  %s3232_s20 = sld [smem:[#allocation6 + $0x83]] }
 0x383   : > { %v1521_v13 = vadd.f32 %v1518_v54, %v1513_v11  ;;  %v1709_v46 = vmul.f32 %v1708_v61, %v2755_v23  ;;  %v1519_v19 = vmul.f32 %v1516_v44, %v2749_v21  ;;  %v1125_v44 = vstv %s3217_s13  ;;  %s2474_s13 = smov 127  }
 0x384   : > { %v1057_v43 = vpop.permute.xlu0 %1056  ;;  %v1055_v50 = vpop.permute.xlu1 %1054  ;;  %v1520_v52 = vadd.f32 %v1517_v45, %v1512_v12  ;;  %v1711_v45 = vmul.f32 %v1708_v61, %v2749_v21  ;;  %v689_v48 = vmul.f32 %v2847_v38, %v2749_v21  ;;  %v1705_v38 = vmul.f32 %v1703_v51, %v2743_v14 }
 0x385   : > { %v1060_v53 = vsel %vm632_vm10, %v1055_v50, %v1057_v43  ;;  %v1895_v50 = vstv %s3220_s22  ;;  %v1126_v47 = vmul.f32 %v1125_v44, %v2746_v15  ;;  %s2475_s22 = smov 126  }
 0x386   : > { %v1065_v29 = vadd.f32 %v1060_v53, %v1035_v9  ;;  %1310 = vrot.lane.b32.xlu0 %v1302_v5, %s2473_s23  ;;  %1308 = vrot.lane.b32.xlu1 %v1301_v62, %s2473_s23  ;;  %v1704_v9 = vmul.f32 %v1703_v51, %v2746_v15  ;;  %v1710_v53 = vmul.f32 %v1708_v61, %v2752_v22 }
 0x388   : > { %v1085_v24 = vpop.permute.xlu0 %1084  ;;  %v3241_v16 = vpop.permute.xlu1 %1058  ;;  %v1712_v54 = vadd.f32 %v1709_v46, %v1704_v9  ;;  %v1130_v61 = vstv %s3232_s20  ;;  %s2476_s20 = smov 125  }
 0x389   : > { %v1061_v55 = vsel %vm632_vm10, %v1057_v43, %v3241_v16  ;;  %v1900_v43 = vstv %s3222_s10  ;;  %s2239_s10 = sld [smem:[#allocation6 + $0x6]] }
 0x38a   : > { %v1066_v33 = vadd.f32 %v1061_v55, %v1036_v34  ;;  %1528 = vrot.lane.b32.xlu0 %v1521_v13, %s2473_s23  ;;  %1526 = vrot.lane.b32.xlu1 %v1520_v52, %s2473_s23  ;;  %v1522_v34 = vadd.f32 %v1519_v19, %v1514_v58  ;;  %v1706_v13 = vmul.f32 %v1703_v51, %v2762_v6  ;;  %v1345_v19 = vstv %s3234_s26  ;;  %s2477_s26 = smov 124  }
 0x38b   : > { %v1350_v55 = vstv %s3237_s11  ;;  %v1903_v36 = vmul.f32 %v1900_v43, %v2749_v21  ;;  %s2478_s11 = smov 123  }
 0x38c   : > { %v3260_v5 = vpop.permute.xlu0 %1088  ;;  %v1087_v62 = vpop.permute.xlu1 %1086  ;;  %v1714_v58 = vadd.f32 %v1711_v45, %v1706_v13  ;;  %v1897_v45 = vmul.f32 %v1895_v50, %v2743_v14  ;;  %v3301_v13 = vstv %s3255_s25  ;;  %v1353_v18 = vmul.f32 %v1350_v55, %v2749_v21  ;;  %s2259_s25 = sshll.u32 %s2529_s19, 10 }
 0x38d   : > { %v1090_v11 = vsel %vm661_vm11, %v1085_v24, %v1087_v62  ;;  %v1091_v12 = vsel %vm661_vm11, %v1087_v62, %v3260_v5  ;;  %v684_v24 = vmul.f32 %v2845_v37, %v2762_v6  ;;  %v1713_v62 = vadd.f32 %v1710_v53, %v1705_v38  ;;  %s3721_s19 = scalar_lea.hbm %s3775_s4, %s2259_s25 }
 0x38e   : > { %v3270_v52 = vadd.f32 %v1090_v11, %v1065_v29  ;;  %v3272_v46 = vadd.f32 %v1091_v12, %v1066_v33  ;;  %1718 = vrot.lane.b32.xlu0 %v1712_v54, %s2472_s14  ;;  %1530 = vrot.lane.b32.xlu1 %v1522_v34, %s2473_s23  ;;  %v1733_v29 = vstv %s3239_s29  ;;  %v1902_v54 = vmul.f32 %v1900_v43, %v2752_v22  ;;  %s2479_s29 = smov 122  }
 0x38f   : > { %v1901_v34 = vmul.f32 %v1900_v43, %v2755_v23  ;;  %v3287_v11 = vadd.f32 %v689_v48, %v684_v24  ;;  %v1738_v12 = vstv %s3247_s9  ;;  %v911_v37 = vmul.f32 %v2890_v31, %v2749_v21  ;;  %s2156_s9 = sld [smem:[#allocation6 + $0x80]] }
 0x390   : > { %3848 = vst [vmem:[#allocation49_spill] sm:$0xff] %v3270_v52  ;;  %3849 = vst [vmem:[#allocation50_spill] sm:$0xff] %v3272_v46  ;;  %v1159_v33 = vpop.permute.xlu0 %1158  ;;  %v1157_v9 = vpop.permute.xlu1 %1156  ;;  %v1896_v53 = vmul.f32 %v1895_v50, %v2746_v15  ;;  %v906_v48 = vmul.f32 %v2888_v26, %v2762_v6  ;;  %v1131_v38 = vmul.f32 %v1130_v61, %v2755_v23 }
 0x391   : > { %v1162_v51 = vsel %vm516_vm6, %v1157_v9, %v1159_v33  ;;  %v1132_v24 = vmul.f32 %v1130_v61, %v2752_v22  ;;  %v1133_v31 = vmul.f32 %v1130_v61, %v2749_v21  ;;  %v1739_v17 = vmul.f32 %v1738_v12, %v2755_v23 }
 0x392   : > { %1722 = vrot.lane.b32.xlu0 %v1714_v58, %s2472_s14  ;;  %1720 = vrot.lane.b32.xlu1 %v1713_v62, %s2472_s14  ;;  %v1905_v62 = vadd.f32 %v1902_v54, %v1897_v45  ;;  %v1904_v1 = vadd.f32 %v1901_v34, %v1896_v53  ;;  %v1127_v46 = vmul.f32 %v1125_v44, %v2743_v14  ;;  %v1930_v34 = vstv %s3278_s12  ;;  %s229_s12 = scalar_lea.vmem [#allocation7], %s2153_s7  ;;  %s2047_s7 = scalar_lea.sflag [#allocation4], %s2635_s6 }
 0x393   : > { %v1128_v26 = vmul.f32 %v1125_v44, %v2762_v6  ;;  %v914_v4 = vadd.f32 %v911_v37, %v906_v48  ;;  %v1734_v61 = vmul.f32 %v1733_v29, %v2746_v15  ;;  %v1898_v54 = vmul.f32 %v1895_v50, %v2762_v6 }
 0x394   : > { %v1377_v9 = vpop.permute.xlu0 %1376  ;;  %v1161_v58 = vpop.permute.xlu1 %1160  ;;  %v1134_v45 = vadd.f32 %v1131_v38, %v1126_v47  ;;  %v1135_v43 = vadd.f32 %v1132_v24, %v1127_v46  ;;  %v1741_v37 = vmul.f32 %v1738_v12, %v2749_v21  ;;  %v1740_v48 = vmul.f32 %v1738_v12, %v2752_v22 }
 0x395   : > { %v1163_v8 = vsel %vm516_vm6, %v1159_v33, %v1161_v58  ;;  %v1136_v53 = vadd.f32 %v1133_v31, %v1128_v26  ;;  %v1742_v52 = vadd.f32 %v1739_v17, %v1734_v61  ;;  %v1906_v33 = vadd.f32 %v1903_v36, %v1898_v54 }
 0x396   : > { %1912 = vrot.lane.b32.xlu0 %v1905_v62, %s2471_s30  ;;  %1910 = vrot.lane.b32.xlu1 %v1904_v1, %s2471_s30  ;;  %v1348_v1 = vmul.f32 %v1345_v19, %v2762_v6  ;;  %v1351_v62 = vmul.f32 %v1350_v55, %v2755_v23  ;;  %v1352_v46 = vmul.f32 %v1350_v55, %v2752_v22  ;;  %v1960_v38 = vstv %s3303_s8  ;;  %s2060_s8 = sshll.u32 %s229_s12, 4  ;;  %s3723_s8 = int_to_ptr.vmem [resolvable:$true] %s2060_s8 }
 0x397   : > { %v1736_v17 = vmul.f32 %v1733_v29, %v2762_v6  ;;  %v1735_v36 = vmul.f32 %v1733_v29, %v2743_v14  ;;  %v1346_v12 = vmul.f32 %v1345_v19, %v2746_v15  ;;  %v1347_v24 = vmul.f32 %v1345_v19, %v2743_v14 }
 0x398   : > { %v1381_v41 = vpop.permute.xlu0 %1380  ;;  %v1379_v44 = vpop.permute.xlu1 %1378  ;;  %v1932_v31 = vmul.f32 %v1930_v34, %v2752_v22  ;;  %v1167_v26 = vadd.f32 %v1162_v51, %v1134_v45  ;;  %v1356_v61 = vadd.f32 %v1353_v18, %v1348_v1  ;;  %v1927_v29 = vmul.f32 %v3292_v59, %v2743_v14 }
 0x399   : > { %v1382_v50 = vsel %vm516_vm6, %v1377_v9, %v1379_v44  ;;  %v1383_v47 = vsel %vm516_vm6, %v1379_v44, %v1381_v41  ;;  %v1931_v9 = vmul.f32 %v1930_v34, %v2755_v23  ;;  %v1743_v44 = vadd.f32 %v1740_v48, %v1735_v36 }
 0x39a   : > { %1748 = vrot.lane.b32.xlu0 %v1742_v52, %s2473_s23  ;;  %1914 = vrot.lane.b32.xlu1 %v1906_v33, %s2471_s30  ;;  %v1744_v52 = vadd.f32 %v1741_v37, %v1736_v17  ;;  %v1961_v19 = vmul.f32 %v1960_v38, %v2755_v23  ;;  %v1354_v10 = vadd.f32 %v1351_v62, %v1346_v12  ;;  %s2226_s30 = sld [smem:[#allocation6 + $0x85]] }
 0x39b   : > { %v1355_v3 = vadd.f32 %v1352_v46, %v1347_v24  ;;  %v1169_v18 = vadd.f32 %v1161_v58, %v1136_v53  ;;  %v1935_v51 = vadd.f32 %v1932_v31, %v1927_v29  ;;  %v1934_v45 = vadd.f32 %v1931_v9, %v1926_v49 }
 0x39c   : > { %v1189_v55 = vpop.permute.xlu0 %1188  ;;  %v1187_v54 = vpop.permute.xlu1 %1186  ;;  %v1956_v37 = vmul.f32 %v3301_v13, %v2746_v15  ;;  %v1168_v48 = vadd.f32 %v1163_v8, %v1135_v43  ;;  %v1928_v36 = vmul.f32 %v3292_v59, %v2762_v6  ;;  %v1933_v62 = vmul.f32 %v1930_v34, %v2749_v21 }
 0x39d   : > { %v1192_v33 = vsel %vm545_vm7, %v1187_v54, %v1189_v55  ;;  %v1958_v46 = vmul.f32 %v3301_v13, %v2762_v6  ;;  %v725_v12 = vadd.f32 %v3070_v39, %v3287_v11  ;;  %v947_v24 = vadd.f32 %v3156_v63, %v914_v4 }
 0x39e   : > { %v3344_v40 = vadd.f32 %v1192_v33, %v1167_v26  ;;  %1752 = vrot.lane.b32.xlu0 %v1744_v52, %s2473_s23  ;;  %1750 = vrot.lane.b32.xlu1 %v1743_v44, %s2473_s23  ;;  %v1964_v53 = vadd.f32 %v1961_v19, %v1956_v37  ;;  %v1963_v59 = vmul.f32 %v1960_v38, %v2749_v21 }
 0x39f   : > { %v755_v34 = vadd.f32 %v3082_v60, %v725_v12  ;;  %v1389_v43 = vadd.f32 %v1381_v41, %v1356_v61  ;;  %v1957_v31 = vmul.f32 %v3301_v13, %v2743_v14  ;;  %v1962_v11 = vmul.f32 %v1960_v38, %v2752_v22 }
 0x3a0   : > { %v1407_v1 = vpop.permute.xlu0 %1406  ;;  %v1191_v17 = vpop.permute.xlu1 %1190  ;;  %v977_v9 = vadd.f32 %v3164_v35, %v947_v24  ;;  %v1387_v26 = vadd.f32 %v1382_v50, %v1354_v10  ;;  %v1936_v54 = vadd.f32 %v1933_v62, %v1928_v36 }
 0x3a1   : > { %v1193_v58 = vsel %vm545_vm7, %v1189_v55, %v1191_v17  ;;  %v1199_v49 = vadd.f32 %v1191_v17, %v1169_v18  ;;  %v1388_v55 = vadd.f32 %v1383_v47, %v1355_v3  ;;  %v785_v52 = vadd.f32 %v3100_v0, %v755_v34 }
 0x3a2   : > { %v1198_v8 = vadd.f32 %v1193_v58, %v1168_v48  ;;  %1942 = vrot.lane.b32.xlu0 %v1935_v51, %s2472_s14  ;;  %1940 = vrot.lane.b32.xlu1 %v1934_v45, %s2472_s14  ;;  %v1007_v41 = vadd.f32 %v3191_v2, %v977_v9  ;;  %v1966_v47 = vadd.f32 %v1963_v59, %v1958_v46 }
 0x3a3   : > { %v815_v35 = vadd.f32 %v3112_v30, %v785_v52  ;;  %v1965_v38 = vadd.f32 %v1962_v11, %v1957_v31 }
 0x3a4   : > { %v1411_v4 = vpop.permute.xlu0 %1410  ;;  %v1409_v63 = vpop.permute.xlu1 %1408  ;;  %v1037_v3 = vadd.f32 %v3207_v20, %v1007_v41 }
 0x3a5   : > { %v1419_v44 = vadd.f32 %v1411_v4, %v1389_v43  ;;  %v1412_v33 = vsel %vm545_vm7, %v1407_v1, %v1409_v63  ;;  %v1413_v29 = vsel %vm545_vm7, %v1409_v63, %v1411_v4  ;;  %v845_v18 = vadd.f32 %v3130_v27, %v815_v35 }
 0x3a6   : > { %v1417_v61 = vadd.f32 %v1412_v33, %v1387_v26  ;;  %v1418_v13 = vadd.f32 %v1413_v29, %v1388_v55  ;;  %1970 = vrot.lane.b32.xlu0 %v1964_v53, %s2473_s23  ;;  %1944 = vrot.lane.b32.xlu1 %v1936_v54, %s2472_s14  ;;  %v1067_v2 = vadd.f32 %v3241_v16, %v1037_v3  ;;  %s2225_s14 = sld [smem:[#allocation6 + $0x5]] }
 0x3a7   : > { %v875_v51 = vadd.f32 %v3142_v25, %v845_v18 }
 0x3a8   : > { %v1601_v10 = vpop.permute.xlu0 %1600  ;;  %v1599_v50 = vpop.permute.xlu1 %1598  ;;  %v1097_v45 = vadd.f32 %v3260_v5, %v1067_v2  ;;  %v1572_v5 = vstv %s2226_s30 }
 0x3a9   : > { %v1604_v19 = vsel %vm516_vm6, %v1599_v50, %v1601_v10  ;;  %v1575_v59 = vmul.f32 %v1572_v5, %v2749_v21  ;;  %v1573_v43 = vmul.f32 %v1572_v5, %v2755_v23 }
 0x3aa   : > { %1974 = vrot.lane.b32.xlu0 %v1966_v47, %s2473_s23  ;;  %1972 = vrot.lane.b32.xlu1 %v1965_v38, %s2473_s23  ;;  %s2240_s23 = sld [smem:[#allocation6 + $0x86]] }
 0x3ac   : > { %v1217_v20 = vpop.permute.xlu0 %1216  ;;  %v1603_v37 = vpop.permute.xlu1 %1602  ;;  %v1567_v58 = vstv %s2225_s14 }
 0x3ad   : > { %v1605_v48 = vsel %vm516_vm6, %v1601_v10, %v1603_v37  ;;  %v1570_v11 = vmul.f32 %v1567_v58, %v2762_v6  ;;  %v1568_v9 = vmul.f32 %v1567_v58, %v2746_v15 }
 0x3ae   : > { %891 = vrot.lane.b32.xlu0 %v875_v51, %s2474_s13  ;;  %1113 = vrot.lane.b32.xlu1 %v1097_v45, %s2475_s22 }
 0x3af   : > { %v1578_v55 = vadd.f32 %v1575_v59, %v1570_v11  ;;  %v1576_v54 = vadd.f32 %v1573_v43, %v1568_v9 }
 0x3b0   : > { %v1221_v16 = vpop.permute.xlu0 %1220  ;;  %v1219_v1 = vpop.permute.xlu1 %1218 }
 0x3b1   : > { %v3385_v17 = vadd.f32 %v1221_v16, %v1199_v49  ;;  %v1222_v36 = vsel %vm574_vm8, %v1217_v20, %v1219_v1  ;;  %v1223_v62 = vsel %vm574_vm8, %v1219_v1, %v1221_v16  ;;  %v1574_v49 = vmul.f32 %v1572_v5, %v2752_v22 }
 0x3b2   : > { %v1227_v46 = vadd.f32 %v1222_v36, %v3344_v40  ;;  %v3390_v12 = vadd.f32 %v1223_v62, %v1198_v8  ;;  %v1569_v40 = vmul.f32 %v1567_v58, %v2743_v14  ;;  %v1611_v29 = vadd.f32 %v1603_v37, %v1578_v55 }
 0x3b3   : > { %v1609_v41 = vadd.f32 %v1604_v19, %v1576_v54 }
 0x3b4   : > { %v1439_v53 = vpop.permute.xlu0 %1438  ;;  %v1437_v24 = vpop.permute.xlu1 %1436  ;;  %v1577_v52 = vadd.f32 %v1574_v49, %v1569_v40 }
 0x3b5   : > { %v1442_v34 = vsel %vm574_vm8, %v1437_v24, %v1439_v53  ;;  %v3433_v24 = vstv %s2240_s23 }
 0x3b6   : > { %v3396_v31 = vadd.f32 %v1442_v34, %v1417_v61  ;;  %v1610_v61 = vadd.f32 %v1605_v48, %v1577_v52  ;;  %v1796_v49 = vmul.f32 %v3433_v24, %v2752_v22 }
 0x3b8   : > { %v1629_v8 = vpop.permute.xlu0 %1628  ;;  %v1441_v26 = vpop.permute.xlu1 %1440 }
 0x3b9   : > { %v1443_v4 = vsel %vm574_vm8, %v1439_v53, %v1441_v26  ;;  %v3402_v63 = vadd.f32 %v1441_v26, %v1419_v44 }
 0x3ba   : > { %v1448_v33 = vadd.f32 %v1443_v4, %v1418_v13 }
 0x3bc   : > { %v1633_v35 = vpop.permute.xlu0 %1632  ;;  %v1631_v3 = vpop.permute.xlu1 %1630 }
 0x3bd   : > { %v3404_v10 = vadd.f32 %v1633_v35, %v1611_v29  ;;  %v1634_v50 = vsel %vm545_vm7, %v1629_v8, %v1631_v3  ;;  %v1635_v47 = vsel %vm545_vm7, %v1631_v3, %v1633_v35 }
 0x3be   : > { %v1639_v38 = vadd.f32 %v1634_v50, %v1609_v41  ;;  %v3408_v18 = vadd.f32 %v1635_v47, %v1610_v61 }
 0x3c0   : > { %v1823_v2 = vpop.permute.xlu0 %1822  ;;  %v1821_v44 = vpop.permute.xlu1 %1820 }
 0x3c1   : > { %v3411_v51 = vsel %vm516_vm6, %v1821_v44, %v1823_v2 }
 0x3c4   : > { %v1247_v13 = vpop.permute.xlu0 %1246  ;;  %v3413_v45 = vpop.permute.xlu1 %1824 }
 0x3c5   : > { %v1827_v19 = vsel %vm516_vm6, %v1823_v2, %v3413_v45 }
 0x3c8   : > { %v3417_v20 = vpop.permute.xlu0 %1250  ;;  %v3419_v37 = vpop.permute.xlu1 %1248 }
 0x3c9   : > { %v1252_v48 = vsel %vm603_vm9, %v1247_v13, %v3419_v37 }
 0x3ca   : > { %v3423_v16 = vadd.f32 %v1252_v48, %v1227_v46  ;;  %v3439_v46 = vstv %s2239_s10  ;;  %v1259_v48 = vadd.f32 %v3417_v20, %v3385_v17  ;;  %v779_v17 = vsel %vm574_vm8, %v3092_v42, %v3100_v0 }
 0x3cb   : > { %v1791_v9 = vmul.f32 %v3439_v46, %v2743_v14 }
 0x3cc   : > { %v3425_v1 = vpop.permute.xlu0 %1468  ;;  %v3427_v36 = vpop.permute.xlu1 %1466 }
 0x3cd   : > { %v1799_v26 = vadd.f32 %v1796_v49, %v1791_v9 }
 0x3cf   : > { %v1832_v55 = vadd.f32 %v1827_v19, %v1799_v26  ;;  %v749_v26 = vsel %vm545_vm7, %v3080_v56, %v3082_v60 }
 0x3d0   : > { %v1659_v62 = vpop.permute.xlu0 %1658  ;;  %v1471_v5 = vpop.permute.xlu1 %1470 }
 0x3d1   : > { %v1473_v58 = vsel %vm603_vm9, %v3425_v1, %v1471_v5  ;;  %v1479_v14 = vadd.f32 %v1471_v5, %v3402_v63  ;;  %v3850_v63 = vld [vmem:[#allocation48_spill] sm:$0xff] }
 0x3d2   : > { %v3431_v53 = vadd.f32 %v1473_v58, %v1448_v33  ;;  %v719_v58 = vsel %vm516_vm6, %v3062_v7, %v3070_v39  ;;  %v869_v5 = vsel %vm661_vm11, %v3850_v63, %v3142_v25 }
 0x3d4   : > { %v3435_v59 = vpop.permute.xlu0 %1662  ;;  %v3437_v34 = vpop.permute.xlu1 %1660 }
 0x3d5   : > { %v1664_v43 = vsel %vm574_vm8, %v1659_v62, %v3437_v34 }
 0x3d6   : > { %v3445_v11 = vadd.f32 %v1664_v43, %v1639_v38 }
 0x3d8   : > { %v3449_v40 = vpop.permute.xlu0 %1852  ;;  %v3451_v8 = vpop.permute.xlu1 %1850 }
 0x3dc   : > { %v3453_v4 = vpop.permute.xlu0 %1276  ;;  %v3455_v54 = vpop.permute.xlu1 %1854 }
 0x3dd   : > { %v1857_v52 = vsel %vm545_vm7, %v3449_v40, %v3455_v54 }
 0x3de   : > { %v3460_v33 = vadd.f32 %v1857_v52, %v1832_v55  ;;  %v724_v55 = vadd.f32 %v719_v58, %v2870_v57  ;;  %v839_v58 = vsel %vm632_vm10, %v3122_v32, %v3130_v27  ;;  %v1253_v27 = vsel %vm603_vm9, %v3419_v37, %v3417_v20 }
 0x3df   : > { %v1472_v20 = vsel %vm603_vm9, %v3427_v36, %v3425_v1  ;;  %v1665_v1 = vsel %vm574_vm8, %v3437_v34, %v3435_v59 }
 0x3e0   : > { %v1281_v29 = vpop.permute.xlu0 %1280  ;;  %v3462_v41 = vpop.permute.xlu1 %1278 }
 0x3e1   : > { %v1289_v62 = vadd.f32 %v1281_v29, %v1259_v48  ;;  %v754_v48 = vadd.f32 %v749_v26, %v724_v55 }
 0x3e3   : > { %v784_v60 = vadd.f32 %v779_v17, %v754_v48  ;;  %v3851_v48 = vld [vmem:[#allocation42_spill] sm:$0xff] }
 0x3e4   : > { %v3464_v61 = vpop.permute.xlu0 %1498  ;;  %v1497_v35 = vpop.permute.xlu1 %1496 }
 0x3e5   : > { %v1502_v36 = vsel %vm632_vm10, %v1497_v35, %v3464_v61 }
 0x3e8   : > { %v3466_v3 = vpop.permute.xlu0 %1688  ;;  %v3468_v50 = vpop.permute.xlu1 %1500 }
 0x3e9   : > { %v1509_v57 = vadd.f32 %v3468_v50, %v1479_v14 }
 0x3ec   : > { %v1693_v47 = vpop.permute.xlu0 %1692  ;;  %v3470_v38 = vpop.permute.xlu1 %1690 }
 0x3f0   : > { %v3472_v2 = vpop.permute.xlu0 %1882  ;;  %v3474_v44 = vpop.permute.xlu1 %1880 }
 0x3f4   : > { %v3476_v13 = vpop.permute.xlu0 %1306  ;;  %v3478_v19 = vpop.permute.xlu1 %1884 }
 0x3f8   : > { %v1311_v43 = vpop.permute.xlu0 %1310  ;;  %v3485_v49 = vpop.permute.xlu1 %1308 }
 0x3f9   : > { %v1319_v9 = vadd.f32 %v1311_v43, %v1289_v62  ;;  %v809_v62 = vsel %vm603_vm9, %v3110_v28, %v3112_v30  ;;  %v1313_v37 = vsel %vm661_vm11, %v3485_v49, %v1311_v43 }
 0x3fa   : > { %v814_v22 = vadd.f32 %v809_v62, %v784_v60  ;;  %v718_v62 = vsel %vm516_vm6, %v3851_v48, %v3062_v7  ;;  %v3853_v7 = vld [vmem:[#allocation23_spill] sm:$0xff]  ;;  %v1477_v48 = vadd.f32 %v1472_v20, %v3396_v31  ;;  %v3857_v20 = vld [vmem:[#allocation46_spill] sm:$0xff] }
 0x3fb   : > { %1333 = vrot.lane.b32.xlu0 %v1319_v9, %s2476_s20 }
 0x3fc   : > { %v3495_v52 = vpop.permute.xlu0 %1528  ;;  %v1527_v39 = vpop.permute.xlu1 %1526  ;;  %v844_v55 = vadd.f32 %v839_v58, %v814_v22  ;;  %v1283_v22 = vsel %vm632_vm10, %v3462_v41, %v1281_v29  ;;  %v3852_v58 = vld [vmem:[#allocation43_spill] sm:$0xff]  ;;  %v1671_v29 = vadd.f32 %v3435_v59, %v3404_v10  ;;  %v1695_v59 = vsel %vm603_vm9, %v3470_v38, %v1693_v47 }
 0x3fd   : > { %v1532_v34 = vsel %vm661_vm11, %v1527_v39, %v3495_v52 }
 0x3fe   : > { %v874_v17 = vadd.f32 %v869_v5, %v844_v55  ;;  %v723_v5 = vadd.f32 %v718_v62, %v3853_v7  ;;  %v1701_v62 = vadd.f32 %v1693_v47, %v1671_v29  ;;  %v1507_v7 = vadd.f32 %v1502_v36, %v1477_v48 }
 0x400   : > { %v3505_v9 = vpop.permute.xlu0 %1718  ;;  %v3507_v0 = vpop.permute.xlu1 %1530 }
 0x401   : > { %v1539_v26 = vadd.f32 %v3507_v0, %v1509_v57  ;;  %v1258_v57 = vadd.f32 %v1253_v27, %v3390_v12  ;;  %v3855_v12 = vld [vmem:[#allocation44_spill] sm:$0xff] }
 0x403   : > { %1555 = vrot.lane.b32.xlu1 %v1539_v26, %s2477_s26  ;;  %v748_v26 = vsel %vm545_vm7, %v3852_v58, %v3080_v56  ;;  %v1288_v55 = vadd.f32 %v1283_v22, %v1258_v57  ;;  %v778_v56 = vsel %vm574_vm8, %v3855_v12, %v3092_v42  ;;  %v3856_v57 = vld [vmem:[#allocation45_spill] sm:$0xff]  ;;  %v1795_v58 = vmul.f32 %v3433_v24, %v2755_v23  ;;  %v3858_v12 = vld [vmem:[#allocation47_spill] sm:$0xff] }
 0x404   : > { %v1723_v30 = vpop.permute.xlu0 %1722  ;;  %v3514_v14 = vpop.permute.xlu1 %1720  ;;  %v753_v10 = vadd.f32 %v748_v26, %v723_v5  ;;  %v808_v42 = vsel %vm603_vm9, %v3856_v57, %v3110_v28  ;;  %v1670_v26 = vadd.f32 %v1665_v1, %v3408_v18  ;;  %v838_v28 = vsel %vm632_vm10, %v3857_v20, %v3122_v32 }
 0x405   : > { %v1318_v22 = vadd.f32 %v1313_v37, %v1288_v55  ;;  %v1731_v31 = vadd.f32 %v1723_v30, %v1701_v62  ;;  %v1790_v37 = vmul.f32 %v3439_v46, %v2746_v15  ;;  %v1725_v47 = vsel %vm632_vm10, %v3514_v14, %v1723_v30 }
 0x406   : > { %v783_v35 = vadd.f32 %v778_v56, %v753_v10  ;;  %v1700_v55 = vadd.f32 %v1695_v59, %v1670_v26  ;;  %v868_v56 = vsel %vm661_vm11, %v3858_v12, %v3850_v63  ;;  %v1797_v32 = vmul.f32 %v3433_v24, %v2749_v21  ;;  %v3860_v12 = vld [vmem:[#allocation22_spill] sm:$0xff] }
 0x407   : > { %889 = vrot.lane.b32.xlu1 %v874_v17, %s2474_s13  ;;  %v3854_v17 = vld [vmem:[#allocation49_spill] sm:$0xff]  ;;  %v1798_v1 = vadd.f32 %v1795_v58, %v1790_v37  ;;  %v1856_v30 = vsel %vm545_vm7, %v3451_v8, %v3449_v40  ;;  %v1792_v63 = vmul.f32 %v3439_v46, %v2762_v6  ;;  %v1886_v57 = vsel %vm574_vm8, %v3474_v44, %v3472_v2 }
 0x408   : > { %v3525_v25 = vpop.permute.xlu0 %1912  ;;  %v1911_v60 = vpop.permute.xlu1 %1910  ;;  %v813_v39 = vadd.f32 %v808_v42, %v783_v35  ;;  %v1730_v48 = vadd.f32 %v1725_v47, %v1700_v55  ;;  %v1282_v6 = vsel %vm632_vm10, %v3453_v4, %v3462_v41  ;;  %v1503_v4 = vsel %vm632_vm10, %v3464_v61, %v3468_v50 }
 0x409   : > { %v1831_v62 = vadd.f32 %v3411_v51, %v1798_v1  ;;  %v1800_v40 = vadd.f32 %v1797_v32, %v1792_v63  ;;  %v1916_v58 = vsel %vm603_vm9, %v1911_v60, %v3525_v25  ;;  %v1312_v60 = vsel %vm661_vm11, %v3476_v13, %v3485_v49 }
 0x40a   : > { %v843_v10 = vadd.f32 %v838_v28, %v813_v39  ;;  %v1694_v13 = vsel %vm603_vm9, %v3466_v3, %v3470_v38  ;;  %v1508_v61 = vadd.f32 %v1503_v4, %v3431_v53  ;;  %v1887_v47 = vsel %vm574_vm8, %v3472_v2, %v3478_v19  ;;  %v3871_v4 = vld [vmem:[#allocation30_spill] sm:$0xff] }
 0x40b   : > { %1109 = vrot.lane.b32.xlu1 %v3854_v17, %s2475_s22  ;;  %v1537_v17 = vadd.f32 %v1532_v34, %v1507_v7  ;;  %v1861_v8 = vadd.f32 %v1856_v30, %v1831_v62  ;;  %v1833_v51 = vadd.f32 %v3413_v45, %v1800_v40  ;;  %v1287_v7 = vadd.f32 %v1282_v6, %v3423_v16  ;;  %v3859_v45 = vld [vmem:[#allocation50_spill] sm:$0xff]  ;;  %v3865_v40 = vld [vmem:[#allocation24_spill] sm:$0xff] }
 0x40c   : > { %v3549_v43 = vpop.permute.xlu0 %1748  ;;  %v3551_v27 = vpop.permute.xlu1 %1914  ;;  %v873_v24 = vadd.f32 %v868_v56, %v843_v10  ;;  %v1533_v16 = vsel %vm661_vm11, %v3495_v52, %v3507_v0  ;;  %v1724_v3 = vsel %vm632_vm10, %v3505_v9, %v3514_v14  ;;  %v1699_v52 = vadd.f32 %v1694_v13, %v3445_v11  ;;  %v3862_v30 = vld [vmem:[#allocation26_spill] sm:$0xff] }
 0x40d   : > { %v1891_v46 = vadd.f32 %v1886_v57, %v1861_v8  ;;  %v1863_v35 = vadd.f32 %v3455_v54, %v1833_v51  ;;  %v1317_v28 = vadd.f32 %v1312_v60, %v1287_v7  ;;  %v1538_v0 = vadd.f32 %v1533_v16, %v1508_v61 }
 0x40e   : > { %v1917_v53 = vsel %vm603_vm9, %v3525_v25, %v3551_v27  ;;  %v1892_v2 = vadd.f32 %v1887_v47, %v3460_v33  ;;  %v487_v33 = vstv %s2156_s9  ;;  %v3876_v47 = vld [vmem:[#allocation37_spill] sm:$0xff] }
 0x40f   : > { %1331 = vrot.lane.b32.xlu1 %v1318_v22, %s2476_s20  ;;  %v1921_v26 = vadd.f32 %v1916_v58, %v1891_v46  ;;  %v1893_v41 = vadd.f32 %v3478_v19, %v1863_v35  ;;  %v1729_v19 = vadd.f32 %v1724_v3, %v1699_v52  ;;  %v489_v56 = vmul.f32 %v487_v33, %v3860_v12  ;;  %v3866_v58 = vld [vmem:[#allocation29_spill] sm:$0xff] }
 0x410   : > { %v1753_v5 = vpop.permute.xlu0 %1752  ;;  %v1751_v29 = vpop.permute.xlu1 %1750  ;;  %v1922_v14 = vadd.f32 %v1917_v53, %v1892_v2  ;;  %v488_v32 = vmul.f32 %v487_v33, %v2755_v23  ;;  %v3867_v23 = vld [vmem:[#allocation28_spill] sm:$0xff] }
 0x411   : > { %v1761_v18 = vadd.f32 %v1753_v5, %v1731_v31  ;;  %v1755_v36 = vsel %vm661_vm11, %v1751_v29, %v1753_v5  ;;  %v1923_v49 = vadd.f32 %v3551_v27, %v1893_v41  ;;  %v1754_v5 = vsel %vm661_vm11, %v3549_v43, %v1751_v29 }
 0x412   : > { %v1760_v42 = vadd.f32 %v1755_v36, %v1730_v48  ;;  %v1759_v55 = vadd.f32 %v1754_v5, %v1729_v19  ;;  %v3861_v36 = vld [vmem:[#allocation21_spill] sm:$0xff]  ;;  %v547_v51 = vsel %vm545_vm7, %v3867_v23, %v3866_v58 }
 0x413   : > { %1777 = vrot.lane.b32.xlu0 %v1761_v18, %s2478_s11  ;;  %1551 = vrot.lane.b32.xlu1 %v1537_v17, %s2477_s26  ;;  %v483_v18 = vstv %s482_s5  ;;  %v3863_v48 = vld [vmem:[#allocation25_spill] sm:$0xff] }
 0x414   : > { %v1943_v22 = vpop.permute.xlu0 %1942  ;;  %v1941_v21 = vpop.permute.xlu1 %1940  ;;  %v485_v10 = vmul.f32 %v483_v18, %v3861_v36  ;;  %v518_v62 = vsel %vm516_vm6, %v3863_v48, %v3862_v30  ;;  %v484_v63 = vmul.f32 %v483_v18, %v2746_v15  ;;  %v517_v8 = vsel %vm516_vm6, %v3865_v40, %v3863_v48  ;;  %v3878_v19 = vld [vmem:[#allocation41_spill] sm:$0xff]  ;;  %v3880_v18 = vld [vmem:[#allocation39_spill] sm:$0xff] }
 0x415   : > { %v1946_v44 = vsel %vm632_vm10, %v1941_v21, %v1943_v22 }
 0x416   : > { %v1951_v31 = vadd.f32 %v1946_v44, %v1921_v26  ;;  %v490_v6 = vadd.f32 %v488_v32, %v484_v63  ;;  %v3869_v44 = vld [vmem:[#allocation32_spill] sm:$0xff] }
 0x417   : > { %887 = vrot.lane.b32.xlu0 %v873_v24, %s2474_s13  ;;  %1775 = vrot.lane.b32.xlu1 %v1760_v42, %s2478_s11  ;;  %v3864_v24 = vld [vmem:[#allocation11_spill] sm:$0xff]  ;;  %s2391_s13 = scalar_lea.vmem %s3723_s8, 1024 }
 0x418   : > { %v1945_v59 = vpop.permute.xlu1 %1944  ;;  %v1971_v34 = vpop.permute.xlu0 %1970  ;;  %v457_v57 = vadd.s32 128, %v3864_v24  ;;  %v521_v60 = vadd.f32 %v517_v8, %v490_v6  ;;  %p2392_p5 = scmp.ne.s32.totalorder %s3723_s8, %s2391_s13 }
 0x419   : > { %v1953_v38 = vadd.f32 %v1945_v59, %v1923_v49  ;;  %v1947_v9 = vsel %vm632_vm10, %v1943_v22, %v1945_v59  ;;  %v491_v22 = vadd.f32 %v489_v56, %v485_v10  ;;  %v3868_v59 = vld [vmem:[#allocation27_spill] sm:$0xff]  ;;  %v3671_v49 = vand.u32 15, %v3864_v24 }
 0x41a   : > { %v1952_v17 = vadd.f32 %v1947_v9, %v1922_v14  ;;  %v546_v15 = vsel %vm545_vm7, %v3868_v59, %v3867_v23  ;;  %v3660_v7 = vand.u32 15, %v457_v57  ;;  %v3879_v9 = vld [vmem:[#allocation40_spill] sm:$0xff]  ;;  %p2393_p8 = pnand %p2392_p5, %p3890_p12 }
 0x41b   : > { %1111 = vrot.lane.b32.xlu0 %v3859_v45, %s2475_s22  ;;  %v522_v46 = vadd.f32 %v518_v62, %v491_v22  ;;  %v663_v14 = vsel %vm661_vm11, %v3879_v9, %v3878_v19  ;;  %v668_v33 = vadd.s32 4294967293, %v3671_v49  ;;  %v662_v12 = vsel %vm661_vm11, %v3880_v18, %v3879_v9  ;;  %s2480_s22 = smov [#allocation7]  }
 0x41c   : > { %v1973_v20 = vpop.permute.xlu1 %1972  ;;  %v1975_v50 = vpop.permute.xlu0 %1974  ;;  %v669_v53 = vadd.s32 4294967293, %v3660_v7  ;;  %v1098_v32 = vadd.s32 4294967295, %v3671_v49  ;;  %v1540_v6 = vadd.s32 1, %v3671_v49  ;;  %p2394_p9 = pneg %p2393_p8  ;;  %s2395_s23 = sshll.u32 %s2480_s22, 4  ;;  %s2396_s23 = int_to_ptr.vmem [resolvable:$false] %s2395_s23 }
 0x41d   : > { %v1976_v54 = vsel %vm661_vm11, %v1971_v34, %v1973_v20  ;;  %v1983_v39 = vadd.f32 %v1975_v50, %v1953_v38  ;;  %v1977_v11 = vsel %vm661_vm11, %v1973_v20, %v1975_v50  ;;  %v3870_v34 = vld [vmem:[#allocation31_spill] sm:$0xff]  ;;  %v551_v26 = vadd.f32 %v547_v51, %v522_v46  ;;  %v3873_v20 = vld [vmem:[#allocation34_spill] sm:$0xff]  ;;  %s2397_s10 = scalar_lea.vmem %s2396_s23, 2048  ;;  %p2398_p10 = scmp.lt.s32.totalorder %s3723_s8, %s2396_s23 }
 0x41e   : > { %v1981_v37 = vadd.f32 %v1976_v54, %v1951_v31  ;;  %v1982_v25 = vadd.f32 %v1977_v11, %v1952_v17  ;;  %v576_v35 = vsel %vm574_vm8, %v3870_v34, %v3869_v44  ;;  %v575_v41 = vsel %vm574_vm8, %v3871_v4, %v3870_v34  ;;  %v3872_v31 = vld [vmem:[#allocation35_spill] sm:$0xff]  ;;  %v3875_v50 = vld [vmem:[#allocation38_spill] sm:$0xff]  ;;  %p2399_p1 = scmp.lt.s32.totalorder %s2397_s10, %s2391_s13 }
 0x41f   : > { %1329 = vrot.lane.b32.xlu0 %v1317_v28, %s2476_s20  ;;  %v605_v28 = vsel %vm603_vm9, %v3873_v20, %v3872_v31  ;;  %v550_v54 = vadd.f32 %v546_v15, %v521_v60  ;;  %v580_v13 = vadd.f32 %v576_v35, %v551_v26  ;;  %v634_v3 = vsel %vm632_vm10, %v3876_v47, %v3875_v50 }
 0x420   : > { %1995 = vrot.lane.b32.xlu1 %v1981_v37, %s2479_s29  ;;  %v1114_v27 = vpop.permute.xlu1 %1113  ;;  %v892_v1 = vpop.permute.xlu0 %891  ;;  %v3874_v37 = vld [vmem:[#allocation33_spill] sm:$0xff]  ;;  %v877_v38 = vadd.s32 4294967294, %v3660_v7  ;;  %v1099_v11 = vadd.s32 4294967295, %v3660_v7  ;;  %vm671_vm15 = vcmp.ge.s32.totalorder %v669_v53, 0  ;;  %vm670_vm2 = vcmp.ge.s32.totalorder %v668_v33, 0  ;;  %p2400_p4 = por %p2399_p1, %p2398_p10 }
 0x421   : > { %v604_v61 = vsel %vm603_vm9, %v3874_v37, %v3873_v20  ;;  %v579_v52 = vadd.f32 %v575_v41, %v550_v54  ;;  %vm1100_vm3 = vcmp.ge.s32.totalorder %v1098_v32, 0  ;;  %v1762_v44 = vadd.s32 2, %v3671_v49  ;;  %v3881_v32 = vld [vmem:[#allocation12_spill] sm:$0xff] }
 0x422   : > { %vm879_vm14 = vcmp.ge.s32.totalorder %v877_v38, 0  ;;  %vm1101_vm1 = vcmp.ge.s32.totalorder %v1099_v11, 0  ;;  %vm1544_vm7 = vcmp.lt.s32.totalorder %v1540_v6, 16  ;;  %vm1779_vm8 = vcmask 1006592   ;;  %p2401_p11 = pnand %p2400_p4, %p2394_p9 }
 0x423   : > { %1553 = vrot.lane.b32.xlu0 %v1538_v0, %s2477_s26  ;;  %v609_v0 = vadd.f32 %v605_v28, %v580_v13  ;;  %v608_v17 = vadd.f32 %v604_v61, %v579_v52  ;;  %vm1766_vm9 = vcmp.lt.s32.totalorder %v1762_v44, 16  ;;  %v1984_v54 = vadd.s32 3, %v3671_v49 }
 0x424   : > { %1999 = vrot.lane.b32.xlu1 %v1983_v39, %s2479_s29  ;;  %v3877_v39 = vld [vmem:[#allocation36_spill] sm:$0xff]  ;;  %v1985_v13 = vadd.s32 3, %v3660_v7  ;;  %vm2001_vm11 = vcmask 998400  }
 0x425   : > { %v633_v2 = vsel %vm632_vm10, %v3877_v39, %v3876_v47 }
 0x426   : > { %v637_v36 = vadd.f32 %v633_v2, %v608_v17 }
 0x427   : > { %1773 = vrot.lane.b32.xlu0 %v1759_v55, %s2478_s11  ;;  %v876_v55 = vadd.s32 4294967294, %v3671_v49 }
 0x428   : > { %v666_v22 = vadd.f32 %v662_v12, %v637_v36 }
 0x429   : > { %vm878_vm0 = vcmp.ge.s32.totalorder %v876_v55, 0 }
 0x42b   : > { %1997 = vrot.lane.b32.xlu0 %v1982_v25, %s2479_s29  ;;  %v638_v25 = vadd.f32 %v634_v3, %v609_v0 }
 0x42d   : > { %v667_v10 = vadd.f32 %v663_v14, %v638_v25 }
 0x42f   : > { %v677_v40 = vsel %vm671_vm15, %v667_v10, 0.0 }
 0x46d   : > { %v3645_v21 = vpop.permute.xlu0 %1333 }
 0x475   : > { %v3636_v43 = vpop.permute.xlu1 %1555 }
 0x479   : > { %v890_v29 = vpop.permute.xlu1 %889 }
 0x47a   : > { %v895_v56 = vsel %vm893_vm12, %v890_v29, %v892_v1  ;;  %v1541_v1 = vadd.s32 1, %v3660_v7 }
 0x47b   : > { %v899_v24 = vsel %vm879_vm14, %v895_v56, 0.0 }
 0x47c   : > { %v901_v51 = vadd.f32 %v899_v24, %v677_v40  ;;  %vm1545_vm6 = vcmp.lt.s32.totalorder %v1541_v1, 16  ;;  %v3886_v40 = vld [vmem:[#allocation16_spill] sm:$0xff] }
 0x47d   : > { %v1110_v42 = vpop.permute.xlu1 %1109 }
 0x481   : > { %v1332_v16 = vpop.permute.xlu1 %1331 }
 0x482   : > { %v1337_v4 = vsel %vm1335_vm4, %v1332_v16, %v3645_v21 }
 0x485   : > { %v3662_v45 = vpop.permute.xlu0 %1777  ;;  %v1552_v30 = vpop.permute.xlu1 %1551 }
 0x489   : > { %v888_v5 = vpop.permute.xlu0 %887  ;;  %v1776_v46 = vpop.permute.xlu1 %1775 }
 0x48a   : > { %v894_v62 = vsel %vm893_vm12, %v888_v5, %v890_v29  ;;  %v676_v29 = vsel %vm670_vm2, %v666_v22, 0.0  ;;  %v1781_v50 = vsel %vm1779_vm8, %v1776_v46, %v3662_v45  ;;  %vm1988_vm12 = vcmp.lt.s32.totalorder %v1984_v54, 16  ;;  %v3884_v22 = vld [vmem:[#allocation17_spill] sm:$0xff] }
 0x48b   : > { %v898_v8 = vsel %vm878_vm0, %v894_v62, 0.0  ;;  %v3883_v62 = vld [vmem:[#allocation13_spill] sm:$0xff] }
 0x48d   : > { %v1112_v48 = vpop.permute.xlu0 %1111 }
 0x48e   : > { %v1117_v63 = vsel %vm1115_vm13, %v1112_v48, %v1114_v27  ;;  %v1116_v57 = vsel %vm1115_vm13, %v1110_v42, %v1112_v48  ;;  %v900_v27 = vadd.f32 %v898_v8, %v676_v29  ;;  %v1763_v42 = vadd.s32 2, %v3660_v7  ;;  %v3889_v29 = vld [vmem:[#allocation20_spill] sm:$0xff] }
 0x48f   : > { %v1121_v58 = vsel %vm1101_vm1, %v1117_v63, 0.0  ;;  %v1120_v59 = vsel %vm1100_vm3, %v1116_v57, 0.0  ;;  %vm1989_vm13 = vcmp.lt.s32.totalorder %v1985_v13, 16  ;;  %v3885_v57 = vld [vmem:[#allocation19_spill] sm:$0xff] }
 0x490   : > { %v1123_v15 = vadd.f32 %v1121_v58, %v901_v51  ;;  %v1122_v35 = vadd.f32 %v1120_v59, %v900_v27  ;;  %vm1767_vm10 = vcmp.lt.s32.totalorder %v1763_v42, 16  ;;  %v3887_v58 = vld [vmem:[#allocation14_spill] sm:$0xff] }
 0x491   : > { %v1330_v23 = vpop.permute.xlu0 %1329  ;;  %v3888_v51 = vld [vmem:[#allocation18_spill] sm:$0xff] }
 0x492   : > { %v1336_v41 = vsel %vm1335_vm4, %v1330_v23, %v1332_v16  ;;  %v1996_v31 = vpop.permute.xlu1 %1995  ;;  %v1343_v28 = vadd.f32 %v1337_v4, %v1123_v15  ;;  %v1785_v16 = vsel %vm1767_vm10, %v1781_v50, 0.0 }
 0x495   : > { %v1554_v34 = vpop.permute.xlu0 %1553 }
 0x496   : > { %v1558_v60 = vsel %vm1557_vm5, %v1552_v30, %v1554_v34  ;;  %v1559_v26 = vsel %vm1557_vm5, %v1554_v34, %v3636_v43  ;;  %v1342_v43 = vadd.f32 %v1336_v41, %v1122_v35  ;;  %v2000_v52 = vpop.permute.xlu1 %1999  ;;  %v3882_v30 = vld [vmem:[#allocation15_spill] sm:$0xff] }
 0x497   : > { %v1563_v20 = vsel %vm1545_vm6, %v1559_v26, 0.0  ;;  %v1562_v37 = vsel %vm1544_vm7, %v1558_v60, 0.0 }
 0x498   : > { %v1565_v47 = vadd.f32 %v1563_v20, %v1343_v28  ;;  %v1564_v38 = vadd.f32 %v1562_v37, %v1342_v43 }
 0x499   : > { %v1774_v61 = vpop.permute.xlu0 %1773 }
 0x49a   : > { %v1780_v3 = vsel %vm1779_vm8, %v1774_v61, %v1776_v46  ;;  %v1787_v49 = vadd.f32 %v1785_v16, %v1565_v47 }
 0x49b   : > { %v1784_v21 = vsel %vm1766_vm9, %v1780_v3, 0.0 }
 0x49c   : > { %v1786_v53 = vadd.f32 %v1784_v21, %v1564_v38 }
 0x49d   : > { %v1998_v0 = vpop.permute.xlu0 %1997 }
 0x49e   : > { %v2002_v5 = vsel %vm2001_vm11, %v1996_v31, %v1998_v0  ;;  %v2003_v7 = vsel %vm2001_vm11, %v1998_v0, %v2000_v52 }
 0x49f   : > { %v2006_v39 = vsel %vm1988_vm12, %v2002_v5, 0.0  ;;  %v2007_v2 = vsel %vm1989_vm13, %v2003_v7, 0.0 }
 0x4a0   : > { %v2008_v19 = vadd.f32 %v2006_v39, %v1786_v53  ;;  %v2009_v45 = vadd.f32 %v2007_v2, %v1787_v49 }
 0x4a2   : > { %v2010_v9 = vsub.f32 0.0, %v2008_v19  ;;  %v2011_v14 = vsub.f32 0.0, %v2009_v45 }
 0x4a4   : > { %v2012_v55 = vmul.f32 1.442695, %v2010_v9  ;;  %v2014_v11 = vmul.f32 1.442695, %v2011_v14 }
 0x4a6   : > { %2338 = vpow2.f32 %v2012_v55 }
 0x4a7   : > { %2340 = vpow2.f32 %v2014_v11 }
 0x4b0   : > { %v2339_v17 = vpop.eup %2338 }
 0x4b1   : > { %v2341_v25 = vpop.eup %2340  ;;  %v2016_v33 = vadd.f32 1.0, %v2339_v17 }
 0x4b2   : > { %v2017_v18 = vadd.f32 1.0, %v2341_v25 }
 0x4b3   : > { %2342 = vrcp.f32 %v2016_v33 }
 0x4b4   : > { %2344 = vrcp.f32 %v2017_v18 }
 0x4bd   : > { %v2343_v12 = vpop.eup %2342 }
 0x4be   : > { %v2345_v56 = vpop.eup %2344  ;;  %v2025_v36 = vrot.slane %v2343_v12, %v3881_v32 }
 0x4bf   : > { %v2029_v10 = vrot.slane %v2345_v56, %v3881_v32 }
 0x4c0   : > { %v2030_v48 = vmul.f32 %v2025_v36, %v3882_v30  ;;  %v2032_v63 = vmul.f32 %v2025_v36, %v3883_v62  ;;  %v2034_v24 = vmul.f32 %v2025_v36, %v3884_v22  ;;  %v2036_v1 = vmul.f32 %v2025_v36, %v3885_v57 }
 0x4c1   : > { %v2031_v8 = vmul.f32 %v2029_v10, %v3886_v40  ;;  %v2033_v23 = vmul.f32 %v2029_v10, %v3887_v58  ;;  %v2035_v6 = vmul.f32 %v2029_v10, %v3888_v51  ;;  %v2037_v46 = vmul.f32 %v2029_v10, %v3889_v29 }
 0x4c2   : > { %2038 = vst [vmem:[%s229_s12] sm:$0xff] %v2030_v48  ;;  %2040 = vst [vmem:[%s229_s12 + $0x10] sm:$0xff] %v2032_v63 }
 0x4c3   : > { %2042 = vst [vmem:[%s229_s12 + $0x20] sm:$0xff] %v2034_v24  ;;  %2044 = vst [vmem:[%s229_s12 + $0x30] sm:$0xff] %v2036_v1 }
 0x4c4   : > { %2039 = vst [vmem:[%s229_s12 + $0x8] sm:$0xff] %v2031_v8  ;;  %2041 = vst [vmem:[%s229_s12 + $0x18] sm:$0xff] %v2033_v23 }
 0x4c5   : > { %2043 = vst [vmem:[%s229_s12 + $0x28] sm:$0xff] %v2035_v6  ;;  %2045 = vst [vmem:[%s229_s12 + $0x38] sm:$0xff] %v2037_v46 }
 0x4c6   : > { %2404 = shalt.err (!%p2401_p11)
}
 0x4c7   : > { %s2405_s20 = scalar_lea.hbm %s3721_s19, 1024  ;;  %s2409_s29 = scalar_lea.hbm %s3775_s4, 2048 }
 0x4c8   : > { %p2406_p0 = scmp.ne.s32.totalorder %s3721_s19, %s2405_s20  ;;  %p2410_p6 = scmp.lt.u32.totalorder %s3721_s19, %s3775_s4 }
 0x4c9   : > { %p2411_p3 = scmp.lt.u32.totalorder %s2409_s29, %s2405_s20  ;;  %p2413_p5 = scmp.lt.u32.totalorder %s2405_s20, %s3721_s19 }
 0x4ca   : > { %p2407_p2 = pnand %p2406_p0, %p3890_p12 }
 0x4cb   : > { %p2412_p13 = por %p2411_p3, %p2410_p6 }
 0x4cc   : > { %p2408_p7 = pneg %p2407_p2 }
 0x4cd   : > { %p2414_p8 = por %p2413_p5, %p2412_p13 }
 0x4cf   : > { %p2415_p9 = pnand %p2414_p8, %p2408_p7 }
 0x4d1   : > { %2418 = shalt.err (!%p2415_p9)
}
 0x4d2   : > { %s2481_s25 = smov 256   ;;  %s2482_s12 = smov 16  }
 0x4d3   : > { %2266 = dma.vmem_to_hbm [thread:$0]  (%p3890_p12), %s3723_s8, 1024, %s3721_s19, %s2047_s7, %s2481_s25, %s2481_s25, %s2482_s12  }
 0x4d4 PF: > { %s2075_s30 = sand.u32 1, %s2449_s15   ;;  %p3891_p10 = scmp.ne.s32.totalorder %s3803_s28, 0 }
 0x4d5   : > { %p3892_p1 = scmp.ge.s32.totalorder %s2461_s18, 2  ;;  %s2076_s14 = scalar_lea.sflag [#allocation4], %s2075_s30 }
 0x4d7   : > { %p2277_p4 = pnand %p3892_p1, %p3891_p10 }
 0x4d9   : > { %2444 = dma.done.wait (!%p2277_p4), %s2076_s14, 1024  }
 0x4da   : > { %2446 = vsyncadd (!%p2277_p4), %s2076_s14, 4294966272  ;;  %p18_p11 = scmp.ge.s32.totalorder %s2533_s21, 4   ;;  %s3893_s15 = smov %s2453_s16 }
 0x4db   : > { %s3894_s16 = smov %s2457_s17  ;;  %s3895_s17 = smov %s2545_s24 }
 0x4dc   : > { %s3896_s18 = smov %s2533_s21  ;;  %20 = sbr.rel (!%p18_p11) target bundleno = 6 (0x6), region = 86 }
 0x4e3   :  { %2081 = vsyncpa [#allocation3], 1 }
 0x4e4   :  { %2083 = vsyncpa [#allocation3 + $0x1], 1 }
 0x4e5   :  { %2084 = vsyncpa [#allocation4], 1 }
 0x4e6   :  { %2086 = vsyncpa [#allocation4 + $0x1], 1 }
 0x4e7   :  { %2087 = vsyncpa [#allocation5], 1 }
 0x4e8   :  { %2089 = vsyncpa [#allocation5 + $0x1], 1 }

</bundles_post_ra>
